<compile_context>
chip_gen: v7x
topology: tpu7x:2x2x1
jax: 0.10.0
libtpu: 0.0.40
codegen_flags: <defaults>
</compile_context>

<pallas_src>
import jax
import jax.numpy as jnp
from jax import lax
from jax.experimental import pallas as pl
from jax.experimental.pallas import tpu as pltpu

K_DW = 21                  # depthwise kernel size in UConvBlock (kSize=21)
PAD = K_DW // 2            # 10 samples of left (past) context
NTAPS = K_DW - K_DW // 2   # 11 taps survive the ScaledWSConv1d causal mask


def _prelu(y, a):
    return jnp.where(y >= 0.0, y, a * y)


def _upsample2_matrix(t_in):
    """(t_in, 2*t_in) 0/1 matrix: U[j, t] = 1 iff t//2 == j (nearest upsample x2)."""
    rows = lax.broadcasted_iota(jnp.int32, (t_in, 2 * t_in), 0)
    cols = lax.broadcasted_iota(jnp.int32, (t_in, 2 * t_in), 1)
    d = cols - 2 * rows
    return jnp.where((d == 0) | (d == 1), 1.0, 0.0).astype(jnp.float32)


def _decimate2_matrix(t_in):
    """(t_in, t_in//2) 0/1 matrix: D[t, j] = 1 iff t == 2*j (keep even samples)."""
    rows = lax.broadcasted_iota(jnp.int32, (t_in, t_in // 2), 0)
    cols = lax.broadcasted_iota(jnp.int32, (t_in, t_in // 2), 1)
    return jnp.where(rows == 2 * cols, 1.0, 0.0).astype(jnp.float32)


# -----------------------------------------------------------------------------
# Fused UConvBlock kernel: one batch element per grid step, channels on the
# sublane axis, time on the lane axis.  All stages stay in VMEM.
# -----------------------------------------------------------------------------
def _uconv_block_kernel(alpha_ref, wp_ref, bp_ref, wd_ref, bd_ref,
                        wr_ref, br_ref, x_ref, o_ref, *pads):
    depth = wd_ref.shape[0]
    ci = wd_ref.shape[1]
    t_len = x_ref.shape[-1]

    x = x_ref[...]                                                   # (Co, T)

    # proj_1x1 (weights pre-divided by beta) + bias + PReLU  -> (Ci, T)
    y = jnp.dot(wp_ref[...], x, preferred_element_type=jnp.float32) + bp_ref[...]
    last = _prelu(y, alpha_ref[0])

    # Depthwise causal pyramid.  pads[l] holds the left-zero-padded input of
    # conv level l; only the 11 causally-unmasked taps are accumulated.
    for lvl in range(depth):
        l_in = t_len >> max(lvl - 1, 0)
        buf = pads[lvl]                                              # (Ci, PAD + l_in)
        buf[:, :PAD] = jnp.zeros((ci, PAD), jnp.float32)
        buf[:, PAD:] = last
        w_l = wd_ref[lvl]                                            # (Ci, NTAPS)
        acc = jnp.zeros((ci, l_in), jnp.float32)
        for t in range(NTAPS):                                       # static unroll
            acc = acc + w_l[:, t:t + 1] * buf[:, t:t + l_in]
        y_full = _prelu(acc + bd_ref[lvl], alpha_ref[lvl + 1])       # full-rate output
        if lvl == 0:
            last = y_full                                            # stride 1
        else:
            # stride-2 level == decimation of the full-rate output; done as a
            # 0/1 selection matmul on the idle MXU (robust, no strided slices).
            last = jnp.dot(y_full, _decimate2_matrix(l_in),
                           preferred_element_type=jnp.float32)       # (Ci, l_in//2)

    # Merge: nearest-neighbour 2x upsample (0/1 matmul) + add, deepest first.
    # Level lvl's output (lvl <= depth-2) already sits in pads[lvl+1][:, PAD:].
    m = last                                                         # (Ci, T >> (depth-1))
    for lvl in range(depth - 2, -1, -1):
        t_half = t_len >> (lvl + 1)
        up = jnp.dot(m, _upsample2_matrix(t_half),
                     preferred_element_type=jnp.float32)             # (Ci, T >> lvl)
        m = pads[lvl + 1][:, PAD:] + up

    # res_conv (weights pre-scaled by skipinit_gain * alpha) + residual
    res = jnp.dot(wr_ref[...], m, preferred_element_type=jnp.float32) + br_ref[...]
    o_ref[...] = res + x


def uconv_block_forward(x, params):
    """UConvBlock forward.  x: (B, out_channels, T) -> (B, out_channels, T)."""
    B, Co, T = x.shape
    depth = len(params['w_dw'])
    Ci = params['w_proj'].shape[0]
    assert T % (2 ** (depth - 1)) == 0, "T must be divisible by 2**(depth-1)"

    # Fold scalars into the 1x1 weights (no runtime scalar passes):
    #   proj(x/beta) == (W/beta) @ x + b ; res(m)*gain*alpha == (W*g*a) @ m + b*g*a
    wp = (params['w_proj'] / params['beta']).astype(jnp.float32)         # (Ci, Co)
    bp = params['b_proj'].reshape(Ci, 1).astype(jnp.float32)
    ga = params['gain'] * params['alpha']
    wr = (params['w_res'] * ga).astype(jnp.float32)                      # (Co, Ci)
    br = (params['b_res'] * ga).reshape(Co, 1).astype(jnp.float32)
    # ScaledWSConv1d causal mask zeroes taps >= NTAPS, so only ship active taps.
    wd = jnp.stack([w[:, :NTAPS] for w in params['w_dw']]).astype(jnp.float32)
    bd = jnp.stack([b.reshape(Ci, 1) for b in params['b_dw']]).astype(jnp.float32)
    alphas = jnp.asarray([params['a_proj']] + list(params['a_dw']), jnp.float32)

    # Left-padded per-level scratch (conv-level input lengths: T, T, T/2, ...).
    in_lens = [T >> max(l - 1, 0) for l in range(depth)]
    scratch = [pltpu.VMEM((Ci, PAD + L), jnp.float32) for L in in_lens]

    return pl.pallas_call(
        _uconv_block_kernel,
        out_shape=jax.ShapeDtypeStruct((B, Co, T), jnp.float32),
        grid=(B,),
        in_specs=[
            pl.BlockSpec(memory_space=pltpu.MemorySpace.SMEM),             # alphas
            pl.BlockSpec((Ci, Co), lambda b: (0, 0)),                      # wp
            pl.BlockSpec((Ci, 1), lambda b: (0, 0)),                       # bp
            pl.BlockSpec((depth, Ci, NTAPS), lambda b: (0, 0, 0)),         # wd
            pl.BlockSpec((depth, Ci, 1), lambda b: (0, 0, 0)),             # bd
            pl.BlockSpec((Co, Ci), lambda b: (0, 0)),                      # wr
            pl.BlockSpec((Co, 1), lambda b: (0, 0)),                       # br
            pl.BlockSpec((None, Co, T), lambda b: (b, 0, 0)),              # x
        ],
        out_specs=pl.BlockSpec((None, Co, T), lambda b: (b, 0, 0)),
        scratch_shapes=scratch,
        compiler_params=pltpu.CompilerParams(dimension_semantics=("parallel",)),
    )(alphas, wp, bp, wd, bd, wr, br, x)


# -----------------------------------------------------------------------------
# Deterministic parameters (shapes follow UConvBlock.__init__)
# -----------------------------------------------------------------------------
def make_params(key, cfg):
    Co, Ci, depth = cfg['out_channels'], cfg['in_channels'], cfg['upsampling_depth']
    keys = iter(jax.random.split(key, 4 * depth + 8))

    def nrm(shape, scale=0.2):
        return (scale * jax.random.normal(next(keys), shape)).astype(jnp.float32)

    return {
        'w_proj': nrm((Ci, Co)), 'b_proj': nrm((Ci,), 0.05), 'a_proj': 0.25,
        'w_dw': [nrm((Ci, K_DW)) for _ in range(depth)],
        'b_dw': [nrm((Ci,), 0.05) for _ in range(depth)],
        'a_dw': [0.25] * depth,
        'w_res': nrm((Co, Ci)), 'b_res': nrm((Co,), 0.05),
        # PyTorch inits skipinit_gain to 0 (block == identity at init); use a
        # non-zero value so the whole U-Conv path is exercised by the check.
        'gain': 0.5,
        'alpha': 1.0, 'beta': 1.0,     # UConvBlock defaults
    }


# -----------------------------------------------------------------------------
# Pure-JAX (lax.conv, HIGHEST precision) reference of UConvBlock.forward
# -----------------------------------------------------------------------------
def reference_uconv_block(x, params):
    depth = len(params['w_dw'])
    Ci, K = params['w_dw'][0].shape
    mask = jnp.ones((K,), jnp.float32).at[K - K // 2:].set(0.0)   # causal mask

    def conv1d(v, w, b, stride=1, padding=0, groups=1):
        y = lax.conv_general_dilated(v, w, (stride,), [(padding, padding)],
                                     dimension_numbers=('NCH', 'OIH', 'NCH'),
                                     feature_group_count=groups,
                                     precision=lax.Precision.HIGHEST)
        return y + b[None, :, None]

    prelu = lambda v, a: jnp.where(v >= 0.0, v, a * v)
    residual = x
    o = prelu(conv1d(x / params['beta'], params['w_proj'][:, :, None],
                     params['b_proj']), params['a_proj'])
    pad_dw = (K - 1) // 2
    outs = [prelu(conv1d(o, (params['w_dw'][0] * mask)[:, None, :], params['b_dw'][0],
                         stride=1, padding=pad_dw, groups=Ci), params['a_dw'][0])]
    for k in range(1, depth):
        outs.append(prelu(conv1d(outs[-1], (params['w_dw'][k] * mask)[:, None, :],
                                 params['b_dw'][k], stride=2, padding=pad_dw,
                                 groups=Ci), params['a_dw'][k]))
    for _ in range(depth - 1):
        top = outs.pop()
        outs[-1] = outs[-1] + jnp.repeat(top, 2, axis=-1)
    y = conv1d(outs[-1], params['w_res'][:, :, None], params['b_res'])
    return y * params['gain'] * params['alpha'] + residual


# -----------------------------------------------------------------------------
if __name__ == "__main__":
    cfg = dict(out_channels=16, in_channels=32, upsampling_depth=4)
    B, T = 2, 128
    key = jax.random.PRNGKey(0)
    pkey, xkey = jax.random.split(key)
    params = make_params(pkey, cfg)
    # UConvBlock input feature map: (batch, out_channels, time)
    x = jax.random.normal(xkey, (B, cfg['out_channels'], T), dtype=jnp.float32)

    out = jax.block_until_ready(uconv_block_forward(x, params))
    ref = jax.block_until_ready(reference_uconv_block(x, params))

    assert out.shape == (B, cfg['out_channels'], T), out.shape
    # Kernel matmuls run on the native single-pass bf16 MXU path (default
    # precision); the reference uses Precision.HIGHEST, hence the 2e-2 tolerance.
    if not jnp.allclose(out, ref, rtol=2e-2, atol=2e-2):
        raise AssertionError(
            f"mismatch vs reference, max abs err = {jnp.max(jnp.abs(out - ref))}")
    print("KERNEL_OK")
</pallas_src>

<mosaic_0001>
module attributes {stable_mosaic.version = 11 : i64} {
  func.func @_uconv_block_kernel(%arg0: i32, %arg1: memref<5xf32, #tpu.memory_space<smem>>, %arg2: memref<32x16xf32, #tpu.memory_space<vmem>>, %arg3: memref<32x1xf32, #tpu.memory_space<vmem>>, %arg4: memref<4x32x11xf32, #tpu.memory_space<vmem>>, %arg5: memref<4x32x1xf32, #tpu.memory_space<vmem>>, %arg6: memref<16x32xf32, #tpu.memory_space<vmem>>, %arg7: memref<16x1xf32, #tpu.memory_space<vmem>>, %arg8: memref<1x16x128xf32, #tpu.memory_space<vmem>>, %arg9: memref<1x16x128xf32, #tpu.memory_space<vmem>>, %arg10: memref<32x138xf32, #tpu.memory_space<vmem>>, %arg11: memref<32x138xf32, #tpu.memory_space<vmem>>, %arg12: memref<32x74xf32, #tpu.memory_space<vmem>>, %arg13: memref<32x42xf32, #tpu.memory_space<vmem>>) attributes {dimension_semantics = [#tpu.dimension_semantics<parallel>], iteration_bounds = array<i64: 2>, scalar_prefetch = 0 : i64, scratch_operands = 4 : i64, tpu.core_type = #tpu.core_type<tc>, window_params = [{transform_indices = @transform_0, window_bounds = array<i64: 5>}, {pipeline_mode = #tpu.pipeline_mode<synchronous>, transform_indices = @transform_1, window_bounds = array<i64: 32, 16>}, {pipeline_mode = #tpu.pipeline_mode<synchronous>, transform_indices = @transform_2, window_bounds = array<i64: 32, 1>}, {pipeline_mode = #tpu.pipeline_mode<synchronous>, transform_indices = @transform_3, window_bounds = array<i64: 4, 32, 11>}, {pipeline_mode = #tpu.pipeline_mode<synchronous>, transform_indices = @transform_4, window_bounds = array<i64: 4, 32, 1>}, {pipeline_mode = #tpu.pipeline_mode<synchronous>, transform_indices = @transform_5, window_bounds = array<i64: 16, 32>}, {pipeline_mode = #tpu.pipeline_mode<synchronous>, transform_indices = @transform_6, window_bounds = array<i64: 16, 1>}, {transform_indices = @transform_7, window_bounds = array<i64: 1, 16, 128>}, {transform_indices = @transform_8, window_bounds = array<i64: 1, 16, 128>}]} {
    %c0 = arith.constant 0 : index
    %c0_0 = arith.constant 0 : index
    %c0_1 = arith.constant 0 : index
    %0 = vector.load %arg8[%c0, %c0_0, %c0_1] : memref<1x16x128xf32, #tpu.memory_space<vmem>>, vector<1x16x128xf32>
    %1 = vector.shape_cast %0 : vector<1x16x128xf32> to vector<16x128xf32>
    %c0_2 = arith.constant 0 : index
    %c0_3 = arith.constant 0 : index
    %2 = vector.load %arg2[%c0_2, %c0_3] : memref<32x16xf32, #tpu.memory_space<vmem>>, vector<32x16xf32>
    %cst = arith.constant dense<0.000000e+00> : vector<32x128xf32>
    %3 = tpu.matmul %2, %1, %cst {dimension_numbers = #tpu.dot_dimension_numbers<[1], [0], [0], [1], [0, 0, 1, 1], [], []>} : vector<32x16xf32>, vector<16x128xf32>, vector<32x128xf32> -> vector<32x128xf32>
    %c0_4 = arith.constant 0 : index
    %c0_5 = arith.constant 0 : index
    %4 = vector.load %arg3[%c0_4, %c0_5] : memref<32x1xf32, #tpu.memory_space<vmem>>, vector<32x1xf32>
    %5 = vector.broadcast %4 : vector<32x1xf32> to vector<32x128xf32>
    %6 = arith.addf %3, %5 : vector<32x128xf32>
    %c0_6 = arith.constant 0 : index
    %7 = memref.load %arg1[%c0_6] : memref<5xf32, #tpu.memory_space<smem>>
    %cst_7 = arith.constant 0.000000e+00 : f32
    %8 = vector.broadcast %cst_7 : f32 to vector<32x128xf32>
    %9 = arith.cmpf oge, %6, %8 : vector<32x128xf32>
    %10 = vector.broadcast %7 : f32 to vector<32x128xf32>
    %11 = arith.mulf %10, %6 : vector<32x128xf32>
    %12 = arith.select %9, %6, %11 : vector<32x128xi1>, vector<32x128xf32>
    %cst_8 = arith.constant 0.000000e+00 : f32
    %13 = vector.broadcast %cst_8 : f32 to vector<32x10xf32>
    %c0_9 = arith.constant 0 : index
    %c0_10 = arith.constant 0 : index
    %14 = vector.load %arg10[%c0_9, %c0_10] : memref<32x138xf32, #tpu.memory_space<vmem>>, vector<32x10xf32>
    tpu.vector_store %arg10[%c0_9, %c0_10], %13 {strides = array<i32>} : memref<32x138xf32, #tpu.memory_space<vmem>>, vector<32x10xf32>,
    %c0_11 = arith.constant 0 : index
    %c10 = arith.constant 10 : index
    %15 = vector.load %arg10[%c0_11, %c10] : memref<32x138xf32, #tpu.memory_space<vmem>>, vector<32x128xf32>
    tpu.vector_store %arg10[%c0_11, %c10], %12 {strides = array<i32>} : memref<32x138xf32, #tpu.memory_space<vmem>>, vector<32x128xf32>,
    %c0_12 = arith.constant 0 : index
    %c0_13 = arith.constant 0 : index
    %c0_14 = arith.constant 0 : index
    %16 = vector.load %arg4[%c0_12, %c0_13, %c0_14] : memref<4x32x11xf32, #tpu.memory_space<vmem>>, vector<1x32x11xf32>
    %17 = vector.shape_cast %16 : vector<1x32x11xf32> to vector<32x11xf32>
    %cst_15 = arith.constant 0.000000e+00 : f32
    %18 = vector.broadcast %cst_15 : f32 to vector<32x128xf32>
    %19 = vector.extract_strided_slice %17 {offsets = [0, 0], sizes = [32, 1], strides = [1, 1]} : vector<32x11xf32> to vector<32x1xf32>
    %c0_16 = arith.constant 0 : index
    %c0_17 = arith.constant 0 : index
    %20 = vector.load %arg10[%c0_16, %c0_17] : memref<32x138xf32, #tpu.memory_space<vmem>>, vector<32x128xf32>
    %21 = vector.broadcast %19 : vector<32x1xf32> to vector<32x128xf32>
    %22 = arith.mulf %21, %20 : vector<32x128xf32>
    %23 = arith.addf %18, %22 : vector<32x128xf32>
    %24 = vector.extract_strided_slice %17 {offsets = [0, 1], sizes = [32, 1], strides = [1, 1]} : vector<32x11xf32> to vector<32x1xf32>
    %c0_18 = arith.constant 0 : index
    %c1 = arith.constant 1 : index
    %25 = vector.load %arg10[%c0_18, %c1] : memref<32x138xf32, #tpu.memory_space<vmem>>, vector<32x128xf32>
    %26 = vector.broadcast %24 : vector<32x1xf32> to vector<32x128xf32>
    %27 = arith.mulf %26, %25 : vector<32x128xf32>
    %28 = arith.addf %23, %27 : vector<32x128xf32>
    %29 = vector.extract_strided_slice %17 {offsets = [0, 2], sizes = [32, 1], strides = [1, 1]} : vector<32x11xf32> to vector<32x1xf32>
    %c0_19 = arith.constant 0 : index
    %c2 = arith.constant 2 : index
    %30 = vector.load %arg10[%c0_19, %c2] : memref<32x138xf32, #tpu.memory_space<vmem>>, vector<32x128xf32>
    %31 = vector.broadcast %29 : vector<32x1xf32> to vector<32x128xf32>
    %32 = arith.mulf %31, %30 : vector<32x128xf32>
    %33 = arith.addf %28, %32 : vector<32x128xf32>
    %34 = vector.extract_strided_slice %17 {offsets = [0, 3], sizes = [32, 1], strides = [1, 1]} : vector<32x11xf32> to vector<32x1xf32>
    %c0_20 = arith.constant 0 : index
    %c3 = arith.constant 3 : index
    %35 = vector.load %arg10[%c0_20, %c3] : memref<32x138xf32, #tpu.memory_space<vmem>>, vector<32x128xf32>
    %36 = vector.broadcast %34 : vector<32x1xf32> to vector<32x128xf32>
    %37 = arith.mulf %36, %35 : vector<32x128xf32>
    %38 = arith.addf %33, %37 : vector<32x128xf32>
    %39 = vector.extract_strided_slice %17 {offsets = [0, 4], sizes = [32, 1], strides = [1, 1]} : vector<32x11xf32> to vector<32x1xf32>
    %c0_21 = arith.constant 0 : index
    %c4 = arith.constant 4 : index
    %40 = vector.load %arg10[%c0_21, %c4] : memref<32x138xf32, #tpu.memory_space<vmem>>, vector<32x128xf32>
    %41 = vector.broadcast %39 : vector<32x1xf32> to vector<32x128xf32>
    %42 = arith.mulf %41, %40 : vector<32x128xf32>
    %43 = arith.addf %38, %42 : vector<32x128xf32>
    %44 = vector.extract_strided_slice %17 {offsets = [0, 5], sizes = [32, 1], strides = [1, 1]} : vector<32x11xf32> to vector<32x1xf32>
    %c0_22 = arith.constant 0 : index
    %c5 = arith.constant 5 : index
    %45 = vector.load %arg10[%c0_22, %c5] : memref<32x138xf32, #tpu.memory_space<vmem>>, vector<32x128xf32>
    %46 = vector.broadcast %44 : vector<32x1xf32> to vector<32x128xf32>
    %47 = arith.mulf %46, %45 : vector<32x128xf32>
    %48 = arith.addf %43, %47 : vector<32x128xf32>
    %49 = vector.extract_strided_slice %17 {offsets = [0, 6], sizes = [32, 1], strides = [1, 1]} : vector<32x11xf32> to vector<32x1xf32>
    %c0_23 = arith.constant 0 : index
    %c6 = arith.constant 6 : index
    %50 = vector.load %arg10[%c0_23, %c6] : memref<32x138xf32, #tpu.memory_space<vmem>>, vector<32x128xf32>
    %51 = vector.broadcast %49 : vector<32x1xf32> to vector<32x128xf32>
    %52 = arith.mulf %51, %50 : vector<32x128xf32>
    %53 = arith.addf %48, %52 : vector<32x128xf32>
    %54 = vector.extract_strided_slice %17 {offsets = [0, 7], sizes = [32, 1], strides = [1, 1]} : vector<32x11xf32> to vector<32x1xf32>
    %c0_24 = arith.constant 0 : index
    %c7 = arith.constant 7 : index
    %55 = vector.load %arg10[%c0_24, %c7] : memref<32x138xf32, #tpu.memory_space<vmem>>, vector<32x128xf32>
    %56 = vector.broadcast %54 : vector<32x1xf32> to vector<32x128xf32>
    %57 = arith.mulf %56, %55 : vector<32x128xf32>
    %58 = arith.addf %53, %57 : vector<32x128xf32>
    %59 = vector.extract_strided_slice %17 {offsets = [0, 8], sizes = [32, 1], strides = [1, 1]} : vector<32x11xf32> to vector<32x1xf32>
    %c0_25 = arith.constant 0 : index
    %c8 = arith.constant 8 : index
    %60 = vector.load %arg10[%c0_25, %c8] : memref<32x138xf32, #tpu.memory_space<vmem>>, vector<32x128xf32>
    %61 = vector.broadcast %59 : vector<32x1xf32> to vector<32x128xf32>
    %62 = arith.mulf %61, %60 : vector<32x128xf32>
    %63 = arith.addf %58, %62 : vector<32x128xf32>
    %64 = vector.extract_strided_slice %17 {offsets = [0, 9], sizes = [32, 1], strides = [1, 1]} : vector<32x11xf32> to vector<32x1xf32>
    %c0_26 = arith.constant 0 : index
    %c9 = arith.constant 9 : index
    %65 = vector.load %arg10[%c0_26, %c9] : memref<32x138xf32, #tpu.memory_space<vmem>>, vector<32x128xf32>
    %66 = vector.broadcast %64 : vector<32x1xf32> to vector<32x128xf32>
    %67 = arith.mulf %66, %65 : vector<32x128xf32>
    %68 = arith.addf %63, %67 : vector<32x128xf32>
    %69 = vector.extract_strided_slice %17 {offsets = [0, 10], sizes = [32, 1], strides = [1, 1]} : vector<32x11xf32> to vector<32x1xf32>
    %c0_27 = arith.constant 0 : index
    %c10_28 = arith.constant 10 : index
    %70 = vector.load %arg10[%c0_27, %c10_28] : memref<32x138xf32, #tpu.memory_space<vmem>>, vector<32x128xf32>
    %71 = vector.broadcast %69 : vector<32x1xf32> to vector<32x128xf32>
    %72 = arith.mulf %71, %70 : vector<32x128xf32>
    %73 = arith.addf %68, %72 : vector<32x128xf32>
    %c0_29 = arith.constant 0 : index
    %c0_30 = arith.constant 0 : index
    %c0_31 = arith.constant 0 : index
    %74 = vector.load %arg5[%c0_29, %c0_30, %c0_31] : memref<4x32x1xf32, #tpu.memory_space<vmem>>, vector<1x32x1xf32>
    %75 = vector.shape_cast %74 : vector<1x32x1xf32> to vector<32x1xf32>
    %76 = vector.broadcast %75 : vector<32x1xf32> to vector<32x128xf32>
    %77 = arith.addf %73, %76 : vector<32x128xf32>
    %c1_32 = arith.constant 1 : index
    %78 = memref.load %arg1[%c1_32] : memref<5xf32, #tpu.memory_space<smem>>
    %cst_33 = arith.constant 0.000000e+00 : f32
    %79 = vector.broadcast %cst_33 : f32 to vector<32x128xf32>
    %80 = arith.cmpf oge, %77, %79 : vector<32x128xf32>
    %81 = vector.broadcast %78 : f32 to vector<32x128xf32>
    %82 = arith.mulf %81, %77 : vector<32x128xf32>
    %83 = arith.select %80, %77, %82 : vector<32x128xi1>, vector<32x128xf32>
    %cst_34 = arith.constant 0.000000e+00 : f32
    %84 = vector.broadcast %cst_34 : f32 to vector<32x10xf32>
    %c0_35 = arith.constant 0 : index
    %c0_36 = arith.constant 0 : index
    %85 = vector.load %arg11[%c0_35, %c0_36] : memref<32x138xf32, #tpu.memory_space<vmem>>, vector<32x10xf32>
    tpu.vector_store %arg11[%c0_35, %c0_36], %84 {strides = array<i32>} : memref<32x138xf32, #tpu.memory_space<vmem>>, vector<32x10xf32>,
    %c0_37 = arith.constant 0 : index
    %c10_38 = arith.constant 10 : index
    %86 = vector.load %arg11[%c0_37, %c10_38] : memref<32x138xf32, #tpu.memory_space<vmem>>, vector<32x128xf32>
    tpu.vector_store %arg11[%c0_37, %c10_38], %83 {strides = array<i32>} : memref<32x138xf32, #tpu.memory_space<vmem>>, vector<32x128xf32>,
    %c1_39 = arith.constant 1 : index
    %c0_40 = arith.constant 0 : index
    %c0_41 = arith.constant 0 : index
    %87 = vector.load %arg4[%c1_39, %c0_40, %c0_41] : memref<4x32x11xf32, #tpu.memory_space<vmem>>, vector<1x32x11xf32>
    %88 = vector.shape_cast %87 : vector<1x32x11xf32> to vector<32x11xf32>
    %cst_42 = arith.constant 0.000000e+00 : f32
    %89 = vector.broadcast %cst_42 : f32 to vector<32x128xf32>
    %90 = vector.extract_strided_slice %88 {offsets = [0, 0], sizes = [32, 1], strides = [1, 1]} : vector<32x11xf32> to vector<32x1xf32>
    %c0_43 = arith.constant 0 : index
    %c0_44 = arith.constant 0 : index
    %91 = vector.load %arg11[%c0_43, %c0_44] : memref<32x138xf32, #tpu.memory_space<vmem>>, vector<32x128xf32>
    %92 = vector.broadcast %90 : vector<32x1xf32> to vector<32x128xf32>
    %93 = arith.mulf %92, %91 : vector<32x128xf32>
    %94 = arith.addf %89, %93 : vector<32x128xf32>
    %95 = vector.extract_strided_slice %88 {offsets = [0, 1], sizes = [32, 1], strides = [1, 1]} : vector<32x11xf32> to vector<32x1xf32>
    %c0_45 = arith.constant 0 : index
    %c1_46 = arith.constant 1 : index
    %96 = vector.load %arg11[%c0_45, %c1_46] : memref<32x138xf32, #tpu.memory_space<vmem>>, vector<32x128xf32>
    %97 = vector.broadcast %95 : vector<32x1xf32> to vector<32x128xf32>
    %98 = arith.mulf %97, %96 : vector<32x128xf32>
    %99 = arith.addf %94, %98 : vector<32x128xf32>
    %100 = vector.extract_strided_slice %88 {offsets = [0, 2], sizes = [32, 1], strides = [1, 1]} : vector<32x11xf32> to vector<32x1xf32>
    %c0_47 = arith.constant 0 : index
    %c2_48 = arith.constant 2 : index
    %101 = vector.load %arg11[%c0_47, %c2_48] : memref<32x138xf32, #tpu.memory_space<vmem>>, vector<32x128xf32>
    %102 = vector.broadcast %100 : vector<32x1xf32> to vector<32x128xf32>
    %103 = arith.mulf %102, %101 : vector<32x128xf32>
    %104 = arith.addf %99, %103 : vector<32x128xf32>
    %105 = vector.extract_strided_slice %88 {offsets = [0, 3], sizes = [32, 1], strides = [1, 1]} : vector<32x11xf32> to vector<32x1xf32>
    %c0_49 = arith.constant 0 : index
    %c3_50 = arith.constant 3 : index
    %106 = vector.load %arg11[%c0_49, %c3_50] : memref<32x138xf32, #tpu.memory_space<vmem>>, vector<32x128xf32>
    %107 = vector.broadcast %105 : vector<32x1xf32> to vector<32x128xf32>
    %108 = arith.mulf %107, %106 : vector<32x128xf32>
    %109 = arith.addf %104, %108 : vector<32x128xf32>
    %110 = vector.extract_strided_slice %88 {offsets = [0, 4], sizes = [32, 1], strides = [1, 1]} : vector<32x11xf32> to vector<32x1xf32>
    %c0_51 = arith.constant 0 : index
    %c4_52 = arith.constant 4 : index
    %111 = vector.load %arg11[%c0_51, %c4_52] : memref<32x138xf32, #tpu.memory_space<vmem>>, vector<32x128xf32>
    %112 = vector.broadcast %110 : vector<32x1xf32> to vector<32x128xf32>
    %113 = arith.mulf %112, %111 : vector<32x128xf32>
    %114 = arith.addf %109, %113 : vector<32x128xf32>
    %115 = vector.extract_strided_slice %88 {offsets = [0, 5], sizes = [32, 1], strides = [1, 1]} : vector<32x11xf32> to vector<32x1xf32>
    %c0_53 = arith.constant 0 : index
    %c5_54 = arith.constant 5 : index
    %116 = vector.load %arg11[%c0_53, %c5_54] : memref<32x138xf32, #tpu.memory_space<vmem>>, vector<32x128xf32>
    %117 = vector.broadcast %115 : vector<32x1xf32> to vector<32x128xf32>
    %118 = arith.mulf %117, %116 : vector<32x128xf32>
    %119 = arith.addf %114, %118 : vector<32x128xf32>
    %120 = vector.extract_strided_slice %88 {offsets = [0, 6], sizes = [32, 1], strides = [1, 1]} : vector<32x11xf32> to vector<32x1xf32>
    %c0_55 = arith.constant 0 : index
    %c6_56 = arith.constant 6 : index
    %121 = vector.load %arg11[%c0_55, %c6_56] : memref<32x138xf32, #tpu.memory_space<vmem>>, vector<32x128xf32>
    %122 = vector.broadcast %120 : vector<32x1xf32> to vector<32x128xf32>
    %123 = arith.mulf %122, %121 : vector<32x128xf32>
    %124 = arith.addf %119, %123 : vector<32x128xf32>
    %125 = vector.extract_strided_slice %88 {offsets = [0, 7], sizes = [32, 1], strides = [1, 1]} : vector<32x11xf32> to vector<32x1xf32>
    %c0_57 = arith.constant 0 : index
    %c7_58 = arith.constant 7 : index
    %126 = vector.load %arg11[%c0_57, %c7_58] : memref<32x138xf32, #tpu.memory_space<vmem>>, vector<32x128xf32>
    %127 = vector.broadcast %125 : vector<32x1xf32> to vector<32x128xf32>
    %128 = arith.mulf %127, %126 : vector<32x128xf32>
    %129 = arith.addf %124, %128 : vector<32x128xf32>
    %130 = vector.extract_strided_slice %88 {offsets = [0, 8], sizes = [32, 1], strides = [1, 1]} : vector<32x11xf32> to vector<32x1xf32>
    %c0_59 = arith.constant 0 : index
    %c8_60 = arith.constant 8 : index
    %131 = vector.load %arg11[%c0_59, %c8_60] : memref<32x138xf32, #tpu.memory_space<vmem>>, vector<32x128xf32>
    %132 = vector.broadcast %130 : vector<32x1xf32> to vector<32x128xf32>
    %133 = arith.mulf %132, %131 : vector<32x128xf32>
    %134 = arith.addf %129, %133 : vector<32x128xf32>
    %135 = vector.extract_strided_slice %88 {offsets = [0, 9], sizes = [32, 1], strides = [1, 1]} : vector<32x11xf32> to vector<32x1xf32>
    %c0_61 = arith.constant 0 : index
    %c9_62 = arith.constant 9 : index
    %136 = vector.load %arg11[%c0_61, %c9_62] : memref<32x138xf32, #tpu.memory_space<vmem>>, vector<32x128xf32>
    %137 = vector.broadcast %135 : vector<32x1xf32> to vector<32x128xf32>
    %138 = arith.mulf %137, %136 : vector<32x128xf32>
    %139 = arith.addf %134, %138 : vector<32x128xf32>
    %140 = vector.extract_strided_slice %88 {offsets = [0, 10], sizes = [32, 1], strides = [1, 1]} : vector<32x11xf32> to vector<32x1xf32>
    %c0_63 = arith.constant 0 : index
    %c10_64 = arith.constant 10 : index
    %141 = vector.load %arg11[%c0_63, %c10_64] : memref<32x138xf32, #tpu.memory_space<vmem>>, vector<32x128xf32>
    %142 = vector.broadcast %140 : vector<32x1xf32> to vector<32x128xf32>
    %143 = arith.mulf %142, %141 : vector<32x128xf32>
    %144 = arith.addf %139, %143 : vector<32x128xf32>
    %c1_65 = arith.constant 1 : index
    %c0_66 = arith.constant 0 : index
    %c0_67 = arith.constant 0 : index
    %145 = vector.load %arg5[%c1_65, %c0_66, %c0_67] : memref<4x32x1xf32, #tpu.memory_space<vmem>>, vector<1x32x1xf32>
    %146 = vector.shape_cast %145 : vector<1x32x1xf32> to vector<32x1xf32>
    %147 = vector.broadcast %146 : vector<32x1xf32> to vector<32x128xf32>
    %148 = arith.addf %144, %147 : vector<32x128xf32>
    %c2_68 = arith.constant 2 : index
    %149 = memref.load %arg1[%c2_68] : memref<5xf32, #tpu.memory_space<smem>>
    %cst_69 = arith.constant 0.000000e+00 : f32
    %150 = vector.broadcast %cst_69 : f32 to vector<32x128xf32>
    %151 = arith.cmpf oge, %148, %150 : vector<32x128xf32>
    %152 = vector.broadcast %149 : f32 to vector<32x128xf32>
    %153 = arith.mulf %152, %148 : vector<32x128xf32>
    %154 = arith.select %151, %148, %153 : vector<32x128xi1>, vector<32x128xf32>
    %155 = tpu.iota {dimensions = array<i32: 0>} : vector<128x64xi32>
    %156 = tpu.iota {dimensions = array<i32: 1>} : vector<128x64xi32>
    %c2_i32 = arith.constant 2 : i32
    %157 = vector.broadcast %c2_i32 : i32 to vector<128x64xi32>
    %158 = arith.muli %157, %156 : vector<128x64xi32>
    %159 = arith.cmpi eq, %155, %158 : vector<128x64xi32>
    %cst_70 = arith.constant 1.000000e+00 : f32
    %cst_71 = arith.constant 0.000000e+00 : f32
    %160 = vector.broadcast %cst_70 : f32 to vector<128x64xf32>
    %161 = vector.broadcast %cst_71 : f32 to vector<128x64xf32>
    %162 = arith.select %159, %160, %161 : vector<128x64xi1>, vector<128x64xf32>
    %cst_72 = arith.constant dense<0.000000e+00> : vector<32x64xf32>
    %163 = tpu.matmul %154, %162, %cst_72 {dimension_numbers = #tpu.dot_dimension_numbers<[1], [0], [0], [1], [0, 0, 1, 1], [], []>} : vector<32x128xf32>, vector<128x64xf32>, vector<32x64xf32> -> vector<32x64xf32>
    %cst_73 = arith.constant 0.000000e+00 : f32
    %164 = vector.broadcast %cst_73 : f32 to vector<32x10xf32>
    %c0_74 = arith.constant 0 : index
    %c0_75 = arith.constant 0 : index
    %165 = vector.load %arg12[%c0_74, %c0_75] : memref<32x74xf32, #tpu.memory_space<vmem>>, vector<32x10xf32>
    tpu.vector_store %arg12[%c0_74, %c0_75], %164 {strides = array<i32>} : memref<32x74xf32, #tpu.memory_space<vmem>>, vector<32x10xf32>,
    %c0_76 = arith.constant 0 : index
    %c10_77 = arith.constant 10 : index
    %166 = vector.load %arg12[%c0_76, %c10_77] : memref<32x74xf32, #tpu.memory_space<vmem>>, vector<32x64xf32>
    tpu.vector_store %arg12[%c0_76, %c10_77], %163 {strides = array<i32>} : memref<32x74xf32, #tpu.memory_space<vmem>>, vector<32x64xf32>,
    %c2_78 = arith.constant 2 : index
    %c0_79 = arith.constant 0 : index
    %c0_80 = arith.constant 0 : index
    %167 = vector.load %arg4[%c2_78, %c0_79, %c0_80] : memref<4x32x11xf32, #tpu.memory_space<vmem>>, vector<1x32x11xf32>
    %168 = vector.shape_cast %167 : vector<1x32x11xf32> to vector<32x11xf32>
    %cst_81 = arith.constant 0.000000e+00 : f32
    %169 = vector.broadcast %cst_81 : f32 to vector<32x64xf32>
    %170 = vector.extract_strided_slice %168 {offsets = [0, 0], sizes = [32, 1], strides = [1, 1]} : vector<32x11xf32> to vector<32x1xf32>
    %c0_82 = arith.constant 0 : index
    %c0_83 = arith.constant 0 : index
    %171 = vector.load %arg12[%c0_82, %c0_83] : memref<32x74xf32, #tpu.memory_space<vmem>>, vector<32x64xf32>
    %172 = vector.broadcast %170 : vector<32x1xf32> to vector<32x64xf32>
    %173 = arith.mulf %172, %171 : vector<32x64xf32>
    %174 = arith.addf %169, %173 : vector<32x64xf32>
    %175 = vector.extract_strided_slice %168 {offsets = [0, 1], sizes = [32, 1], strides = [1, 1]} : vector<32x11xf32> to vector<32x1xf32>
    %c0_84 = arith.constant 0 : index
    %c1_85 = arith.constant 1 : index
    %176 = vector.load %arg12[%c0_84, %c1_85] : memref<32x74xf32, #tpu.memory_space<vmem>>, vector<32x64xf32>
    %177 = vector.broadcast %175 : vector<32x1xf32> to vector<32x64xf32>
    %178 = arith.mulf %177, %176 : vector<32x64xf32>
    %179 = arith.addf %174, %178 : vector<32x64xf32>
    %180 = vector.extract_strided_slice %168 {offsets = [0, 2], sizes = [32, 1], strides = [1, 1]} : vector<32x11xf32> to vector<32x1xf32>
    %c0_86 = arith.constant 0 : index
    %c2_87 = arith.constant 2 : index
    %181 = vector.load %arg12[%c0_86, %c2_87] : memref<32x74xf32, #tpu.memory_space<vmem>>, vector<32x64xf32>
    %182 = vector.broadcast %180 : vector<32x1xf32> to vector<32x64xf32>
    %183 = arith.mulf %182, %181 : vector<32x64xf32>
    %184 = arith.addf %179, %183 : vector<32x64xf32>
    %185 = vector.extract_strided_slice %168 {offsets = [0, 3], sizes = [32, 1], strides = [1, 1]} : vector<32x11xf32> to vector<32x1xf32>
    %c0_88 = arith.constant 0 : index
    %c3_89 = arith.constant 3 : index
    %186 = vector.load %arg12[%c0_88, %c3_89] : memref<32x74xf32, #tpu.memory_space<vmem>>, vector<32x64xf32>
    %187 = vector.broadcast %185 : vector<32x1xf32> to vector<32x64xf32>
    %188 = arith.mulf %187, %186 : vector<32x64xf32>
    %189 = arith.addf %184, %188 : vector<32x64xf32>
    %190 = vector.extract_strided_slice %168 {offsets = [0, 4], sizes = [32, 1], strides = [1, 1]} : vector<32x11xf32> to vector<32x1xf32>
    %c0_90 = arith.constant 0 : index
    %c4_91 = arith.constant 4 : index
    %191 = vector.load %arg12[%c0_90, %c4_91] : memref<32x74xf32, #tpu.memory_space<vmem>>, vector<32x64xf32>
    %192 = vector.broadcast %190 : vector<32x1xf32> to vector<32x64xf32>
    %193 = arith.mulf %192, %191 : vector<32x64xf32>
    %194 = arith.addf %189, %193 : vector<32x64xf32>
    %195 = vector.extract_strided_slice %168 {offsets = [0, 5], sizes = [32, 1], strides = [1, 1]} : vector<32x11xf32> to vector<32x1xf32>
    %c0_92 = arith.constant 0 : index
    %c5_93 = arith.constant 5 : index
    %196 = vector.load %arg12[%c0_92, %c5_93] : memref<32x74xf32, #tpu.memory_space<vmem>>, vector<32x64xf32>
    %197 = vector.broadcast %195 : vector<32x1xf32> to vector<32x64xf32>
    %198 = arith.mulf %197, %196 : vector<32x64xf32>
    %199 = arith.addf %194, %198 : vector<32x64xf32>
    %200 = vector.extract_strided_slice %168 {offsets = [0, 6], sizes = [32, 1], strides = [1, 1]} : vector<32x11xf32> to vector<32x1xf32>
    %c0_94 = arith.constant 0 : index
    %c6_95 = arith.constant 6 : index
    %201 = vector.load %arg12[%c0_94, %c6_95] : memref<32x74xf32, #tpu.memory_space<vmem>>, vector<32x64xf32>
    %202 = vector.broadcast %200 : vector<32x1xf32> to vector<32x64xf32>
    %203 = arith.mulf %202, %201 : vector<32x64xf32>
    %204 = arith.addf %199, %203 : vector<32x64xf32>
    %205 = vector.extract_strided_slice %168 {offsets = [0, 7], sizes = [32, 1], strides = [1, 1]} : vector<32x11xf32> to vector<32x1xf32>
    %c0_96 = arith.constant 0 : index
    %c7_97 = arith.constant 7 : index
    %206 = vector.load %arg12[%c0_96, %c7_97] : memref<32x74xf32, #tpu.memory_space<vmem>>, vector<32x64xf32>
    %207 = vector.broadcast %205 : vector<32x1xf32> to vector<32x64xf32>
    %208 = arith.mulf %207, %206 : vector<32x64xf32>
    %209 = arith.addf %204, %208 : vector<32x64xf32>
    %210 = vector.extract_strided_slice %168 {offsets = [0, 8], sizes = [32, 1], strides = [1, 1]} : vector<32x11xf32> to vector<32x1xf32>
    %c0_98 = arith.constant 0 : index
    %c8_99 = arith.constant 8 : index
    %211 = vector.load %arg12[%c0_98, %c8_99] : memref<32x74xf32, #tpu.memory_space<vmem>>, vector<32x64xf32>
    %212 = vector.broadcast %210 : vector<32x1xf32> to vector<32x64xf32>
    %213 = arith.mulf %212, %211 : vector<32x64xf32>
    %214 = arith.addf %209, %213 : vector<32x64xf32>
    %215 = vector.extract_strided_slice %168 {offsets = [0, 9], sizes = [32, 1], strides = [1, 1]} : vector<32x11xf32> to vector<32x1xf32>
    %c0_100 = arith.constant 0 : index
    %c9_101 = arith.constant 9 : index
    %216 = vector.load %arg12[%c0_100, %c9_101] : memref<32x74xf32, #tpu.memory_space<vmem>>, vector<32x64xf32>
    %217 = vector.broadcast %215 : vector<32x1xf32> to vector<32x64xf32>
    %218 = arith.mulf %217, %216 : vector<32x64xf32>
    %219 = arith.addf %214, %218 : vector<32x64xf32>
    %220 = vector.extract_strided_slice %168 {offsets = [0, 10], sizes = [32, 1], strides = [1, 1]} : vector<32x11xf32> to vector<32x1xf32>
    %c0_102 = arith.constant 0 : index
    %c10_103 = arith.constant 10 : index
    %221 = vector.load %arg12[%c0_102, %c10_103] : memref<32x74xf32, #tpu.memory_space<vmem>>, vector<32x64xf32>
    %222 = vector.broadcast %220 : vector<32x1xf32> to vector<32x64xf32>
    %223 = arith.mulf %222, %221 : vector<32x64xf32>
    %224 = arith.addf %219, %223 : vector<32x64xf32>
    %c2_104 = arith.constant 2 : index
    %c0_105 = arith.constant 0 : index
    %c0_106 = arith.constant 0 : index
    %225 = vector.load %arg5[%c2_104, %c0_105, %c0_106] : memref<4x32x1xf32, #tpu.memory_space<vmem>>, vector<1x32x1xf32>
    %226 = vector.shape_cast %225 : vector<1x32x1xf32> to vector<32x1xf32>
    %227 = vector.broadcast %226 : vector<32x1xf32> to vector<32x64xf32>
    %228 = arith.addf %224, %227 : vector<32x64xf32>
    %c3_107 = arith.constant 3 : index
    %229 = memref.load %arg1[%c3_107] : memref<5xf32, #tpu.memory_space<smem>>
    %cst_108 = arith.constant 0.000000e+00 : f32
    %230 = vector.broadcast %cst_108 : f32 to vector<32x64xf32>
    %231 = arith.cmpf oge, %228, %230 : vector<32x64xf32>
    %232 = vector.broadcast %229 : f32 to vector<32x64xf32>
    %233 = arith.mulf %232, %228 : vector<32x64xf32>
    %234 = arith.select %231, %228, %233 : vector<32x64xi1>, vector<32x64xf32>
    %235 = tpu.iota {dimensions = array<i32: 0>} : vector<64x32xi32>
    %236 = tpu.iota {dimensions = array<i32: 1>} : vector<64x32xi32>
    %c2_i32_109 = arith.constant 2 : i32
    %237 = vector.broadcast %c2_i32_109 : i32 to vector<64x32xi32>
    %238 = arith.muli %237, %236 : vector<64x32xi32>
    %239 = arith.cmpi eq, %235, %238 : vector<64x32xi32>
    %cst_110 = arith.constant 1.000000e+00 : f32
    %cst_111 = arith.constant 0.000000e+00 : f32
    %240 = vector.broadcast %cst_110 : f32 to vector<64x32xf32>
    %241 = vector.broadcast %cst_111 : f32 to vector<64x32xf32>
    %242 = arith.select %239, %240, %241 : vector<64x32xi1>, vector<64x32xf32>
    %cst_112 = arith.constant dense<0.000000e+00> : vector<32x32xf32>
    %243 = tpu.matmul %234, %242, %cst_112 {dimension_numbers = #tpu.dot_dimension_numbers<[1], [0], [0], [1], [0, 0, 1, 1], [], []>} : vector<32x64xf32>, vector<64x32xf32>, vector<32x32xf32> -> vector<32x32xf32>
    %cst_113 = arith.constant 0.000000e+00 : f32
    %244 = vector.broadcast %cst_113 : f32 to vector<32x10xf32>
    %c0_114 = arith.constant 0 : index
    %c0_115 = arith.constant 0 : index
    %245 = vector.load %arg13[%c0_114, %c0_115] : memref<32x42xf32, #tpu.memory_space<vmem>>, vector<32x10xf32>
    tpu.vector_store %arg13[%c0_114, %c0_115], %244 {strides = array<i32>} : memref<32x42xf32, #tpu.memory_space<vmem>>, vector<32x10xf32>,
    %c0_116 = arith.constant 0 : index
    %c10_117 = arith.constant 10 : index
    %246 = vector.load %arg13[%c0_116, %c10_117] : memref<32x42xf32, #tpu.memory_space<vmem>>, vector<32x32xf32>
    tpu.vector_store %arg13[%c0_116, %c10_117], %243 {strides = array<i32>} : memref<32x42xf32, #tpu.memory_space<vmem>>, vector<32x32xf32>,
    %c3_118 = arith.constant 3 : index
    %c0_119 = arith.constant 0 : index
    %c0_120 = arith.constant 0 : index
    %247 = vector.load %arg4[%c3_118, %c0_119, %c0_120] : memref<4x32x11xf32, #tpu.memory_space<vmem>>, vector<1x32x11xf32>
    %248 = vector.shape_cast %247 : vector<1x32x11xf32> to vector<32x11xf32>
    %cst_121 = arith.constant 0.000000e+00 : f32
    %249 = vector.broadcast %cst_121 : f32 to vector<32x32xf32>
    %250 = vector.extract_strided_slice %248 {offsets = [0, 0], sizes = [32, 1], strides = [1, 1]} : vector<32x11xf32> to vector<32x1xf32>
    %c0_122 = arith.constant 0 : index
    %c0_123 = arith.constant 0 : index
    %251 = vector.load %arg13[%c0_122, %c0_123] : memref<32x42xf32, #tpu.memory_space<vmem>>, vector<32x32xf32>
    %252 = vector.broadcast %250 : vector<32x1xf32> to vector<32x32xf32>
    %253 = arith.mulf %252, %251 : vector<32x32xf32>
    %254 = arith.addf %249, %253 : vector<32x32xf32>
    %255 = vector.extract_strided_slice %248 {offsets = [0, 1], sizes = [32, 1], strides = [1, 1]} : vector<32x11xf32> to vector<32x1xf32>
    %c0_124 = arith.constant 0 : index
    %c1_125 = arith.constant 1 : index
    %256 = vector.load %arg13[%c0_124, %c1_125] : memref<32x42xf32, #tpu.memory_space<vmem>>, vector<32x32xf32>
    %257 = vector.broadcast %255 : vector<32x1xf32> to vector<32x32xf32>
    %258 = arith.mulf %257, %256 : vector<32x32xf32>
    %259 = arith.addf %254, %258 : vector<32x32xf32>
    %260 = vector.extract_strided_slice %248 {offsets = [0, 2], sizes = [32, 1], strides = [1, 1]} : vector<32x11xf32> to vector<32x1xf32>
    %c0_126 = arith.constant 0 : index
    %c2_127 = arith.constant 2 : index
    %261 = vector.load %arg13[%c0_126, %c2_127] : memref<32x42xf32, #tpu.memory_space<vmem>>, vector<32x32xf32>
    %262 = vector.broadcast %260 : vector<32x1xf32> to vector<32x32xf32>
    %263 = arith.mulf %262, %261 : vector<32x32xf32>
    %264 = arith.addf %259, %263 : vector<32x32xf32>
    %265 = vector.extract_strided_slice %248 {offsets = [0, 3], sizes = [32, 1], strides = [1, 1]} : vector<32x11xf32> to vector<32x1xf32>
    %c0_128 = arith.constant 0 : index
    %c3_129 = arith.constant 3 : index
    %266 = vector.load %arg13[%c0_128, %c3_129] : memref<32x42xf32, #tpu.memory_space<vmem>>, vector<32x32xf32>
    %267 = vector.broadcast %265 : vector<32x1xf32> to vector<32x32xf32>
    %268 = arith.mulf %267, %266 : vector<32x32xf32>
    %269 = arith.addf %264, %268 : vector<32x32xf32>
    %270 = vector.extract_strided_slice %248 {offsets = [0, 4], sizes = [32, 1], strides = [1, 1]} : vector<32x11xf32> to vector<32x1xf32>
    %c0_130 = arith.constant 0 : index
    %c4_131 = arith.constant 4 : index
    %271 = vector.load %arg13[%c0_130, %c4_131] : memref<32x42xf32, #tpu.memory_space<vmem>>, vector<32x32xf32>
    %272 = vector.broadcast %270 : vector<32x1xf32> to vector<32x32xf32>
    %273 = arith.mulf %272, %271 : vector<32x32xf32>
    %274 = arith.addf %269, %273 : vector<32x32xf32>
    %275 = vector.extract_strided_slice %248 {offsets = [0, 5], sizes = [32, 1], strides = [1, 1]} : vector<32x11xf32> to vector<32x1xf32>
    %c0_132 = arith.constant 0 : index
    %c5_133 = arith.constant 5 : index
    %276 = vector.load %arg13[%c0_132, %c5_133] : memref<32x42xf32, #tpu.memory_space<vmem>>, vector<32x32xf32>
    %277 = vector.broadcast %275 : vector<32x1xf32> to vector<32x32xf32>
    %278 = arith.mulf %277, %276 : vector<32x32xf32>
    %279 = arith.addf %274, %278 : vector<32x32xf32>
    %280 = vector.extract_strided_slice %248 {offsets = [0, 6], sizes = [32, 1], strides = [1, 1]} : vector<32x11xf32> to vector<32x1xf32>
    %c0_134 = arith.constant 0 : index
    %c6_135 = arith.constant 6 : index
    %281 = vector.load %arg13[%c0_134, %c6_135] : memref<32x42xf32, #tpu.memory_space<vmem>>, vector<32x32xf32>
    %282 = vector.broadcast %280 : vector<32x1xf32> to vector<32x32xf32>
    %283 = arith.mulf %282, %281 : vector<32x32xf32>
    %284 = arith.addf %279, %283 : vector<32x32xf32>
    %285 = vector.extract_strided_slice %248 {offsets = [0, 7], sizes = [32, 1], strides = [1, 1]} : vector<32x11xf32> to vector<32x1xf32>
    %c0_136 = arith.constant 0 : index
    %c7_137 = arith.constant 7 : index
    %286 = vector.load %arg13[%c0_136, %c7_137] : memref<32x42xf32, #tpu.memory_space<vmem>>, vector<32x32xf32>
    %287 = vector.broadcast %285 : vector<32x1xf32> to vector<32x32xf32>
    %288 = arith.mulf %287, %286 : vector<32x32xf32>
    %289 = arith.addf %284, %288 : vector<32x32xf32>
    %290 = vector.extract_strided_slice %248 {offsets = [0, 8], sizes = [32, 1], strides = [1, 1]} : vector<32x11xf32> to vector<32x1xf32>
    %c0_138 = arith.constant 0 : index
    %c8_139 = arith.constant 8 : index
    %291 = vector.load %arg13[%c0_138, %c8_139] : memref<32x42xf32, #tpu.memory_space<vmem>>, vector<32x32xf32>
    %292 = vector.broadcast %290 : vector<32x1xf32> to vector<32x32xf32>
    %293 = arith.mulf %292, %291 : vector<32x32xf32>
    %294 = arith.addf %289, %293 : vector<32x32xf32>
    %295 = vector.extract_strided_slice %248 {offsets = [0, 9], sizes = [32, 1], strides = [1, 1]} : vector<32x11xf32> to vector<32x1xf32>
    %c0_140 = arith.constant 0 : index
    %c9_141 = arith.constant 9 : index
    %296 = vector.load %arg13[%c0_140, %c9_141] : memref<32x42xf32, #tpu.memory_space<vmem>>, vector<32x32xf32>
    %297 = vector.broadcast %295 : vector<32x1xf32> to vector<32x32xf32>
    %298 = arith.mulf %297, %296 : vector<32x32xf32>
    %299 = arith.addf %294, %298 : vector<32x32xf32>
    %300 = vector.extract_strided_slice %248 {offsets = [0, 10], sizes = [32, 1], strides = [1, 1]} : vector<32x11xf32> to vector<32x1xf32>
    %c0_142 = arith.constant 0 : index
    %c10_143 = arith.constant 10 : index
    %301 = vector.load %arg13[%c0_142, %c10_143] : memref<32x42xf32, #tpu.memory_space<vmem>>, vector<32x32xf32>
    %302 = vector.broadcast %300 : vector<32x1xf32> to vector<32x32xf32>
    %303 = arith.mulf %302, %301 : vector<32x32xf32>
    %304 = arith.addf %299, %303 : vector<32x32xf32>
    %c3_144 = arith.constant 3 : index
    %c0_145 = arith.constant 0 : index
    %c0_146 = arith.constant 0 : index
    %305 = vector.load %arg5[%c3_144, %c0_145, %c0_146] : memref<4x32x1xf32, #tpu.memory_space<vmem>>, vector<1x32x1xf32>
    %306 = vector.shape_cast %305 : vector<1x32x1xf32> to vector<32x1xf32>
    %307 = vector.broadcast %306 : vector<32x1xf32> to vector<32x32xf32>
    %308 = arith.addf %304, %307 : vector<32x32xf32>
    %c4_147 = arith.constant 4 : index
    %309 = memref.load %arg1[%c4_147] : memref<5xf32, #tpu.memory_space<smem>>
    %cst_148 = arith.constant 0.000000e+00 : f32
    %310 = vector.broadcast %cst_148 : f32 to vector<32x32xf32>
    %311 = arith.cmpf oge, %308, %310 : vector<32x32xf32>
    %312 = vector.broadcast %309 : f32 to vector<32x32xf32>
    %313 = arith.mulf %312, %308 : vector<32x32xf32>
    %314 = arith.select %311, %308, %313 : vector<32x32xi1>, vector<32x32xf32>
    %315 = tpu.iota {dimensions = array<i32: 0>} : vector<32x16xi32>
    %316 = tpu.iota {dimensions = array<i32: 1>} : vector<32x16xi32>
    %c2_i32_149 = arith.constant 2 : i32
    %317 = vector.broadcast %c2_i32_149 : i32 to vector<32x16xi32>
    %318 = arith.muli %317, %316 : vector<32x16xi32>
    %319 = arith.cmpi eq, %315, %318 : vector<32x16xi32>
    %cst_150 = arith.constant 1.000000e+00 : f32
    %cst_151 = arith.constant 0.000000e+00 : f32
    %320 = vector.broadcast %cst_150 : f32 to vector<32x16xf32>
    %321 = vector.broadcast %cst_151 : f32 to vector<32x16xf32>
    %322 = arith.select %319, %320, %321 : vector<32x16xi1>, vector<32x16xf32>
    %cst_152 = arith.constant dense<0.000000e+00> : vector<32x16xf32>
    %323 = tpu.matmul %314, %322, %cst_152 {dimension_numbers = #tpu.dot_dimension_numbers<[1], [0], [0], [1], [0, 0, 1, 1], [], []>} : vector<32x32xf32>, vector<32x16xf32>, vector<32x16xf32> -> vector<32x16xf32>
    %324 = tpu.iota {dimensions = array<i32: 0>} : vector<16x32xi32>
    %325 = tpu.iota {dimensions = array<i32: 1>} : vector<16x32xi32>
    %c2_i32_153 = arith.constant 2 : i32
    %326 = vector.broadcast %c2_i32_153 : i32 to vector<16x32xi32>
    %327 = arith.muli %326, %324 : vector<16x32xi32>
    %328 = arith.subi %325, %327 : vector<16x32xi32>
    %c0_i32 = arith.constant 0 : i32
    %329 = vector.broadcast %c0_i32 : i32 to vector<16x32xi32>
    %330 = arith.cmpi eq, %328, %329 : vector<16x32xi32>
    %c1_i32 = arith.constant 1 : i32
    %331 = vector.broadcast %c1_i32 : i32 to vector<16x32xi32>
    %332 = arith.cmpi eq, %328, %331 : vector<16x32xi32>
    %333 = arith.ori %330, %332 : vector<16x32xi1>
    %cst_154 = arith.constant 1.000000e+00 : f32
    %cst_155 = arith.constant 0.000000e+00 : f32
    %334 = vector.broadcast %cst_154 : f32 to vector<16x32xf32>
    %335 = vector.broadcast %cst_155 : f32 to vector<16x32xf32>
    %336 = arith.select %333, %334, %335 : vector<16x32xi1>, vector<16x32xf32>
    %cst_156 = arith.constant dense<0.000000e+00> : vector<32x32xf32>
    %337 = tpu.matmul %323, %336, %cst_156 {dimension_numbers = #tpu.dot_dimension_numbers<[1], [0], [0], [1], [0, 0, 1, 1], [], []>} : vector<32x16xf32>, vector<16x32xf32>, vector<32x32xf32> -> vector<32x32xf32>
    %c0_157 = arith.constant 0 : index
    %c10_158 = arith.constant 10 : index
    %338 = vector.load %arg13[%c0_157, %c10_158] : memref<32x42xf32, #tpu.memory_space<vmem>>, vector<32x32xf32>
    %339 = arith.addf %338, %337 : vector<32x32xf32>
    %340 = tpu.iota {dimensions = array<i32: 0>} : vector<32x64xi32>
    %341 = tpu.iota {dimensions = array<i32: 1>} : vector<32x64xi32>
    %c2_i32_159 = arith.constant 2 : i32
    %342 = vector.broadcast %c2_i32_159 : i32 to vector<32x64xi32>
    %343 = arith.muli %342, %340 : vector<32x64xi32>
    %344 = arith.subi %341, %343 : vector<32x64xi32>
    %c0_i32_160 = arith.constant 0 : i32
    %345 = vector.broadcast %c0_i32_160 : i32 to vector<32x64xi32>
    %346 = arith.cmpi eq, %344, %345 : vector<32x64xi32>
    %c1_i32_161 = arith.constant 1 : i32
    %347 = vector.broadcast %c1_i32_161 : i32 to vector<32x64xi32>
    %348 = arith.cmpi eq, %344, %347 : vector<32x64xi32>
    %349 = arith.ori %346, %348 : vector<32x64xi1>
    %cst_162 = arith.constant 1.000000e+00 : f32
    %cst_163 = arith.constant 0.000000e+00 : f32
    %350 = vector.broadcast %cst_162 : f32 to vector<32x64xf32>
    %351 = vector.broadcast %cst_163 : f32 to vector<32x64xf32>
    %352 = arith.select %349, %350, %351 : vector<32x64xi1>, vector<32x64xf32>
    %cst_164 = arith.constant dense<0.000000e+00> : vector<32x64xf32>
    %353 = tpu.matmul %339, %352, %cst_164 {dimension_numbers = #tpu.dot_dimension_numbers<[1], [0], [0], [1], [0, 0, 1, 1], [], []>} : vector<32x32xf32>, vector<32x64xf32>, vector<32x64xf32> -> vector<32x64xf32>
    %c0_165 = arith.constant 0 : index
    %c10_166 = arith.constant 10 : index
    %354 = vector.load %arg12[%c0_165, %c10_166] : memref<32x74xf32, #tpu.memory_space<vmem>>, vector<32x64xf32>
    %355 = arith.addf %354, %353 : vector<32x64xf32>
    %356 = tpu.iota {dimensions = array<i32: 0>} : vector<64x128xi32>
    %357 = tpu.iota {dimensions = array<i32: 1>} : vector<64x128xi32>
    %c2_i32_167 = arith.constant 2 : i32
    %358 = vector.broadcast %c2_i32_167 : i32 to vector<64x128xi32>
    %359 = arith.muli %358, %356 : vector<64x128xi32>
    %360 = arith.subi %357, %359 : vector<64x128xi32>
    %c0_i32_168 = arith.constant 0 : i32
    %361 = vector.broadcast %c0_i32_168 : i32 to vector<64x128xi32>
    %362 = arith.cmpi eq, %360, %361 : vector<64x128xi32>
    %c1_i32_169 = arith.constant 1 : i32
    %363 = vector.broadcast %c1_i32_169 : i32 to vector<64x128xi32>
    %364 = arith.cmpi eq, %360, %363 : vector<64x128xi32>
    %365 = arith.ori %362, %364 : vector<64x128xi1>
    %cst_170 = arith.constant 1.000000e+00 : f32
    %cst_171 = arith.constant 0.000000e+00 : f32
    %366 = vector.broadcast %cst_170 : f32 to vector<64x128xf32>
    %367 = vector.broadcast %cst_171 : f32 to vector<64x128xf32>
    %368 = arith.select %365, %366, %367 : vector<64x128xi1>, vector<64x128xf32>
    %cst_172 = arith.constant dense<0.000000e+00> : vector<32x128xf32>
    %369 = tpu.matmul %355, %368, %cst_172 {dimension_numbers = #tpu.dot_dimension_numbers<[1], [0], [0], [1], [0, 0, 1, 1], [], []>} : vector<32x64xf32>, vector<64x128xf32>, vector<32x128xf32> -> vector<32x128xf32>
    %c0_173 = arith.constant 0 : index
    %c10_174 = arith.constant 10 : index
    %370 = vector.load %arg11[%c0_173, %c10_174] : memref<32x138xf32, #tpu.memory_space<vmem>>, vector<32x128xf32>
    %371 = arith.addf %370, %369 : vector<32x128xf32>
    %c0_175 = arith.constant 0 : index
    %c0_176 = arith.constant 0 : index
    %372 = vector.load %arg6[%c0_175, %c0_176] : memref<16x32xf32, #tpu.memory_space<vmem>>, vector<16x32xf32>
    %cst_177 = arith.constant dense<0.000000e+00> : vector<16x128xf32>
    %373 = tpu.matmul %372, %371, %cst_177 {dimension_numbers = #tpu.dot_dimension_numbers<[1], [0], [0], [1], [0, 0, 1, 1], [], []>} : vector<16x32xf32>, vector<32x128xf32>, vector<16x128xf32> -> vector<16x128xf32>
    %c0_178 = arith.constant 0 : index
    %c0_179 = arith.constant 0 : index
    %374 = vector.load %arg7[%c0_178, %c0_179] : memref<16x1xf32, #tpu.memory_space<vmem>>, vector<16x1xf32>
    %375 = vector.broadcast %374 : vector<16x1xf32> to vector<16x128xf32>
    %376 = arith.addf %373, %375 : vector<16x128xf32>
    %377 = arith.addf %376, %1 : vector<16x128xf32>
    %c0_180 = arith.constant 0 : index
    %c0_181 = arith.constant 0 : index
    %c0_182 = arith.constant 0 : index
    %378 = vector.load %arg9[%c0_180, %c0_181, %c0_182] : memref<1x16x128xf32, #tpu.memory_space<vmem>>, vector<1x16x128xf32>
    %379 = vector.shape_cast %378 : vector<1x16x128xf32> to vector<16x128xf32>
    %380 = vector.shape_cast %377 : vector<16x128xf32> to vector<1x16x128xf32>
    tpu.vector_store %arg9[%c0_180, %c0_181, %c0_182], %380 {strides = array<i32>} : memref<1x16x128xf32, #tpu.memory_space<vmem>>, vector<1x16x128xf32>,
    return
  }
  func.func @transform_0(%arg0: i32) -> i32 {
    %c0_i32 = arith.constant 0 : i32
    %c0_i32_0 = arith.constant 0 : i32
    return %c0_i32 : i32
  }
  func.func @transform_1(%arg0: i32) -> (i32, i32) {
    %c0_i32 = arith.constant 0 : i32
    %c0_i32_0 = arith.constant 0 : i32
    %c0_i32_1 = arith.constant 0 : i32
    return %c0_i32, %c0_i32_0 : i32, i32
  }
  func.func @transform_2(%arg0: i32) -> (i32, i32) {
    %c0_i32 = arith.constant 0 : i32
    %c0_i32_0 = arith.constant 0 : i32
    %c0_i32_1 = arith.constant 0 : i32
    return %c0_i32, %c0_i32_0 : i32, i32
  }
  func.func @transform_3(%arg0: i32) -> (i32, i32, i32) {
    %c0_i32 = arith.constant 0 : i32
    %c0_i32_0 = arith.constant 0 : i32
    %c0_i32_1 = arith.constant 0 : i32
    %c0_i32_2 = arith.constant 0 : i32
    return %c0_i32, %c0_i32_0, %c0_i32_1 : i32, i32, i32
  }
  func.func @transform_4(%arg0: i32) -> (i32, i32, i32) {
    %c0_i32 = arith.constant 0 : i32
    %c0_i32_0 = arith.constant 0 : i32
    %c0_i32_1 = arith.constant 0 : i32
    %c0_i32_2 = arith.constant 0 : i32
    return %c0_i32, %c0_i32_0, %c0_i32_1 : i32, i32, i32
  }
  func.func @transform_5(%arg0: i32) -> (i32, i32) {
    %c0_i32 = arith.constant 0 : i32
    %c0_i32_0 = arith.constant 0 : i32
    %c0_i32_1 = arith.constant 0 : i32
    return %c0_i32, %c0_i32_0 : i32, i32
  }
  func.func @transform_6(%arg0: i32) -> (i32, i32) {
    %c0_i32 = arith.constant 0 : i32
    %c0_i32_0 = arith.constant 0 : i32
    %c0_i32_1 = arith.constant 0 : i32
    return %c0_i32, %c0_i32_0 : i32, i32
  }
  func.func @transform_7(%arg0: i32) -> (i32, i32, i32) {
    %c0_i32 = arith.constant 0 : i32
    %c0_i32_0 = arith.constant 0 : i32
    %c0_i32_1 = arith.constant 0 : i32
    return %arg0, %c0_i32, %c0_i32_0 : i32, i32, i32
  }
  func.func @transform_8(%arg0: i32) -> (i32, i32, i32) {
    %c0_i32 = arith.constant 0 : i32
    %c0_i32_0 = arith.constant 0 : i32
    %c0_i32_1 = arith.constant 0 : i32
    return %arg0, %c0_i32, %c0_i32_0 : i32, i32, i32
  }
}

</mosaic_0001>

<bundles_post_ra>
// kernel: tpu_custom_call.1
= control target key start
LH: loop header
LB: loop body
LE: loop exit
PB: predicated region body
PF: predicated region fallthrough
CT: control target
= control target key end

     0   :  { %13 = vsyncpa [#allocation8], 0  ;;  %s7080_s0 = inlined_call_operand.vmem [shape: f32[5], index: 0, kind: input, shape index: {}]   ;;  %s7081_s1 = inlined_call_operand.vmem [shape: f32[32,16], index: 1, kind: input, shape index: {}]   ;;  %s7082_s2 = inlined_call_operand.vmem [shape: f32[32,1], index: 2, kind: input, shape index: {}]   ;;  %s7083_s3 = inlined_call_operand.vmem [shape: f32[4,32,11], index: 3, kind: input, shape index: {}]   ;;  %s7084_s4 = inlined_call_operand.vmem [shape: f32[4,32,1], index: 4, kind: input, shape index: {}]   ;;  %s7085_s5 = inlined_call_operand.vmem [shape: f32[16,32], index: 5, kind: input, shape index: {}]   ;;  %s7086_s6 = inlined_call_operand.vmem [shape: f32[16,1], index: 6, kind: input, shape index: {}]   ;;  %s7087_s7 = inlined_call_operand.vmem [shape: f32[2,16,128], index: 7, kind: input, shape index: {}]   ;;  %s7088_s8 = inlined_call_operand.hbm [shape: f32[2,16,128], index: 8, kind: output, shape index: {}]  }
   0x1   :  { %14 = vsyncpa [#allocation7], 0 }
   0x2   :  { %16 = vsyncpa [#allocation7 + $0x1], 0  ;;  %s4697_s27 = smov 0   ;;  %s4699_s28 = smov 0  }
   0x3   :  { %s4701_s29 = smov 0   ;;  %s4703_s30 = smov 0  }
   0x4 LB: > { %s4718_s9 = sadd.s32 4294967295, %s4622_s30   ;;  %s3895_s10 = sadd.s32 4294967294, %s4622_s30   ;;  %s4622_s30 = sphi %s4703_s30, %s7363_s30   ;;  %s4618_s29 = sphi %s4701_s29, %s7362_s29   ;;  %s4614_s28 = sphi %s4699_s28, %s7361_s28   ;;  %s4610_s27 = sphi %s4697_s27, %s7360_s27  }
   0x5   : > { %s4722_s11 = sadd.s32 1, %s4622_s30   ;;  %s202_s12 = sadd.s32 1, %s4618_s29 }
   0x6   : > { %s199_s13 = ssub.s32 %s4622_s30, %s4722_s11  ;;  %p212_p0 = scmp.ne.s32.totalorder %s4618_s29, %s4614_s28 }
   0x7   : > { %p200_p1 = scmp.eq.s32.totalorder %s199_s13, 0  ;;  %p213_p2 = scmp.eq.s32.totalorder %s4718_s9, 1 }
   0x8   : > { %p218_p3 = scmp.ne.s32.totalorder %s4614_s28, %s4610_s27  ;;  %p219_p4 = scmp.eq.s32.totalorder %s3895_s10, 1 }
   0x9   : > { %s4733_s14 = scalar_select %p200_p1, %s4618_s29, %s202_s12  }
   0xa   : > { %p4735_p5 = por %p213_p2, %p212_p0  ;;  %p4739_p6 = por %p219_p4, %p218_p3 }
   0xb   : > { %p3896_p7 = scmp.ge.s32.totalorder %s4622_s30, 1  ;;  %p226_p8 = scmp.lt.s32.totalorder %s4622_s30, 3 }
   0xc   : > { %p4336_p9 = scmp.eq.s32.totalorder %s4718_s9, 0  ;;  %s239_s20 = sshll.u32 %s7080_s0, 4  ;;  %s240_s20 = int_to_ptr.vmem [resolvable:$true] %s239_s20 }
   0xd   : > { %p4746_p10 = pnand %p3896_p7, %p226_p8  ;;  %s4541_s21 = scalar_lea.vmem %s240_s20, 16 }
   0xe   : > { %p4542_p13 = scmp.ne.s32.totalorder %s240_s20, %s4541_s21  ;;  %p4549_p3 = scmp.lt.s32.totalorder %s240_s20, %s240_s20 }
   0xf   : > { %p4328_p11 = pneg %p4746_p10  ;;  %p4550_p4 = scmp.lt.s32.totalorder %s4541_s21, %s4541_s21 }
  0x11   : > { %p4329_p12 = pnand %p4336_p9, %p4328_p11  ;;  %p4551_p7 = por %p4550_p4, %p4549_p3 }
  0x13   : > { %p4543_p0 = pneg %p4329_p12 }
  0x15   : > { %p4544_p1 = pnand %p4543_p0, %p4542_p13 }
  0x17   : > { %p4545_p2 = pneg %p4544_p1 }
  0x19   : > { %p4552_p8 = pnand %p4551_p7, %p4545_p2 }
  0x1b   : > { %4555 = shalt.err (!%p4552_p8)
}
  0x1c   : > { %s4624_s22 = smov [#allocation6]   ;;  %278 = sbr.rel (%p4746_p10) target bundleno = 3972 (0xf84), region = 52 }
  0x1d   : > { %4331 = dma.vmem_to_smem (!%p4329_p12), %s240_s20, 16, %s4624_s22, [#allocation8]  }
  0x23   : > { %4601 = dma.done.wait (%p4336_p9), [#allocation8], 16  }
  0x24   : > { %4603 = vsyncadd (%p4336_p9), [#allocation8], 4294967280 }
  0x25   : > { %284 = sfence }
  0x26   : > { %v326_v0 = vld [vmem:[%s7082_s2 + $0x10] sm:$0xff]  ;;  %p313_p11 = scmp.lt.s32.totalorder %s4718_s9, 1  ;;  %v7101_v1 = vmov 0   ;;  %v320_v2 = vld [vmem:[%s7081_s1] sm:$0xff]  ;;  %vm7149_vm0 = vcmask 130048   ;;  %v327_v3 = vld [vmem:[%s7082_s2 + $0x18] sm:$0xff] }
  0x27   : > { %4399 = vset.pattern.permute.xlu1 %v7101_v1  ;;  %4398 = vset.pattern.permute.xlu0 %v7101_v1  ;;  %v324_v4 = vld [vmem:[%s7082_s2] sm:$0xff]  ;;  %v325_v5 = vld [vmem:[%s7082_s2 + $0x8] sm:$0xff]  ;;  %v7099_v10 = vmov 1   ;;  %v322_v12 = vld [vmem:[%s7081_s1 + $0x10] sm:$0xff]  ;;  %v7097_v15 = vmov 2   ;;  %v7109_v17 = vmov 8  }
  0x28   : > { %340 = vperm.xlu1 %4399, %v326_v0   ;;  %s314_s10 = scalar_select %p313_p11, %s4718_s9, 1  ;;  %4089 = vmatprep.mubr.msk.f32.mxu1 %vm7149_vm0, %v320_v2  ;;  %v4793_v9 = vld [vmem:[%s7083_s3 + $0x8] sm:$0xff]  ;;  %v4806_v13 = vld [vmem:[%s7083_s3] sm:$0xff]  ;;  %v323_v14 = vld [vmem:[%s7081_s1 + $0x18] sm:$0xff]  ;;  %v7105_v18 = vmov 10   ;;  %v7093_v20 = vmov 3  }
  0x29   : > { %330 = vperm.xlu0 %4398, %v324_v4   ;;  %v321_v11 = vld [vmem:[%s7081_s1 + $0x8] sm:$0xff]  ;;  %v4821_v16 = vld [vmem:[%s7083_s3 + $0x10] sm:$0xff]  ;;  %v4833_v19 = vld [vmem:[%s7083_s3 + $0x18] sm:$0xff]  ;;  %v7095_v23 = vmov 4   ;;  %v7091_v24 = vmov 5   ;;  %v7089_v27 = vmov 6  }
  0x2a   : > { %s4005_s19 = sshll.u32 %s314_s10, 4  ;;  %v4843_v21 = vld [vmem:[%s7083_s3 + $0x28] sm:$0xff]  ;;  %v4850_v22 = vld [vmem:[%s7083_s3 + $0x30] sm:$0xff]  ;;  %v4871_v25 = vld [vmem:[%s7083_s3 + $0x20] sm:$0xff]  ;;  %v7107_v28 = vmov 7   ;;  %v7103_v29 = vmov 9  }
  0x2b   : > { %s4783_s22 = scalar_lea.vmem %s7087_s7, %s4005_s19  ;;  %v4879_v26 = vld [vmem:[%s7083_s3 + $0x38] sm:$0xff]  ;;  %v1144_v34 = vld [vmem:[%s7084_s4] sm:$0xff]  ;;  %v1146_v36 = vld [vmem:[%s7084_s4 + $0x10] sm:$0xff]  ;;  %vm460_vm1 = vcmask 80896   ;;  %s446_s10 = sld [smem:[#allocation6]]  ;;  %v4636_v54 = vmov 0.0  }
  0x2c   : > { %345 = vperm.xlu1 %4399, %v327_v3   ;;  %v318_v6 = vld [vmem:[%s4783_s22] sm:$0xff]  ;;  %v319_v7 = vld [vmem:[%s4783_s22 + $0x8] sm:$0xff]  ;;  %461 = vst.msk [vmem:[#allocation2] sm:$0xff] %vm460_vm1, %v4636_v54  ;;  %462 = vst.msk [vmem:[#allocation2 + $0x10] sm:$0xff] %vm460_vm1, %v4636_v54  ;;  %s4637_s12 = smov 10   ;;  %vm481_vm6 = vcmask 1047632  }
  0x2d   : > { %v4226_v8 = vpack.c.bf16 %v319_v7, %v318_v6  ;;  %335 = vperm.xlu0 %4398, %v325_v5   ;;  %463 = vst.msk [vmem:[#allocation2 + $0x20] sm:$0xff] %vm460_vm1, %v4636_v54  ;;  %464 = vst.msk [vmem:[#allocation2 + $0x30] sm:$0xff] %vm460_vm1, %v4636_v54  ;;  %s4638_s13 = smov 127   ;;  %s7174_s17 = smov 126   ;;  %vm582_vm7 = vcmask 1039360   ;;  %vm643_vm8 = vcmask 1031168  }
  0x2e   : > { %1186 = vst.msk [vmem:[#allocation3] sm:$0xff] %vm460_vm1, %v4636_v54  ;;  %1187 = vst.msk [vmem:[#allocation3 + $0x10] sm:$0xff] %vm460_vm1, %v4636_v54  ;;  %s7170_s18 = smov 125   ;;  %s7172_s19 = smov 124   ;;  %vm704_vm9 = vcmask 1022976   ;;  %vm765_vm10 = vcmask 1014784  }
  0x2f   : > { %4227 = vmatprep.subr.bf16.mxu1 %v4226_v8  ;;  %1188 = vst.msk [vmem:[#allocation3 + $0x20] sm:$0xff] %vm460_vm1, %v4636_v54  ;;  %1189 = vst.msk [vmem:[#allocation3 + $0x30] sm:$0xff] %vm460_vm1, %v4636_v54  ;;  %s7156_s20 = smov 123   ;;  %s7154_s21 = smov 122   ;;  %vm826_vm11 = vcmask 1006592   ;;  %vm887_vm12 = vcmask 998400  }
  0x30   : > { %4401 = vset.pattern.permute.xlu1 %v7099_v10  ;;  %4229 = vmatpush3.bf16.msra.mxu1 %v4226_v8  ;;  %2039 = vst.msk [vmem:[#allocation4] sm:$0xff] %vm460_vm1, %v4636_v54  ;;  %2040 = vst.msk [vmem:[#allocation4 + $0x8] sm:$0xff] %vm460_vm1, %v4636_v54  ;;  %s7152_s23 = smov 121   ;;  %s7134_s24 = smov 120   ;;  %vm948_vm13 = vcmask 990208   ;;  %vm1009_vm14 = vcmask 982016  }
  0x31   : > { %539 = vperm.xlu1 %4401, %v4793_v9   ;;  %4400 = vset.pattern.permute.xlu0 %v7099_v10  ;;  %2041 = vst.msk [vmem:[#allocation4 + $0x10] sm:$0xff] %vm460_vm1, %v4636_v54  ;;  %2042 = vst.msk [vmem:[#allocation4 + $0x18] sm:$0xff] %vm460_vm1, %v4636_v54  ;;  %v451_v60 = vstv %s446_s10  ;;  %s7132_s25 = smov 119   ;;  %s7130_s26 = smov 118   ;;  %vm7151_vm15 = vcmask 973824  }
  0x32   : > { %535 = vperm.xlu0 %4400, %v4806_v13   ;;  %2642 = vst.msk [vmem:[#allocation5] sm:$0xff] %vm460_vm1, %v4636_v54  ;;  %2643 = vst.msk [vmem:[#allocation5 + $0x8] sm:$0xff] %vm460_vm1, %v4636_v54  ;;  %s7272_s10 = smov 118  }
  0x33   : > { %4090 = vmatmul.mubr.msk.f32.vlgmr.msra.gmra.mrb[0].mxu1 %vm7149_vm0, %v321_v11  ;;  %2644 = vst.msk [vmem:[#allocation5 + $0x10] sm:$0xff] %vm460_vm1, %v4636_v54  ;;  %2645 = vst.msk [vmem:[#allocation5 + $0x18] sm:$0xff] %vm460_vm1, %v4636_v54 }
  0x34   : > { %4092 = vmatprep.mubr.msk.f32.mxu1 %vm7149_vm0, %v322_v12 }
  0x35   : > { %4402 = vset.pattern.permute.xlu1 %v7097_v15 }
  0x36   : > { %596 = vperm.xlu1 %4402, %v4806_v13   ;;  %4417 = vset.pattern.permute.xlu0 %v7109_v17 }
  0x37   : > { %4093 = vmatmul.mubr.msk.f32.gmra.mrb[2].mxu1 %vm7149_vm0, %v323_v14  ;;  %970 = vperm.xlu0 %4417, %v4821_v16  }
  0x3a   : > { %600 = vperm.xlu1 %4402, %v4793_v9  }
  0x3b   : > { %4420 = vset.pattern.permute.xlu0 %v7105_v18 }
  0x3c   : > { %1088 = vperm.xlu0 %4420, %v4793_v9  }
  0x3e   : > { %4403 = vset.pattern.permute.xlu1 %v7099_v10 }
  0x3f   : > { %543 = vperm.xlu1 %4403, %v4821_v16  }
  0x40   : > { %1092 = vperm.xlu0 %4420, %v4821_v16  }
  0x43   : > { %547 = vperm.xlu1 %4403, %v4833_v19  }
  0x44   : > { %4422 = vset.pattern.permute.xlu0 %v7097_v15 }
  0x45   : > { %604 = vperm.xlu0 %4422, %v4821_v16  }
  0x47   : > { %4404 = vset.pattern.permute.xlu1 %v7093_v20 }
  0x48   : > { %661 = vperm.xlu1 %4404, %v4793_v9  }
  0x49   : > { %1324 = vperm.xlu0 %4422, %v4843_v21  }
  0x4c   : > { %4405 = vset.pattern.permute.xlu1 %v7095_v23 }
  0x4d   : > { %718 = vperm.xlu1 %4405, %v4806_v13   ;;  %1328 = vperm.xlu0 %4422, %v4850_v22  }
  0x51   : > { %4406 = vset.pattern.permute.xlu1 %v7097_v15  ;;  %4429 = vset.pattern.permute.xlu0 %v7095_v23 }
  0x52   : > { %608 = vperm.xlu1 %4406, %v4833_v19   ;;  %722 = vperm.xlu0 %4429, %v4793_v9  }
  0x56   : > { %4407 = vset.pattern.permute.xlu1 %v7093_v20  ;;  %1444 = vperm.xlu0 %4429, %v4843_v21  }
  0x57   : > { %665 = vperm.xlu1 %4407, %v4821_v16  }
  0x5a   : > { %4432 = vset.pattern.permute.xlu0 %v7093_v20 }
  0x5b   : > { %4408 = vset.pattern.permute.xlu1 %v7091_v24  ;;  %657 = vperm.xlu0 %4432, %v4806_v13  }
  0x5c   : > { %779 = vperm.xlu1 %4408, %v4806_v13  }
  0x5f   : > { %669 = vperm.xlu0 %4432, %v4833_v19  }
  0x60   : > { %783 = vperm.xlu1 %4408, %v4793_v9  }
  0x63   : > { %1380 = vperm.xlu0 %4432, %v4871_v25  }
  0x64   : > { %4409 = vset.pattern.permute.xlu1 %v7095_v23 }
  0x65   : > { %726 = vperm.xlu1 %4409, %v4821_v16  }
  0x67   : > { %1392 = vperm.xlu0 %4432, %v4879_v26  }
  0x69   : > { %730 = vperm.xlu1 %4409, %v4833_v19  }
  0x6b   : > { %4435 = vset.pattern.permute.xlu0 %v7091_v24 }
  0x6c   : > { %787 = vperm.xlu0 %4435, %v4821_v16  }
  0x6d   : > { %4410 = vset.pattern.permute.xlu1 %v7089_v27 }
  0x6e   : > { %844 = vperm.xlu1 %4410, %v4793_v9  }
  0x70   : > { %1508 = vperm.xlu0 %4435, %v4850_v22  }
  0x72   : > { %4411 = vset.pattern.permute.xlu1 %v7107_v28 }
  0x73   : > { %901 = vperm.xlu1 %4411, %v4806_v13  }
  0x74   : > { %4438 = vset.pattern.permute.xlu0 %v7107_v28 }
  0x75   : > { %905 = vperm.xlu0 %4438, %v4793_v9  }
  0x77   : > { %4412 = vset.pattern.permute.xlu1 %v7091_v24 }
  0x78   : > { %791 = vperm.xlu1 %4412, %v4833_v19  }
  0x79   : > { %1624 = vperm.xlu0 %4438, %v4843_v21  }
  0x7c   : > { %4413 = vset.pattern.permute.xlu1 %v7089_v27 }
  0x7d   : > { %848 = vperm.xlu1 %4413, %v4821_v16   ;;  %4441 = vset.pattern.permute.xlu0 %v7089_v27 }
  0x7e   : > { %840 = vperm.xlu0 %4441, %v4806_v13  }
  0x81   : > { %4414 = vset.pattern.permute.xlu1 %v7109_v17 }
  0x82   : > { %962 = vperm.xlu1 %4414, %v4806_v13   ;;  %852 = vperm.xlu0 %4441, %v4833_v19  }
  0x86   : > { %966 = vperm.xlu1 %4414, %v4793_v9   ;;  %1560 = vperm.xlu0 %4441, %v4871_v25  }
  0x8a   : > { %4415 = vset.pattern.permute.xlu1 %v7107_v28  ;;  %1572 = vperm.xlu0 %4441, %v4879_v26  }
  0x8b   : > { %909 = vperm.xlu1 %4415, %v4821_v16  }
  0x8e   : > { %4444 = vset.pattern.permute.xlu0 %v7103_v29 }
  0x8f   : > { %913 = vperm.xlu1 %4415, %v4833_v19   ;;  %1023 = vperm.xlu0 %4444, %v4806_v13  }
  0x93   : > { %4416 = vset.pattern.permute.xlu1 %v7103_v29 }
  0x94   : > { %1027 = vperm.xlu1 %4416, %v4793_v9  }
  0x98   : > { %4418 = vset.pattern.permute.xlu1 %v7105_v18 }
  0x99   : > { %1084 = vperm.xlu1 %4418, %v4806_v13  }
  0x9d   : > { %4419 = vset.pattern.permute.xlu1 %v7109_v17 }
  0x9e   : > { %974 = vperm.xlu1 %4419, %v4833_v19  }
  0xa2   : > { %4421 = vset.pattern.permute.xlu1 %v7103_v29 }
  0xa3   : > { %1031 = vperm.xlu1 %4421, %v4821_v16  }
  0xa7   : > { %1035 = vperm.xlu1 %4421, %v4833_v19   ;;  %v4919_v30 = vpop.permute.xlu1 %340 }
  0xa8   : > { %v331_v49 = vpop.permute.xlu0 %330 }
  0xab   : > { %4423 = vset.pattern.permute.xlu1 %v7105_v18  ;;  %v4922_v31 = vpop.permute.xlu1 %345 }
  0xac   : > { %1096 = vperm.xlu1 %4423, %v4833_v19   ;;  %v336_v51 = vpop.permute.xlu0 %335 }
  0xb0   : > { %4424 = vset.pattern.permute.xlu1 %v7101_v1  ;;  %v4926_v32 = vpop.permute.xlu1 %539 }
  0xb1   : > { %505 = vperm.xlu1 %4424, %v4793_v9   ;;  %v4989_v52 = vpop.permute.xlu0 %535 }
  0xb5   : > { %510 = vperm.xlu1 %4424, %v4821_v16   ;;  %v4930_v33 = vpop.permute.xlu1 %596 }
  0xb6   : > { %v5013_v56 = vpop.permute.xlu0 %970 }
  0xb9   : > { %1150 = vperm.xlu1 %4424, %v1144_v34   ;;  %v4935_v35 = vpop.permute.xlu1 %600 }
  0xbb   : > { %v5019_v61 = vpop.permute.xlu0 %1088 }
  0xbd   : > { %1160 = vperm.xlu1 %4424, %v1146_v36  }
  0xbe   : > { %v4940_v37 = vpop.permute.xlu1 %543 }
  0xbf   : > { %v5028_v11 = vpop.permute.xlu0 %1092 }
  0xc1   : > { %4425 = vset.pattern.permute.xlu1 %v7099_v10 }
  0xc2   : > { %1260 = vperm.xlu1 %4425, %v4871_v25   ;;  %v4944_v38 = vpop.permute.xlu1 %547 }
  0xc4   : > { %v5038_v34 = vpop.permute.xlu0 %604 }
  0xc6   : > { %4426 = vset.pattern.permute.xlu1 %v7097_v15 }
  0xc7   : > { %1320 = vperm.xlu1 %4426, %v4871_v25   ;;  %v4948_v39 = vpop.permute.xlu1 %661 }
  0xcb   : > { %4427 = vset.pattern.permute.xlu1 %v7099_v10 }
  0xcc   : > { %1268 = vperm.xlu1 %4427, %v4850_v22   ;;  %v4952_v40 = vpop.permute.xlu1 %718 }
  0xd0   : > { %1272 = vperm.xlu1 %4427, %v4879_v26  }
  0xd1   : > { %v4955_v41 = vpop.permute.xlu1 %608 }
  0xd4   : > { %4428 = vset.pattern.permute.xlu1 %v7093_v20 }
  0xd5   : > { %1384 = vperm.xlu1 %4428, %v4843_v21  }
  0xd6   : > { %v4959_v42 = vpop.permute.xlu1 %665 }
  0xd9   : > { %4430 = vset.pattern.permute.xlu1 %v7095_v23 }
  0xda   : > { %1440 = vperm.xlu1 %4430, %v4871_v25  }
  0xdb   : > { %v4963_v43 = vpop.permute.xlu1 %779 }
  0xde   : > { %4431 = vset.pattern.permute.xlu1 %v7097_v15 }
  0xdf   : > { %1332 = vperm.xlu1 %4431, %v4879_v26   ;;  %v4967_v44 = vpop.permute.xlu1 %783 }
  0xe3   : > { %4433 = vset.pattern.permute.xlu1 %v7093_v20 }
  0xe4   : > { %1388 = vperm.xlu1 %4433, %v4850_v22   ;;  %v4971_v45 = vpop.permute.xlu1 %726 }
  0xe8   : > { %4434 = vset.pattern.permute.xlu1 %v7091_v24  ;;  %v4974_v46 = vpop.permute.xlu1 %730 }
  0xe9   : > { %1500 = vperm.xlu1 %4434, %v4871_v25  }
  0xed   : > { %1504 = vperm.xlu1 %4434, %v4843_v21   ;;  %v4978_v47 = vpop.permute.xlu1 %844 }
  0xf1   : > { %4436 = vset.pattern.permute.xlu1 %v7095_v23 }
  0xf2   : > { %1448 = vperm.xlu1 %4436, %v4850_v22   ;;  %v4982_v48 = vpop.permute.xlu1 %901 }
  0xf6   : > { %1452 = vperm.xlu1 %4436, %v4879_v26  }
  0xf7   : > { %v4985_v50 = vpop.permute.xlu1 %791 }
  0xfa   : > { %4437 = vset.pattern.permute.xlu1 %v7089_v27 }
  0xfb   : > { %1564 = vperm.xlu1 %4437, %v4843_v21  }
  0xfc   : > { %v4991_v53 = vpop.permute.xlu1 %848 }
  0xff   : > { %4439 = vset.pattern.permute.xlu1 %v7107_v28 }
 0x100   : > { %1620 = vperm.xlu1 %4439, %v4871_v25  }
 0x101   : > { %v5011_v55 = vpop.permute.xlu1 %962 }
 0x104   : > { %4440 = vset.pattern.permute.xlu1 %v7091_v24 }
 0x105   : > { %1512 = vperm.xlu1 %4440, %v4879_v26   ;;  %v5017_v57 = vpop.permute.xlu1 %966 }
 0x106   : > { %v4091_v58 = vpop.f32.mrb[0].mxu1 }
 0x107   : > { %v427_v59 = vpop.f32.mrb[1].mxu1  ;;  %v433_v63 = vadd.f32 %v4091_v58, %v336_v51  ;;  %v5043_v51 = vpop.permute.xlu0 %1324 }
 0x108   : > { %v428_v62 = vadd.f32 %v427_v59, %v331_v49  ;;  %7179 = vst [vmem:[#allocation12_spill] sm:$0xff] %v5043_v51 }
 0x109   : > { %4442 = vset.pattern.permute.xlu1 %v7089_v27  ;;  %v453_v8 = vmul.f32 %v451_v60, %v433_v63  ;;  %vm448_vm4 = vcmp.ge.f32.partialorder %v433_v63, 0.0 }
 0x10a   : > { %v452_v0 = vmul.f32 %v451_v60, %v428_v62  ;;  %1568 = vperm.xlu1 %4442, %v4850_v22   ;;  %v5023_v2 = vpop.permute.xlu1 %909  ;;  %v4094_v3 = vpop.f32.mrb[2].mxu1  ;;  %vm447_vm2 = vcmp.ge.f32.partialorder %v428_v62, 0.0 }
 0x10b   : > { %v443_v4 = vadd.f32 %v4094_v3, %v4922_v31  ;;  %v437_v5 = vpop.f32.mrb[3].mxu1  ;;  %v457_v31 = vsel %vm448_vm4, %v433_v63, %v453_v8  ;;  %v5047_v58 = vpop.permute.xlu0 %1328 }
 0x10c   : > { %v438_v6 = vadd.f32 %v437_v5, %v4919_v30  ;;  %v456_v7 = vsel %vm447_vm2, %v428_v62, %v452_v0  ;;  %7180 = vst [vmem:[#allocation13_spill] sm:$0xff] %v5047_v58  ;;  %vm7150_vm2 = vcmask 965632  }
 0x10d   : > { %v455_v9 = vmul.f32 %v451_v60, %v443_v4  ;;  %469 = vrot.lane.b32.xlu0 %v456_v7, %s4637_s12  ;;  %vm450_vm3 = vcmp.ge.f32.partialorder %v443_v4, 0.0 }
 0x10e   : > { %4443 = vset.pattern.permute.xlu1 %v7109_v17  ;;  %v5031_v12 = vpop.permute.xlu1 %913  ;;  %v454_v16 = vmul.f32 %v451_v60, %v438_v6  ;;  %vm449_vm5 = vcmp.ge.f32.partialorder %v438_v6, 0.0 }
 0x10f   : > { %1680 = vperm.xlu1 %4443, %v4871_v25   ;;  %v459_v14 = vsel %vm450_vm3, %v443_v4, %v455_v9  ;;  %v5051_v60 = vpop.permute.xlu0 %722 }
 0x110   : > { %v458_v36 = vsel %vm449_vm5, %v438_v6, %v454_v16 }
 0x111   : > { %475 = vrot.lane.b32.xlu0 %v459_v14, %s4637_s12 }
 0x113   : > { %v5035_v30 = vpop.permute.xlu1 %1027  ;;  %471 = vrot.lane.b32.xlu1 %v457_v31, %s4637_s12  ;;  %v5057_v0 = vpop.permute.xlu0 %1444 }
 0x114   : > { %7181 = vst [vmem:[#allocation14_spill] sm:$0xff] %v5057_v0 }
 0x115   : > { %473 = vrot.lane.b32.xlu0 %v458_v36, %s4637_s12 }
 0x117   : > { %v5061_v4 = vpop.permute.xlu0 %657 }
 0x118   : > { %v5041_v49 = vpop.permute.xlu1 %1084 }
 0x11b   : > { %v5065_v6 = vpop.permute.xlu0 %669 }
 0x11d   : > { %v5045_v54 = vpop.permute.xlu1 %974 }
 0x11f   : > { %v5071_v9 = vpop.permute.xlu0 %1380 }
 0x120   : > { %7184 = vst [vmem:[#allocation17_spill] sm:$0xff] %v5071_v9 }
 0x122   : > { %v5049_v59 = vpop.permute.xlu1 %1031 }
 0x123   : > { %v5075_v16 = vpop.permute.xlu0 %1392 }
 0x124   : > { %7186 = vst [vmem:[#allocation19_spill] sm:$0xff] %v5075_v16 }
 0x126   : > { %v5053_v62 = vpop.permute.xlu1 %1035 }
 0x127   : > { %v5079_v36 = vpop.permute.xlu0 %787 }
 0x12b   : > { %v5055_v63 = vpop.permute.xlu1 %1096  ;;  %v5085_v20 = vpop.permute.xlu0 %1508 }
 0x12c   : > { %7190 = vst [vmem:[#allocation23_spill] sm:$0xff] %v5085_v20 }
 0x12f   : > { %v5089_v15 = vpop.permute.xlu0 %905 }
 0x130   : > { %v5059_v3 = vpop.permute.xlu1 %505 }
 0x133   : > { %v5093_v1 = vpop.permute.xlu0 %1624 }
 0x134   : > { %v5063_v5 = vpop.permute.xlu1 %510  ;;  %7193 = vst [vmem:[#allocation26_spill] sm:$0xff] %v5093_v1  ;;  %v7221_v1 = vmov 1  }
 0x137   : > { %v5097_v18 = vpop.permute.xlu0 %840 }
 0x138   : > { %v5067_v7 = vpop.permute.xlu1 %1150 }
 0x139   : > { %7182 = vst [vmem:[#allocation15_spill] sm:$0xff] %v5067_v7 }
 0x13b   : > { %v5101_v17 = vpop.permute.xlu0 %852 }
 0x13c   : > { %v5069_v8 = vpop.permute.xlu1 %1160 }
 0x13d   : > { %7183 = vst [vmem:[#allocation16_spill] sm:$0xff] %v5069_v8 }
 0x13f   : > { %v5107_v20 = vpop.permute.xlu0 %1560 }
 0x140   : > { %7198 = vst [vmem:[#allocation31_spill] sm:$0xff] %v5107_v20 }
 0x141   : > { %v5073_v14 = vpop.permute.xlu1 %1260 }
 0x142   : > { %7185 = vst [vmem:[#allocation18_spill] sm:$0xff] %v5073_v14 }
 0x146   : > { %v5077_v31 = vpop.permute.xlu1 %1320 }
 0x147   : > { %7187 = vst [vmem:[#allocation20_spill] sm:$0xff] %v5077_v31 }
 0x14b   : > { %v5081_v27 = vpop.permute.xlu1 %1268 }
 0x14c   : > { %7188 = vst [vmem:[#allocation21_spill] sm:$0xff] %v5081_v27 }
 0x14f   : > { %v5083_v24 = vpop.permute.xlu1 %1272 }
 0x150   : > { %7189 = vst [vmem:[#allocation22_spill] sm:$0xff] %v5083_v24  ;;  %v5111_v24 = vpop.permute.xlu0 %1572 }
 0x151   : > { %7200 = vst [vmem:[#allocation33_spill] sm:$0xff] %v5111_v24 }
 0x154   : > { %v5087_v23 = vpop.permute.xlu1 %1384  ;;  %v5115_v9 = vpop.permute.xlu0 %1023 }
 0x155   : > { %7191 = vst [vmem:[#allocation24_spill] sm:$0xff] %v5087_v23 }
 0x159   : > { %v5091_v10 = vpop.permute.xlu1 %1440 }
 0x15a   : > { %7192 = vst [vmem:[#allocation25_spill] sm:$0xff] %v5091_v10 }
 0x15e   : > { %v5095_v29 = vpop.permute.xlu1 %1332 }
 0x15f   : > { %7194 = vst [vmem:[#allocation27_spill] sm:$0xff] %v5095_v29 }
 0x163   : > { %v5099_v28 = vpop.permute.xlu1 %1388 }
 0x164   : > { %7195 = vst [vmem:[#allocation28_spill] sm:$0xff] %v5099_v28 }
 0x168   : > { %v5103_v58 = vpop.permute.xlu1 %1500 }
 0x169   : > { %7196 = vst [vmem:[#allocation29_spill] sm:$0xff] %v5103_v58 }
 0x16c   : > { %v5105_v27 = vpop.permute.xlu1 %1504 }
 0x16d   : > { %7197 = vst [vmem:[#allocation30_spill] sm:$0xff] %v5105_v27 }
 0x171   : > { %v5109_v16 = vpop.permute.xlu1 %1448 }
 0x172   : > { %7199 = vst [vmem:[#allocation32_spill] sm:$0xff] %v5109_v16 }
 0x175   : > { %v5113_v10 = vpop.permute.xlu1 %1452 }
 0x176   : > { %7201 = vst [vmem:[#allocation34_spill] sm:$0xff] %v5113_v10 }
 0x17a   : > { %v5117_v29 = vpop.permute.xlu1 %1564 }
 0x17b   : > { %7202 = vst [vmem:[#allocation35_spill] sm:$0xff] %v5117_v29 }
 0x17f   : > { %v5119_v28 = vpop.permute.xlu1 %1620  ;;  %v470_v31 = vpop.permute.xlu0 %469 }
 0x180   : > { %7203 = vst [vmem:[#allocation36_spill] sm:$0xff] %v5119_v28  ;;  %482 = vst.msk [vmem:[#allocation2] sm:$0xff] %vm481_vm6, %v470_v31 }
 0x181   : > { %483 = vst.msk [vmem:[#allocation2 + $0x8] sm:$0xff] %vm460_vm1, %v470_v31 }
 0x183   : > { %v476_v58 = vpop.permute.xlu0 %475 }
 0x184   : > { %488 = vst.msk [vmem:[#allocation2 + $0x30] sm:$0xff] %vm481_vm6, %v476_v58  ;;  %v5125_v16 = vpop.permute.xlu1 %1512 }
 0x185   : > { %489 = vst.msk [vmem:[#allocation2 + $0x38] sm:$0xff] %vm460_vm1, %v476_v58  ;;  %7204 = vst [vmem:[#allocation37_spill] sm:$0xff] %v5125_v16 }
 0x187   : > { %v474_v24 = vpop.permute.xlu0 %473 }
 0x188   : > { %486 = vst.msk [vmem:[#allocation2 + $0x20] sm:$0xff] %vm481_vm6, %v474_v24 }
 0x189   : > { %487 = vst.msk [vmem:[#allocation2 + $0x28] sm:$0xff] %vm460_vm1, %v474_v24  ;;  %v5129_v10 = vpop.permute.xlu1 %1568 }
 0x18a   : > { %7205 = vst [vmem:[#allocation38_spill] sm:$0xff] %v5129_v10 }
 0x18e   : > { %v5131_v28 = vpop.permute.xlu1 %1680 }
 0x18f   : > { %7206 = vst [vmem:[#allocation39_spill] sm:$0xff] %v5131_v28 }
 0x192   : > { %v472_v20 = vpop.permute.xlu1 %471 }
 0x193   : > { %484 = vst.msk [vmem:[#allocation2 + $0x10] sm:$0xff] %vm481_vm6, %v472_v20 }
 0x194   : > { %485 = vst.msk [vmem:[#allocation2 + $0x18] sm:$0xff] %vm460_vm1, %v472_v20 }
 0x19a   : > { %v5135_v31 = vld [vmem:[#allocation2 + $0x10] sm:$0xff] }
 0x19b   : > { %v529_v14 = vld [vmem:[#allocation2 + $0x18] sm:$0xff]  ;;  %v552_v58 = vmul.f32 %v4926_v32, %v5135_v31  ;;  %v613_v24 = vmul.f32 %v4935_v35, %v5135_v31  ;;  %v674_v20 = vmul.f32 %v4948_v39, %v5135_v31 }
 0x19c   : > { %v553_v16 = vmul.f32 %v4926_v32, %v529_v14  ;;  %v614_v10 = vmul.f32 %v4935_v35, %v529_v14  ;;  %v675_v32 = vmul.f32 %v4948_v39, %v529_v14  ;;  %v736_v35 = vmul.f32 %v5051_v60, %v529_v14 }
 0x19d   : > { %570 = vrot.lane.b32.xlu1 %v552_v58, %s4638_s13  ;;  %v797_v39 = vmul.f32 %v4967_v44, %v529_v14  ;;  %v857_v58 = vmul.f32 %v4978_v47, %v5135_v31 }
 0x19e   : > { %572 = vrot.lane.b32.xlu0 %v553_v16, %s4638_s13  ;;  %v735_v16 = vmul.f32 %v5051_v60, %v5135_v31  ;;  %v858_v60 = vmul.f32 %v4978_v47, %v529_v14  ;;  %v979_v47 = vmul.f32 %v5017_v57, %v5135_v31 }
 0x1a1   : > { %631 = vrot.lane.b32.xlu1 %v613_v24, %s7174_s17  ;;  %v918_v24 = vmul.f32 %v5089_v15, %v5135_v31 }
 0x1a2   : > { %633 = vrot.lane.b32.xlu0 %v614_v10, %s7174_s17  ;;  %v796_v10 = vmul.f32 %v4967_v44, %v5135_v31  ;;  %v919_v44 = vmul.f32 %v5089_v15, %v529_v14  ;;  %v1041_v15 = vmul.f32 %v5035_v30, %v529_v14 }
 0x1a5   : > { %692 = vrot.lane.b32.xlu1 %v674_v20, %s7170_s18  ;;  %v980_v20 = vmul.f32 %v5017_v57, %v529_v14  ;;  %v1101_v57 = vmul.f32 %v5019_v61, %v5135_v31 }
 0x1a6   : > { %694 = vrot.lane.b32.xlu0 %v675_v32, %s7170_s18  ;;  %v1040_v32 = vmul.f32 %v5035_v30, %v5135_v31 }
 0x1a9   : > { %753 = vrot.lane.b32.xlu1 %v735_v16, %s7172_s19  ;;  %v1102_v16 = vmul.f32 %v5019_v61, %v529_v14 }
 0x1aa   : > { %755 = vrot.lane.b32.xlu0 %v736_v35, %s7172_s19  ;;  %v527_v35 = vld [vmem:[#allocation2 + $0x8] sm:$0xff] }
 0x1ab   : > { %v551_v30 = vmul.f32 %v4989_v52, %v527_v35  ;;  %v612_v14 = vmul.f32 %v4930_v33, %v527_v35 }
 0x1ad   : > { %814 = vrot.lane.b32.xlu1 %v796_v10, %s7156_s20  ;;  %v5185_v10 = vld [vmem:[#allocation2] sm:$0xff] }
 0x1ae   : > { %816 = vrot.lane.b32.xlu0 %v797_v39, %s7156_s20  ;;  %v550_v39 = vmul.f32 %v4989_v52, %v5185_v10  ;;  %v611_v61 = vmul.f32 %v4930_v33, %v5185_v10  ;;  %v734_v52 = vmul.f32 %v4952_v40, %v527_v35  ;;  %v795_v33 = vmul.f32 %v4963_v43, %v527_v35 }
 0x1b1   : > { %875 = vrot.lane.b32.xlu1 %v857_v58, %s7154_s21  ;;  %v673_v58 = vmul.f32 %v5061_v4, %v527_v35 }
 0x1b2   : > { %877 = vrot.lane.b32.xlu0 %v858_v60, %s7154_s21  ;;  %v672_v60 = vmul.f32 %v5061_v4, %v5185_v10  ;;  %v856_v4 = vmul.f32 %v5097_v18, %v527_v35 }
 0x1b5   : > { %936 = vrot.lane.b32.xlu1 %v918_v24, %s7152_s23  ;;  %v733_v24 = vmul.f32 %v4952_v40, %v5185_v10  ;;  %v917_v40 = vmul.f32 %v4982_v48, %v527_v35 }
 0x1b6   : > { %938 = vrot.lane.b32.xlu0 %v919_v44, %s7152_s23  ;;  %v794_v44 = vmul.f32 %v4963_v43, %v5185_v10  ;;  %v978_v43 = vmul.f32 %v5011_v55, %v527_v35 }
 0x1b9   : > { %999 = vrot.lane.b32.xlu1 %v980_v20, %s7134_s24  ;;  %v855_v20 = vmul.f32 %v5097_v18, %v5185_v10  ;;  %v1039_v18 = vmul.f32 %v5115_v9, %v527_v35 }
 0x1ba   : > { %997 = vrot.lane.b32.xlu0 %v979_v47, %s7134_s24  ;;  %v916_v47 = vmul.f32 %v4982_v48, %v5185_v10  ;;  %v1100_v48 = vmul.f32 %v5041_v49, %v527_v35 }
 0x1bd   : > { %1058 = vrot.lane.b32.xlu1 %v1040_v32, %s7132_s25  ;;  %v977_v32 = vmul.f32 %v5011_v55, %v5185_v10  ;;  %v5237_v55 = vld [vmem:[#allocation2 + $0x30] sm:$0xff] }
 0x1be   : > { %1060 = vrot.lane.b32.xlu0 %v1041_v15, %s7132_s25  ;;  %v1038_v15 = vmul.f32 %v5115_v9, %v5185_v10  ;;  %v556_v9 = vmul.f32 %v4944_v38, %v5237_v55 }
 0x1c1   : > { %1121 = vrot.lane.b32.xlu1 %v1102_v16, %s7130_s26  ;;  %v1099_v16 = vmul.f32 %v5041_v49, %v5185_v10  ;;  %v617_v49 = vmul.f32 %v4955_v41, %v5237_v55 }
 0x1c2   : > { %1119 = vrot.lane.b32.xlu0 %v1101_v57, %s7130_s26  ;;  %v533_v57 = vld [vmem:[#allocation2 + $0x38] sm:$0xff] }
 0x1c3   : > { %v618_v35 = vmul.f32 %v4955_v41, %v533_v57  ;;  %v801_v41 = vmul.f32 %v4985_v50, %v533_v57 }
 0x1c5   : > { %566 = vrot.lane.b32.xlu1 %v550_v39, %s4638_s13  ;;  %v679_v39 = vmul.f32 %v5065_v6, %v533_v57 }
 0x1c6   : > { %568 = vrot.lane.b32.xlu0 %v551_v30, %s4638_s13  ;;  %v557_v30 = vmul.f32 %v4944_v38, %v533_v57  ;;  %v740_v38 = vmul.f32 %v4974_v46, %v533_v57 }
 0x1c9   : > { %627 = vrot.lane.b32.xlu1 %v611_v61, %s7174_s17  ;;  %v739_v61 = vmul.f32 %v4974_v46, %v5237_v55  ;;  %v923_v46 = vmul.f32 %v5031_v12, %v533_v57 }
 0x1ca   : > { %629 = vrot.lane.b32.xlu0 %v612_v14, %s7174_s17  ;;  %v678_v14 = vmul.f32 %v5065_v6, %v5237_v55  ;;  %v861_v6 = vmul.f32 %v5101_v17, %v5237_v55 }
 0x1cd   : > { %688 = vrot.lane.b32.xlu1 %v672_v60, %s7170_s18  ;;  %v862_v60 = vmul.f32 %v5101_v17, %v533_v57  ;;  %v1045_v17 = vmul.f32 %v5053_v62, %v533_v57 }
 0x1ce   : > { %690 = vrot.lane.b32.xlu0 %v673_v58, %s7170_s18  ;;  %v800_v58 = vmul.f32 %v4985_v50, %v5237_v55  ;;  %v983_v50 = vmul.f32 %v5045_v54, %v5237_v55 }
 0x1d1   : > { %749 = vrot.lane.b32.xlu1 %v733_v24, %s7172_s19  ;;  %v984_v24 = vmul.f32 %v5045_v54, %v533_v57  ;;  %v1105_v54 = vmul.f32 %v5055_v63, %v5237_v55 }
 0x1d2   : > { %751 = vrot.lane.b32.xlu0 %v734_v52, %s7172_s19  ;;  %v922_v52 = vmul.f32 %v5031_v12, %v5237_v55 }
 0x1d5   : > { %810 = vrot.lane.b32.xlu1 %v794_v44, %s7156_s20 }
 0x1d6   : > { %812 = vrot.lane.b32.xlu0 %v795_v33, %s7156_s20  ;;  %v1044_v33 = vmul.f32 %v5053_v62, %v5237_v55 }
 0x1d9   : > { %871 = vrot.lane.b32.xlu1 %v855_v20, %s7154_s21  ;;  %v5293_v20 = vld [vmem:[#allocation2 + $0x28] sm:$0xff] }
 0x1da   : > { %873 = vrot.lane.b32.xlu0 %v856_v4, %s7154_s21  ;;  %v1106_v4 = vmul.f32 %v5055_v63, %v533_v57  ;;  %v677_v57 = vmul.f32 %v4959_v42, %v5293_v20 }
 0x1dd   : > { %932 = vrot.lane.b32.xlu1 %v916_v47, %s7152_s23 }
 0x1de   : > { %934 = vrot.lane.b32.xlu0 %v917_v40, %s7152_s23  ;;  %v5295_v40 = vld [vmem:[#allocation2 + $0x20] sm:$0xff] }
 0x1e1   : > { %993 = vrot.lane.b32.xlu1 %v977_v32, %s7134_s24  ;;  %v554_v32 = vmul.f32 %v4940_v37, %v5295_v40 }
 0x1e2   : > { %995 = vrot.lane.b32.xlu0 %v978_v43, %s7134_s24  ;;  %v555_v43 = vmul.f32 %v4940_v37, %v5293_v20 }
 0x1e5   : > { %1054 = vrot.lane.b32.xlu1 %v1038_v15, %s7132_s25  ;;  %v616_v15 = vmul.f32 %v5038_v34, %v5293_v20 }
 0x1e6   : > { %1056 = vrot.lane.b32.xlu0 %v1039_v18, %s7132_s25 }
 0x1e9   : > { %1115 = vrot.lane.b32.xlu1 %v1099_v16, %s7130_s26 }
 0x1ea   : > { %1117 = vrot.lane.b32.xlu0 %v1100_v48, %s7130_s26  ;;  %v615_v48 = vmul.f32 %v5038_v34, %v5295_v40 }
 0x1ed   : > { %578 = vrot.lane.b32.xlu1 %v556_v9, %s4638_s13 }
 0x1ee   : > { %580 = vrot.lane.b32.xlu0 %v557_v30, %s4638_s13  ;;  %v676_v30 = vmul.f32 %v4959_v42, %v5295_v40 }
 0x1f1   : > { %639 = vrot.lane.b32.xlu1 %v617_v49, %s7174_s17  ;;  %v737_v49 = vmul.f32 %v4971_v45, %v5295_v40 }
 0x1f2   : > { %641 = vrot.lane.b32.xlu0 %v618_v35, %s7174_s17  ;;  %v738_v35 = vmul.f32 %v4971_v45, %v5293_v20 }
 0x1f5   : > { %700 = vrot.lane.b32.xlu1 %v678_v14, %s7170_s18  ;;  %v799_v14 = vmul.f32 %v5079_v36, %v5293_v20 }
 0x1f6   : > { %702 = vrot.lane.b32.xlu0 %v679_v39, %s7170_s18 }
 0x1f9   : > { %761 = vrot.lane.b32.xlu1 %v739_v61, %s7172_s19 }
 0x1fa   : > { %763 = vrot.lane.b32.xlu0 %v740_v38, %s7172_s19  ;;  %v798_v38 = vmul.f32 %v5079_v36, %v5295_v40 }
 0x1fd   : > { %822 = vrot.lane.b32.xlu1 %v800_v58, %s7156_s20  ;;  %v859_v58 = vmul.f32 %v4991_v53, %v5295_v40 }
 0x1fe   : > { %824 = vrot.lane.b32.xlu0 %v801_v41, %s7156_s20  ;;  %v860_v41 = vmul.f32 %v4991_v53, %v5293_v20 }
 0x201   : > { %885 = vrot.lane.b32.xlu1 %v862_v60, %s7154_s21  ;;  %v921_v60 = vmul.f32 %v5023_v2, %v5293_v20 }
 0x202   : > { %883 = vrot.lane.b32.xlu0 %v861_v6, %s7154_s21 }
 0x205   : > { %944 = vrot.lane.b32.xlu1 %v922_v52, %s7152_s23 }
 0x206   : > { %946 = vrot.lane.b32.xlu0 %v923_v46, %s7152_s23  ;;  %v920_v46 = vmul.f32 %v5023_v2, %v5295_v40 }
 0x209   : > { %1007 = vrot.lane.b32.xlu1 %v984_v24, %s7134_s24  ;;  %v981_v24 = vmul.f32 %v5013_v56, %v5295_v40 }
 0x20a   : > { %1005 = vrot.lane.b32.xlu0 %v983_v50, %s7134_s24  ;;  %v982_v50 = vmul.f32 %v5013_v56, %v5293_v20 }
 0x20d   : > { %1066 = vrot.lane.b32.xlu1 %v1044_v33, %s7132_s25  ;;  %v1043_v33 = vmul.f32 %v5049_v59, %v5293_v20 }
 0x20e   : > { %1068 = vrot.lane.b32.xlu0 %v1045_v17, %s7132_s25 }
 0x20f   : > { %v5286_v12 = vpop.permute.xlu1 %570 }
 0x210   : > { %v5288_v44 = vpop.permute.xlu0 %572 }
 0x211   : > { %1127 = vrot.lane.b32.xlu1 %v1105_v54, %s7130_s26 }
 0x212   : > { %1129 = vrot.lane.b32.xlu0 %v1106_v4, %s7130_s26  ;;  %v1042_v4 = vmul.f32 %v5049_v59, %v5295_v40  ;;  %v1104_v59 = vmul.f32 %v5028_v11, %v5293_v20 }
 0x213   : > { %v5299_v62 = vpop.permute.xlu1 %631 }
 0x214   : > { %v5301_v47 = vpop.permute.xlu0 %633 }
 0x215   : > { %574 = vrot.lane.b32.xlu1 %v554_v32, %s4638_s13 }
 0x216   : > { %576 = vrot.lane.b32.xlu0 %v555_v43, %s4638_s13  ;;  %v1103_v43 = vmul.f32 %v5028_v11, %v5295_v40  ;;  %v7209_v11 = vmov 10  }
 0x217   : > { %v5309_v63 = vpop.permute.xlu1 %692 }
 0x218   : > { %v5311_v18 = vpop.permute.xlu0 %694 }
 0x219   : > { %635 = vrot.lane.b32.xlu1 %v615_v48, %s7174_s17  ;;  %v7207_v48 = vmov 8  }
 0x21a   : > { %637 = vrot.lane.b32.xlu0 %v616_v15, %s7174_s17 }
 0x21b   : > { %v5319_v16 = vpop.permute.xlu1 %753 }
 0x21c   : > { %v5321_v37 = vpop.permute.xlu0 %755 }
 0x21d   : > { %696 = vrot.lane.b32.xlu1 %v676_v30, %s7170_s18 }
 0x21e   : > { %698 = vrot.lane.b32.xlu0 %v677_v57, %s7170_s18 }
 0x21f   : > { %v5329_v9 = vpop.permute.xlu1 %814 }
 0x220   : > { %v5331_v34 = vpop.permute.xlu0 %816 }
 0x221   : > { %757 = vrot.lane.b32.xlu1 %v737_v49, %s7172_s19 }
 0x222   : > { %759 = vrot.lane.b32.xlu0 %v738_v35, %s7172_s19  ;;  %v7208_v35 = vmov 7  }
 0x223   : > { %v5339_v39 = vpop.permute.xlu1 %875 }
 0x224   : > { %v5341_v42 = vpop.permute.xlu0 %877 }
 0x225   : > { %818 = vrot.lane.b32.xlu1 %v798_v38, %s7156_s20  ;;  %v7210_v38 = vmov 9  }
 0x226   : > { %820 = vrot.lane.b32.xlu0 %v799_v14, %s7156_s20 }
 0x227   : > { %v5349_v61 = vpop.permute.xlu1 %936 }
 0x228   : > { %v5351_v45 = vpop.permute.xlu0 %938 }
 0x229   : > { %879 = vrot.lane.b32.xlu1 %v859_v58, %s7154_s21 }
 0x22a   : > { %881 = vrot.lane.b32.xlu0 %v860_v41, %s7154_s21 }
 0x22b   : > { %v5359_v6 = vpop.permute.xlu1 %999 }
 0x22c   : > { %v5361_v36 = vpop.permute.xlu0 %997 }
 0x22d   : > { %940 = vrot.lane.b32.xlu1 %v920_v46, %s7152_s23 }
 0x22e   : > { %942 = vrot.lane.b32.xlu0 %v921_v60, %s7152_s23  ;;  %v7211_v60 = vmov 0  }
 0x22f   : > { %v5369_v52 = vpop.permute.xlu1 %1058 }
 0x230   : > { %v5371_v53 = vpop.permute.xlu0 %1060 }
 0x231   : > { %1001 = vrot.lane.b32.xlu1 %v981_v24, %s7134_s24 }
 0x232   : > { %1003 = vrot.lane.b32.xlu0 %v982_v50, %s7134_s24  ;;  %s5585_s24 = sld [smem:[#allocation6 + $0x1]] }
 0x233   : > { %v5379_v17 = vpop.permute.xlu1 %1121 }
 0x234   : > { %v5381_v2 = vpop.permute.xlu0 %1119 }
 0x235   : > { %1062 = vrot.lane.b32.xlu1 %v1042_v4, %s7132_s25 }
 0x236   : > { %1064 = vrot.lane.b32.xlu0 %v1043_v33, %s7132_s25  ;;  %v1145_v33 = vld [vmem:[%s7084_s4 + $0x8] sm:$0xff]  ;;  %s7270_s25 = smov 120  }
 0x237   : > { %v5389_v54 = vpop.permute.xlu1 %566 }
 0x238   : > { %v5391_v56 = vpop.permute.xlu0 %568 }
 0x239   : > { %1123 = vrot.lane.b32.xlu1 %v1103_v43, %s7130_s26  ;;  %v1147_v43 = vld [vmem:[%s7084_s4 + $0x18] sm:$0xff] }
 0x23a   : > { %1740 = vperm.xlu0 %4444, %v4871_v25  }
 0x23b   : > { %v5397_v32 = vpop.permute.xlu1 %627 }
 0x23c   : > { %v5399_v15 = vpop.permute.xlu0 %629 }
 0x23d   : > { %1684 = vperm.xlu1 %4443, %v4843_v21  }
 0x23e   : > { %1125 = vrot.lane.b32.xlu0 %v1104_v59, %s7130_s26  ;;  %s7271_s26 = smov 119  }
 0x23f   : > { %4447 = vset.pattern.permute.xlu0 %v7207_v48  ;;  %v5406_v57 = vpop.permute.xlu1 %688 }
 0x240   : > { %v5408_v30 = vpop.permute.xlu0 %690 }
 0x241   : > { %4445 = vset.pattern.permute.xlu1 %v7208_v35 }
 0x242   : > { %1688 = vperm.xlu0 %4447, %v4850_v22   ;;  %1628 = vperm.xlu1 %4445, %v4850_v22  }
 0x243   : > { %v5415_v14 = vpop.permute.xlu1 %749 }
 0x244   : > { %v5413_v49 = vpop.permute.xlu0 %751 }
 0x246   : > { %4450 = vset.pattern.permute.xlu0 %v7209_v11  ;;  %1632 = vperm.xlu1 %4445, %v4879_v26  }
 0x247   : > { %1804 = vperm.xlu0 %4450, %v4843_v21   ;;  %v5424_v41 = vpop.permute.xlu1 %810 }
 0x248   : > { %v5420_v20 = vpop.permute.xlu0 %812 }
 0x24a   : > { %4446 = vset.pattern.permute.xlu1 %v7210_v38 }
 0x24b   : > { %1808 = vperm.xlu0 %4450, %v4850_v22   ;;  %1744 = vperm.xlu1 %4446, %v4843_v21   ;;  %v5435_v50 = vpop.permute.xlu1 %871 }
 0x24c   : > { %v5426_v58 = vpop.permute.xlu0 %873 }
 0x24f   : > { %4452 = vset.pattern.permute.xlu0 %v7211_v60  ;;  %4448 = vset.pattern.permute.xlu1 %v7209_v11 }
 0x250   : > { %500 = vperm.xlu0 %4452, %v4806_v13   ;;  %v5431_v46 = vpop.permute.xlu0 %934  ;;  %1800 = vperm.xlu1 %4448, %v4871_v25   ;;  %v5445_v13 = vpop.permute.xlu1 %932 }
 0x251   : > { %7212 = vst [vmem:[#allocation40_spill] sm:$0xff] %v5431_v46  ;;  %7214 = vst [vmem:[#allocation42_spill] sm:$0xff] %v5445_v13 }
 0x254   : > { %515 = vperm.xlu0 %4452, %v4833_v19   ;;  %v5438_v24 = vpop.permute.xlu0 %995  ;;  %4449 = vset.pattern.permute.xlu1 %v7207_v48  ;;  %v5456_v59 = vpop.permute.xlu1 %993 }
 0x255   : > { %7213 = vst [vmem:[#allocation41_spill] sm:$0xff] %v5438_v24  ;;  %1692 = vperm.xlu1 %4449, %v4879_v26   ;;  %7217 = vst [vmem:[#allocation45_spill] sm:$0xff] %v5456_v59 }
 0x258   : > { %1155 = vperm.xlu0 %4452, %v1145_v33   ;;  %v5447_v4 = vpop.permute.xlu0 %1056  ;;  %v5463_v48 = vpop.permute.xlu1 %1054 }
 0x259   : > { %7215 = vst [vmem:[#allocation43_spill] sm:$0xff] %v5447_v4  ;;  %4451 = vset.pattern.permute.xlu1 %v7210_v38  ;;  %7218 = vst [vmem:[#allocation46_spill] sm:$0xff] %v5463_v48 }
 0x25a   : > { %1748 = vperm.xlu1 %4451, %v4850_v22  }
 0x25c   : > { %1165 = vperm.xlu0 %4452, %v1147_v43   ;;  %v5454_v19 = vpop.permute.xlu0 %1117  ;;  %v3914_v43 = vld [vmem:[%s7084_s4 + $0x28] sm:$0xff] }
 0x25d   : > { %7216 = vst [vmem:[#allocation44_spill] sm:$0xff] %v5454_v19 }
 0x25e   : > { %1752 = vperm.xlu1 %4451, %v4879_v26  }
 0x260   : > { %1225 = vperm.xlu0 %4452, %v4871_v25   ;;  %v5460_v33 = vpop.permute.xlu0 %580  ;;  %v3916_v25 = vld [vmem:[%s7084_s4 + $0x38] sm:$0xff] }
 0x262   : > { %4453 = vset.pattern.permute.xlu1 %v7209_v11  ;;  %v5479_v11 = vpop.permute.xlu1 %1115 }
 0x263   : > { %1812 = vperm.xlu1 %4453, %v4879_v26   ;;  %7219 = vst [vmem:[#allocation47_spill] sm:$0xff] %v5479_v11 }
 0x264   : > { %1240 = vperm.xlu0 %4452, %v4879_v26   ;;  %v5466_v38 = vpop.permute.xlu0 %641  ;;  %v3913_v26 = vld [vmem:[%s7084_s4 + $0x20] sm:$0xff] }
 0x267   : > { %4454 = vset.pattern.permute.xlu1 %v7211_v60 }
 0x268   : > { %1871 = vperm.xlu0 %4452, %v3914_v43   ;;  %v5472_v35 = vpop.permute.xlu0 %702  ;;  %1230 = vperm.xlu1 %4454, %v4843_v21   ;;  %v5487_v43 = vpop.permute.xlu1 %578 }
 0x26c   : > { %1881 = vperm.xlu0 %4452, %v3916_v25   ;;  %v5481_v28 = vpop.permute.xlu0 %763  ;;  %1235 = vperm.xlu1 %4454, %v4850_v22   ;;  %v3915_v25 = vld [vmem:[%s7084_s4 + $0x30] sm:$0xff]  ;;  %v5498_v22 = vpop.permute.xlu1 %639 }
 0x270   : > { %v5489_v60 = vpop.permute.xlu0 %824  ;;  %4455 = vset.pattern.permute.xlu0 %v7221_v1  ;;  %1866 = vperm.xlu1 %4454, %v3913_v26   ;;  %v5503_v0 = vpop.permute.xlu1 %700 }
 0x271   : > { %7220 = vst [vmem:[#allocation48_spill] sm:$0xff] %v5489_v60  ;;  %1264 = vperm.xlu0 %4455, %v4843_v21  }
 0x274   : > { %v5496_v29 = vpop.permute.xlu0 %883  ;;  %1876 = vperm.xlu1 %4454, %v3915_v25   ;;  %v5509_v21 = vpop.permute.xlu1 %761 }
 0x275   : > { %7222 = vst [vmem:[#allocation49_spill] sm:$0xff] %v5496_v29 }
 0x278   : > { %v5500_v27 = vpop.permute.xlu0 %946  ;;  %4456 = vset.pattern.permute.xlu1 %v7221_v1  ;;  %v5513_v8 = vpop.permute.xlu1 %822 }
 0x279   : > { %7223 = vst [vmem:[#allocation50_spill] sm:$0xff] %v5500_v27  ;;  %7227 = vst [vmem:[#allocation54_spill] sm:$0xff] %v5513_v8 }
 0x27c   : > { %v5505_v23 = vpop.permute.xlu0 %1005  ;;  %v5515_v11 = vpop.permute.xlu1 %885 }
 0x27d   : > { %7224 = vst [vmem:[#allocation51_spill] sm:$0xff] %v5505_v23  ;;  %7228 = vst [vmem:[#allocation55_spill] sm:$0xff] %v5515_v11 }
 0x280   : > { %v5507_v51 = vpop.permute.xlu0 %1068  ;;  %v5519_v27 = vpop.permute.xlu1 %944 }
 0x281   : > { %7225 = vst [vmem:[#allocation52_spill] sm:$0xff] %v5507_v51  ;;  %7229 = vst [vmem:[#allocation56_spill] sm:$0xff] %v5519_v27 }
 0x284   : > { %v5511_v26 = vpop.permute.xlu0 %1129  ;;  %v5523_v48 = vpop.permute.xlu1 %1007 }
 0x285   : > { %7226 = vst [vmem:[#allocation53_spill] sm:$0xff] %v5511_v26  ;;  %7230 = vst [vmem:[#allocation57_spill] sm:$0xff] %v5523_v48 }
 0x288   : > { %v577_v7 = vpop.permute.xlu0 %576  ;;  %v5527_v51 = vpop.permute.xlu1 %1066 }
 0x289   : > { %7231 = vst [vmem:[#allocation58_spill] sm:$0xff] %v5527_v51 }
 0x28c   : > { %v638_v25 = vpop.permute.xlu0 %637  ;;  %v5531_v26 = vpop.permute.xlu1 %1127 }
 0x28d   : > { %7232 = vst [vmem:[#allocation59_spill] sm:$0xff] %v5531_v26  ;;  %v584_v26 = vsel %vm582_vm7, %v5286_v12, %v5288_v44  ;;  %v828_v44 = vsel %vm826_vm11, %v5329_v9, %v5331_v34 }
 0x290   : > { %v5517_v19 = vpop.permute.xlu0 %698  ;;  %v575_v59 = vpop.permute.xlu1 %574 }
 0x291   : > { %v585_v34 = vsel %vm582_vm7, %v575_v59, %v577_v7 }
 0x294   : > { %v5521_v1 = vpop.permute.xlu0 %759  ;;  %v636_v24 = vpop.permute.xlu1 %635 }
 0x298   : > { %v5525_v23 = vpop.permute.xlu0 %820  ;;  %v697_v27 = vpop.permute.xlu1 %696 }
 0x29c   : > { %v5529_v4 = vpop.permute.xlu0 %881  ;;  %v758_v13 = vpop.permute.xlu1 %757 }
 0x2a0   : > { %v5533_v29 = vpop.permute.xlu0 %942 }
 0x2a1   : > { %7233 = vst [vmem:[#allocation60_spill] sm:$0xff] %v5533_v29  ;;  %v706_v29 = vsel %vm704_vm9, %v5309_v63, %v5311_v18 }
 0x2a4   : > { %v5535_v11 = vpop.permute.xlu0 %1003 }
 0x2a5   : > { %7234 = vst [vmem:[#allocation61_spill] sm:$0xff] %v5535_v11  ;;  %v519_v11 = vmul.f32 %v5135_v31, %v5059_v3  ;;  %v767_v3 = vsel %vm765_vm10, %v5319_v16, %v5321_v37  ;;  %v1011_v16 = vsel %vm1009_vm14, %v5361_v36, %v5359_v6  ;;  %v646_v36 = vsel %vm643_vm8, %v636_v24, %v638_v25 }
 0x2a6   : > { %v705_v24 = vsel %vm704_vm9, %v5406_v57, %v5408_v30  ;;  %v647_v57 = vsel %vm643_vm8, %v5498_v22, %v5466_v38 }
 0x2a8   : > { %v5537_v8 = vpop.permute.xlu0 %1064 }
 0x2a9   : > { %7235 = vst [vmem:[#allocation62_spill] sm:$0xff] %v5537_v8  ;;  %v645_v8 = vsel %vm643_vm8, %v5299_v62, %v5301_v47 }
 0x2b9   : > { %v5539_v60 = vpop.permute.xlu0 %1740 }
 0x2ba   : > { %7236 = vst [vmem:[#allocation63_spill] sm:$0xff] %v5539_v60  ;;  %v592_v60 = vadd.f32 %v584_v26, %v519_v11 }
 0x2bc   : > { %v653_v46 = vadd.f32 %v645_v8, %v592_v60  ;;  %v889_v8 = vsel %vm887_vm12, %v5339_v39, %v5341_v42  ;;  %v1072_v42 = vsel %vm7151_vm15, %v5369_v52, %v5371_v53  ;;  %v644_v52 = vsel %vm643_vm8, %v5397_v32, %v5399_v15 }
 0x2bd   : > { %v5541_v48 = vpop.permute.xlu0 %1125  ;;  %v768_v32 = vsel %vm765_vm10, %v758_v13, %v5521_v1  ;;  %v708_v13 = vsel %vm704_vm9, %v5503_v0, %v5472_v35 }
 0x2be   : > { %7237 = vst [vmem:[#allocation64_spill] sm:$0xff] %v5541_v48  ;;  %v819_v48 = vpop.permute.xlu1 %818  ;;  %v714_v31 = vadd.f32 %v706_v29, %v653_v46  ;;  %v950_v29 = vsel %vm948_vm13, %v5349_v61, %v5351_v45  ;;  %v583_v61 = vsel %vm582_vm7, %v5389_v54, %v5391_v56  ;;  %v520_v45 = vmul.f32 %v5295_v40, %v5063_v5 }
 0x2bf   : > { %v707_v5 = vsel %vm704_vm9, %v697_v27, %v5517_v19 }
 0x2c0   : > { %v775_v62 = vadd.f32 %v767_v3, %v714_v31  ;;  %v593_v53 = vadd.f32 %v585_v34, %v520_v45  ;;  %v7247_v45 = vld [vmem:[#allocation61_spill] sm:$0xff] }
 0x2c1   : > { %v5546_v51 = vpop.permute.xlu0 %1688 }
 0x2c2   : > { %v880_v47 = vpop.permute.xlu1 %879  ;;  %v836_v63 = vadd.f32 %v828_v44, %v775_v62 }
 0x2c3   : > { %v890_v0 = vsel %vm887_vm12, %v880_v47, %v5529_v4  ;;  %v7243_v47 = vld [vmem:[#allocation41_spill] sm:$0xff] }
 0x2c4   : > { %v897_v18 = vadd.f32 %v889_v8, %v836_v63  ;;  %v7238_v8 = vld [vmem:[#allocation40_spill] sm:$0xff]  ;;  %v7239_v63 = vld [vmem:[#allocation42_spill] sm:$0xff] }
 0x2c6   : > { %v5556_v12 = vpop.permute.xlu0 %1804  ;;  %v958_v9 = vadd.f32 %v950_v29, %v897_v18  ;;  %v941_v60 = vpop.permute.xlu1 %940  ;;  %v949_v29 = vsel %vm948_vm13, %v7239_v63, %v7238_v8  ;;  %v7240_v18 = vld [vmem:[#allocation48_spill] sm:$0xff] }
 0x2c8   : > { %v1019_v6 = vadd.f32 %v1011_v16, %v958_v9  ;;  %v7241_v16 = vld [vmem:[#allocation54_spill] sm:$0xff]  ;;  %v7244_v9 = vld [vmem:[#allocation45_spill] sm:$0xff] }
 0x2c9   : > { %v1010_v34 = vsel %vm1009_vm14, %v7244_v9, %v7243_v47 }
 0x2ca   : > { %v5564_v11 = vpop.permute.xlu0 %1808  ;;  %v1080_v54 = vadd.f32 %v1072_v42, %v1019_v6  ;;  %v1002_v15 = vpop.permute.xlu1 %1001  ;;  %v7246_v42 = vld [vmem:[#allocation49_spill] sm:$0xff] }
 0x2cb   : > { %v1012_v6 = vsel %vm1009_vm14, %v1002_v15, %v7247_v45  ;;  %v7254_v15 = vld [vmem:[#allocation47_spill] sm:$0xff] }
 0x2ce   : > { %v1063_v44 = vpop.permute.xlu1 %1062 }
 0x2cf   : > { %v501_v37 = vpop.permute.xlu0 %500 }
 0x2d0   : > { %v518_v39 = vmul.f32 %v5185_v10, %v501_v37  ;;  %v1133_v10 = vsel %vm7150_vm2, %v5381_v2, %v5379_v17  ;;  %v586_v17 = vsel %vm582_vm7, %v5487_v43, %v5460_v33  ;;  %v654_v2 = vadd.f32 %v646_v36, %v593_v53 }
 0x2d1   : > { %v1141_v59 = vadd.f32 %v1133_v10, %v1080_v54  ;;  %v827_v33 = vsel %vm826_vm11, %v5424_v41, %v5420_v20  ;;  %v888_v20 = vsel %vm887_vm12, %v5435_v50, %v5426_v58  ;;  %v769_v41 = vsel %vm765_vm10, %v5509_v21, %v5481_v28  ;;  %v7242_v50 = vld [vmem:[#allocation60_spill] sm:$0xff] }
 0x2d2   : > { %v591_v7 = vadd.f32 %v583_v61, %v518_v39  ;;  %v715_v30 = vadd.f32 %v707_v5, %v654_v2  ;;  %v830_v58 = vsel %vm826_vm11, %v7241_v16, %v7240_v18  ;;  %v951_v37 = vsel %vm948_vm13, %v941_v60, %v7242_v50  ;;  %v7245_v39 = vld [vmem:[#allocation55_spill] sm:$0xff]  ;;  %v7251_v54 = vld [vmem:[#allocation56_spill] sm:$0xff] }
 0x2d3   : > { %v516_v46 = vpop.permute.xlu0 %515  ;;  %v891_v61 = vsel %vm887_vm12, %v7246_v42, %v7245_v39  ;;  %v7248_v60 = vld [vmem:[#allocation43_spill] sm:$0xff] }
 0x2d4   : > { %v652_v40 = vadd.f32 %v644_v52, %v591_v7  ;;  %v521_v56 = vmul.f32 %v5237_v55, %v516_v46  ;;  %v766_v55 = vsel %vm765_vm10, %v5415_v14, %v5413_v49  ;;  %v776_v3 = vadd.f32 %v768_v32, %v715_v30  ;;  %v7249_v52 = vld [vmem:[#allocation46_spill] sm:$0xff]  ;;  %v7253_v32 = vld [vmem:[#allocation44_spill] sm:$0xff] }
 0x2d5   : > { %v829_v49 = vsel %vm826_vm11, %v819_v48, %v5525_v23  ;;  %v1177_v14 = vstv %s5585_s24  ;;  %v1071_v53 = vsel %vm7151_vm15, %v7249_v52, %v7248_v60  ;;  %v7250_v46 = vld [vmem:[#allocation50_spill] sm:$0xff]  ;;  %v7257_v30 = vld [vmem:[#allocation64_spill] sm:$0xff]  ;;  %s7336_s24 = smov 121  }
 0x2d6   : > { %v713_v26 = vadd.f32 %v705_v24, %v652_v40  ;;  %v594_v27 = vadd.f32 %v586_v17, %v521_v56  ;;  %v837_v35 = vadd.f32 %v829_v49, %v776_v3  ;;  %v952_v5 = vsel %vm948_vm13, %v7251_v54, %v7250_v46  ;;  %v7252_v40 = vld [vmem:[#allocation62_spill] sm:$0xff]  ;;  %v1124_v17 = vpop.permute.xlu1 %1123 }
 0x2d7   : > { %v1156_v19 = vpop.permute.xlu0 %1155  ;;  %v1073_v56 = vsel %vm7151_vm15, %v1063_v44, %v7252_v40  ;;  %v7264_v40 = vld [vmem:[#allocation12_spill] sm:$0xff] }
 0x2d8   : > { %v774_v43 = vadd.f32 %v766_v55, %v713_v26  ;;  %v655_v25 = vadd.f32 %v647_v57, %v594_v27  ;;  %v1169_v1 = vadd.f32 %v1156_v19, %v1141_v59  ;;  %v898_v28 = vadd.f32 %v890_v0, %v837_v35  ;;  %v7255_v27 = vld [vmem:[#allocation57_spill] sm:$0xff]  ;;  %v7256_v55 = vld [vmem:[#allocation51_spill] sm:$0xff] }
 0x2d9   : > { %v1132_v26 = vsel %vm7150_vm2, %v7254_v15, %v7253_v32  ;;  %v1013_v57 = vsel %vm1009_vm14, %v7256_v55, %v7255_v27  ;;  %v1134_v19 = vsel %vm7150_vm2, %v1124_v17, %v7257_v30  ;;  %v7267_v30 = vld [vmem:[#allocation30_spill] sm:$0xff] }
 0x2da   : > { %v835_v31 = vadd.f32 %v827_v33, %v774_v43  ;;  %v716_v38 = vadd.f32 %v708_v13, %v655_v25  ;;  %v1179_v22 = vmul.f32 %v1177_v14, %v1169_v1  ;;  %vm1174_vm3 = vcmp.ge.f32.partialorder %v1169_v1, 0.0  ;;  %v7259_v13 = vld [vmem:[#allocation58_spill] sm:$0xff]  ;;  %v1685_v50 = vpop.permute.xlu1 %1684 }
 0x2db   : > { %v959_v36 = vadd.f32 %v951_v37, %v898_v28 }
 0x2dc   : > { %v896_v62 = vadd.f32 %v888_v20, %v835_v31  ;;  %v777_v23 = vadd.f32 %v769_v41, %v716_v38  ;;  %v1183_v48 = vsel %vm1174_vm3, %v1169_v1, %v1179_v22  ;;  %v7258_v1 = vld [vmem:[#allocation52_spill] sm:$0xff]  ;;  %v7260_v38 = vld [vmem:[#allocation15_spill] sm:$0xff]  ;;  %v7261_v20 = vld [vmem:[#allocation53_spill] sm:$0xff] }
 0x2dd   : > { %1196 = vrot.lane.b32.xlu0 %v1183_v48, %s4637_s12  ;;  %v1020_v24 = vadd.f32 %v1012_v6, %v959_v36  ;;  %v1074_v3 = vsel %vm7151_vm15, %v7259_v13, %v7258_v1  ;;  %v7262_v41 = vld [vmem:[#allocation59_spill] sm:$0xff]  ;;  %v7269_v13 = vld [vmem:[#allocation26_spill] sm:$0xff] }
 0x2de   : > { %v957_v4 = vadd.f32 %v949_v29, %v896_v62  ;;  %v838_v21 = vadd.f32 %v830_v58, %v777_v23  ;;  %v1135_v0 = vsel %vm7150_vm2, %v7262_v41, %v7261_v20  ;;  %v1166_v62 = vpop.permute.xlu0 %1165  ;;  %v7263_v23 = vld [vmem:[#allocation16_spill] sm:$0xff]  ;;  %v5672_v37 = vpop.permute.xlu1 %1628 }
 0x2df   : > { %v1081_v33 = vadd.f32 %v1073_v56, %v1020_v24 }
 0x2e0   : > { %v899_v7 = vadd.f32 %v891_v61, %v838_v21  ;;  %v1018_v10 = vadd.f32 %v1010_v34, %v957_v4 }
 0x2e1   : > { %v1142_v49 = vadd.f32 %v1134_v19, %v1081_v33 }
 0x2e2   : > { %v960_v2 = vadd.f32 %v952_v5, %v899_v7  ;;  %v1079_v59 = vadd.f32 %v1071_v53, %v1018_v10  ;;  %v5674_v28 = vpop.permute.xlu1 %1632  ;;  %v5680_v9 = vpop.permute.xlu0 %1225 }
 0x2e3   : > { %v1170_v48 = vadd.f32 %v7263_v23, %v1142_v49 }
 0x2e4   : > { %v1021_v43 = vadd.f32 %v1013_v57, %v960_v2  ;;  %v1140_v25 = vadd.f32 %v1132_v26, %v1079_v59  ;;  %v7265_v2 = vld [vmem:[#allocation24_spill] sm:$0xff]  ;;  %v7266_v26 = vld [vmem:[#allocation14_spill] sm:$0xff] }
 0x2e5   : > { %v1180_v16 = vmul.f32 %v1177_v14, %v1170_v48  ;;  %vm1175_vm3 = vcmp.ge.f32.partialorder %v1170_v48, 0.0 }
 0x2e6   : > { %v1082_v31 = vadd.f32 %v1074_v3, %v1021_v43  ;;  %v1168_v22 = vadd.f32 %v7260_v38, %v1140_v25  ;;  %v1745_v4 = vpop.permute.xlu1 %1744  ;;  %v7268_v43 = vld [vmem:[#allocation35_spill] sm:$0xff] }
 0x2e7   : > { %v1184_v58 = vsel %vm1175_vm3, %v1170_v48, %v1180_v16 }
 0x2e8   : > { %v1143_v35 = vadd.f32 %v1135_v0, %v1082_v31  ;;  %vm1173_vm4 = vcmp.ge.f32.partialorder %v1168_v22, 0.0  ;;  %v1178_v44 = vmul.f32 %v1177_v14, %v1168_v22 }
 0x2ea   : > { %v1171_v8 = vadd.f32 %v1166_v62, %v1143_v35  ;;  %v1182_v63 = vsel %vm1173_vm4, %v1168_v22, %v1178_v44  ;;  %v5676_v21 = vpop.permute.xlu1 %1800  ;;  %v7273_v62 = vld [vmem:[#allocation18_spill] sm:$0xff] }
 0x2eb   : > { %1194 = vrot.lane.b32.xlu1 %v1182_v63, %s4637_s12 }
 0x2ec   : > { %v1181_v29 = vmul.f32 %v1177_v14, %v1171_v8  ;;  %vm1176_vm5 = vcmp.ge.f32.partialorder %v1171_v8, 0.0  ;;  %v5684_v14 = vpop.permute.xlu0 %1240 }
 0x2ee   : > { %v1185_v18 = vsel %vm1176_vm5, %v1171_v8, %v1181_v29  ;;  %v5678_v47 = vpop.permute.xlu1 %1692  ;;  %v1902_v8 = vlaneseq }
 0x2ef   : > { %1200 = vrot.lane.b32.xlu1 %v1185_v18, %s4637_s12 }
 0x2f0   : > { %v5688_v42 = vpop.permute.xlu0 %1871  ;;  %v5770_v18 = vshrl.u32 %v1902_v8, 7  ;;  %v5772_v16 = vand.u32 127, %v1902_v8 }
 0x2f2   : > { %v5682_v34 = vpop.permute.xlu1 %1748  ;;  %7275 = vst [vmem:[#allocation40_spill] sm:$0xff] %v5770_v18  ;;  %7276 = vst [vmem:[#allocation42_spill] sm:$0xff] %v5772_v16  ;;  %v1916_v8 = vadd.s32 104, %v5770_v18 }
 0x2f3   : > { %1198 = vrot.lane.b32.xlu1 %v1184_v58, %s4637_s12  ;;  %v5777_v58 = vadd.s32 8, %v5770_v18 }
 0x2f4   : > { %v5692_v45 = vpop.permute.xlu0 %1881 }
 0x2f5   : > { %7277 = vst [vmem:[#allocation48_spill] sm:$0xff] %v5777_v58 }
 0x2f6   : > { %v5686_v39 = vpop.permute.xlu1 %1752 }
 0x2f8   : > { %v1265_v36 = vpop.permute.xlu0 %1264 }
 0x2fa   : > { %v5690_v61 = vpop.permute.xlu1 %1812 }
 0x2fe   : > { %v5694_v6 = vpop.permute.xlu1 %1230 }
 0x302   : > { %v5696_v7 = vpop.permute.xlu1 %1235 }
 0x306   : > { %v5700_v60 = vpop.permute.xlu1 %1866 }
 0x30a   : > { %v5702_v52 = vpop.permute.xlu1 %1876 }
 0x34f   : > { %v1197_v10 = vpop.permute.xlu0 %1196 }
 0x350   : > { %1208 = vst.msk [vmem:[#allocation3 + $0x10] sm:$0xff] %vm481_vm6, %v1197_v10 }
 0x351   : > { %1209 = vst.msk [vmem:[#allocation3 + $0x18] sm:$0xff] %vm460_vm1, %v1197_v10  ;;  %v7280_v10 = vld [vmem:[#allocation17_spill] sm:$0xff] }
 0x357   : > { %v5704_v46 = vld [vmem:[#allocation3 + $0x10] sm:$0xff] }
 0x358   : > { %v1254_v53 = vld [vmem:[#allocation3 + $0x18] sm:$0xff]  ;;  %v1277_v5 = vmul.f32 %v1265_v36, %v5704_v46  ;;  %v1337_v24 = vmul.f32 %v7264_v40, %v5704_v46  ;;  %v1397_v32 = vmul.f32 %v7265_v2, %v5704_v46  ;;  %v1457_v55 = vmul.f32 %v7266_v26, %v5704_v46 }
 0x359   : > { %v1278_v54 = vmul.f32 %v1265_v36, %v1254_v53  ;;  %v1338_v56 = vmul.f32 %v7264_v40, %v1254_v53  ;;  %v1398_v59 = vmul.f32 %v7265_v2, %v1254_v53  ;;  %v1458_v27 = vmul.f32 %v7266_v26, %v1254_v53 }
 0x35a   : > { %1295 = vrot.lane.b32.xlu1 %v1277_v5, %s4638_s13  ;;  %v1518_v19 = vmul.f32 %v7267_v30, %v1254_v53  ;;  %v1517_v33 = vmul.f32 %v7267_v30, %v5704_v46  ;;  %v1578_v25 = vmul.f32 %v7268_v43, %v1254_v53  ;;  %v1577_v1 = vmul.f32 %v7268_v43, %v5704_v46 }
 0x35b   : > { %1297 = vrot.lane.b32.xlu0 %v1278_v54, %s4638_s13  ;;  %v1638_v3 = vmul.f32 %v7269_v13, %v1254_v53  ;;  %v1637_v49 = vmul.f32 %v7269_v13, %v5704_v46  ;;  %v1697_v31 = vmul.f32 %v1685_v50, %v5704_v46  ;;  %v1698_v38 = vmul.f32 %v1685_v50, %v1254_v53 }
 0x35c   : > { %v1758_v22 = vmul.f32 %v1745_v4, %v1254_v53  ;;  %v1757_v20 = vmul.f32 %v1745_v4, %v5704_v46  ;;  %v1817_v41 = vmul.f32 %v5556_v12, %v5704_v46  ;;  %v1818_v0 = vmul.f32 %v5556_v12, %v1254_v53  ;;  %v7274_v12 = vld [vmem:[#allocation20_spill] sm:$0xff] }
 0x35d   : > { %v1195_v17 = vpop.permute.xlu1 %1194  ;;  %v5780_v50 = vmul.u32 2, %v5772_v16  ;;  %v5783_v4 = vadd.s32 16, %v5770_v18  ;;  %v5786_v36 = vadd.s32 24, %v5770_v18  ;;  %v5849_v26 = vadd.s32 48, %v5770_v18 }
 0x35e   : > { %1206 = vst.msk [vmem:[#allocation3] sm:$0xff] %vm481_vm6, %v1195_v17  ;;  %1355 = vrot.lane.b32.xlu1 %v1337_v24, %s7174_s17  ;;  %v5814_v24 = vadd.s32 40, %v5770_v18  ;;  %v1912_v43 = vadd.s32 72, %v5770_v18 }
 0x35f   : > { %1207 = vst.msk [vmem:[#allocation3 + $0x8] sm:$0xff] %vm460_vm1, %v1195_v17  ;;  %1357 = vrot.lane.b32.xlu0 %v1338_v56, %s7174_s17  ;;  %7278 = vst [vmem:[#allocation54_spill] sm:$0xff] %v5783_v4  ;;  %vm1924_vm4 = vcmp.eq.s32.totalorder %v5783_v4, %v5780_v50  ;;  %vm1925_vm3 = vcmp.eq.s32.totalorder %v5786_v36, %v5780_v50  ;;  %v5811_v56 = vadd.s32 32, %v5770_v18  ;;  %v7287_v17 = vld [vmem:[#allocation25_spill] sm:$0xff] }
 0x360   : > { %7279 = vst [vmem:[#allocation60_spill] sm:$0xff] %v5786_v36  ;;  %vm5806_vm0 = vmpackc.low %vm1925_vm3, %vm1924_vm4  ;;  %vm1928_vm3 = vcmp.eq.s32.totalorder %v5849_v26, %v5780_v50 }
 0x361   : > { %v1201_v15 = vpop.permute.xlu1 %1200  ;;  %7285 = vst [vmem:[#allocation41_spill] sm:$0xff] %v5811_v56  ;;  %7286 = vst [vmem:[#allocation45_spill] sm:$0xff] %v5814_v24 }
 0x362   : > { %1212 = vst.msk [vmem:[#allocation3 + $0x30] sm:$0xff] %vm481_vm6, %v1201_v15  ;;  %1415 = vrot.lane.b32.xlu1 %v1397_v32, %s7170_s18  ;;  %7290 = vst [vmem:[#allocation55_spill] sm:$0xff] %v5849_v26 }
 0x363   : > { %1213 = vst.msk [vmem:[#allocation3 + $0x38] sm:$0xff] %vm460_vm1, %v1201_v15  ;;  %1417 = vrot.lane.b32.xlu0 %v1398_v59, %s7170_s18  ;;  %v7158_v59 = vmov 1.0|1.0  }
 0x365   : > { %v1199_v57 = vpop.permute.xlu1 %1198  ;;  %v5756_v44 = vld [vmem:[#allocation3] sm:$0xff] }
 0x366   : > { %1210 = vst.msk [vmem:[#allocation3 + $0x20] sm:$0xff] %vm481_vm6, %v1199_v57  ;;  %1475 = vrot.lane.b32.xlu1 %v1457_v55, %s7172_s19  ;;  %v5754_v35 = vld [vmem:[#allocation3 + $0x8] sm:$0xff]  ;;  %v1275_v48 = vmul.f32 %v7273_v62, %v5756_v44  ;;  %v1335_v29 = vmul.f32 %v7274_v12, %v5756_v44  ;;  %v1395_v54 = vmul.f32 %v7280_v10, %v5756_v44 }
 0x367   : > { %1211 = vst.msk [vmem:[#allocation3 + $0x28] sm:$0xff] %vm460_vm1, %v1199_v57  ;;  %1477 = vrot.lane.b32.xlu0 %v1458_v27, %s7172_s19  ;;  %v1276_v23 = vmul.f32 %v7273_v62, %v5754_v35  ;;  %v1336_v63 = vmul.f32 %v7274_v12, %v5754_v35  ;;  %v1396_v53 = vmul.f32 %v7280_v10, %v5754_v35  ;;  %v5852_v27 = vadd.s32 56, %v5770_v18  ;;  %v7292_v55 = vld [vmem:[#allocation29_spill] sm:$0xff] }
 0x368   : > { %vm1922_vm1 = vcmp.eq.s32.totalorder %v5770_v18, %v5780_v50  ;;  %vm1923_vm6 = vcmp.eq.s32.totalorder %v5777_v58, %v5780_v50  ;;  %v1456_v2 = vmul.f32 %v7287_v17, %v5754_v35  ;;  %v1455_v32 = vmul.f32 %v7287_v17, %v5756_v44 }
 0x369   : > { %vm5798_vm5 = vmpackc.low %vm1923_vm6, %vm1922_vm1  ;;  %vm1926_vm1 = vcmp.eq.s32.totalorder %v5811_v56, %v5780_v50  ;;  %vm1927_vm6 = vcmp.eq.s32.totalorder %v5814_v24, %v5780_v50  ;;  %7291 = vst [vmem:[#allocation49_spill] sm:$0xff] %v5852_v27  ;;  %v1516_v57 = vmul.f32 %v7292_v55, %v5754_v35  ;;  %v1515_v30 = vmul.f32 %v7292_v55, %v5756_v44 }
 0x36a   : > { %1535 = vrot.lane.b32.xlu1 %v1517_v33, %s7156_s20  ;;  %4231 = vmatprep.subr.msk.bf16.mxu1 %vm5798_vm5, %v7158_v59  ;;  %vm5844_vm4 = vmpackc.low %vm1927_vm6, %vm1926_vm1  ;;  %vm1929_vm1 = vcmp.eq.s32.totalorder %v5852_v27, %v5780_v50  ;;  %v1911_v33 = vadd.s32 64, %v5770_v18  ;;  %v1917_v12 = vadd.s32 112, %v5770_v18  ;;  %v1815_v17 = vmul.f32 %v5676_v21, %v5756_v44 }
 0x36b   : > { %1537 = vrot.lane.b32.xlu0 %v1518_v19, %s7156_s20  ;;  %4263 = vmatprep.subr.msk.bf16.mxu0 %vm5798_vm5, %v7158_v59  ;;  %vm5876_vm6 = vmpackc.low %vm1929_vm1, %vm1928_vm3  ;;  %vm1931_vm3 = vcmp.eq.s32.totalorder %v1912_v43, %v5780_v50  ;;  %v7306_v43 = vld [vmem:[#allocation34_spill] sm:$0xff] }
 0x36c   : > { %4233 = vmatpush3.bf16.msk.msra.mxu1 %vm5798_vm5, %v7158_v59  ;;  %4265 = vmatpush3.bf16.msk.msra.mxu0 %vm5798_vm5, %v7158_v59  ;;  %vm1930_vm2 = vcmp.eq.s32.totalorder %v1911_v33, %v5780_v50 }
 0x36d   : > { %4235 = vmatprep.subr.msk.bf16.mxu1 %vm5806_vm0, %v7158_v59  ;;  %4267 = vmatprep.subr.msk.bf16.mxu0 %vm5806_vm0, %v7158_v59  ;;  %vm5902_vm1 = vmpackc.low %vm1931_vm3, %vm1930_vm2 }
 0x36e   : > { %1595 = vrot.lane.b32.xlu1 %v1577_v1, %s7154_s21 }
 0x36f   : > { %1597 = vrot.lane.b32.xlu0 %v1578_v25, %s7154_s21  ;;  %v7295_v25 = vld [vmem:[#allocation31_spill] sm:$0xff] }
 0x370   : > { %4237 = vmatpush3.bf16.msk.msra.mxu1 %vm5806_vm0, %v7158_v59  ;;  %4269 = vmatpush3.bf16.msk.msra.mxu0 %vm5806_vm0, %v7158_v59  ;;  %v1576_v1 = vmul.f32 %v7295_v25, %v5754_v35  ;;  %v1575_v13 = vmul.f32 %v7295_v25, %v5756_v44 }
 0x371   : > { %4239 = vmatprep.subr.msk.bf16.mxu1 %vm5844_vm4, %v7158_v59  ;;  %4271 = vmatprep.subr.msk.bf16.mxu0 %vm5844_vm4, %v7158_v59 }
 0x372   : > { %1655 = vrot.lane.b32.xlu1 %v1637_v49, %s7152_s23  ;;  %v1913_v49 = vadd.s32 80, %v5770_v18 }
 0x373   : > { %1657 = vrot.lane.b32.xlu0 %v1638_v3, %s7152_s23 }
 0x374   : > { %4241 = vmatpush3.bf16.msk.msra.mxu1 %vm5844_vm4, %v7158_v59  ;;  %4273 = vmatpush3.bf16.msk.msra.mxu0 %vm5844_vm4, %v7158_v59  ;;  %vm1932_vm4 = vcmp.eq.s32.totalorder %v1913_v49, %v5780_v50 }
 0x375   : > { %4243 = vmatprep.subr.msk.bf16.mxu1 %vm5876_vm6, %v7158_v59  ;;  %4275 = vmatprep.subr.msk.bf16.mxu0 %vm5876_vm6, %v7158_v59 }
 0x376   : > { %1717 = vrot.lane.b32.xlu1 %v1698_v38, %s7270_s25  ;;  %v7298_v38 = vld [vmem:[#allocation36_spill] sm:$0xff] }
 0x377   : > { %1715 = vrot.lane.b32.xlu0 %v1697_v31, %s7270_s25  ;;  %v1914_v31 = vadd.s32 88, %v5770_v18 }
 0x378   : > { %4245 = vmatpush3.bf16.msk.msra.mxu1 %vm5876_vm6, %v7158_v59  ;;  %4277 = vmatpush3.bf16.msk.msra.mxu0 %vm5876_vm6, %v7158_v59 }
 0x379   : > { %vm1933_vm2 = vcmp.eq.s32.totalorder %v1914_v31, %v5780_v50  ;;  %4247 = vmatprep.subr.msk.bf16.mxu1 %vm5902_vm1, %v7158_v59  ;;  %4279 = vmatprep.subr.msk.bf16.mxu0 %vm5798_vm5, %v7158_v59  ;;  %v7308_v31 = vld [vmem:[#allocation33_spill] sm:$0xff] }
 0x37a   : > { %1775 = vrot.lane.b32.xlu1 %v1757_v20, %s7271_s26  ;;  %v1635_v20 = vmul.f32 %v7298_v38, %v5756_v44  ;;  %vm5928_vm3 = vmpackc.low %vm1933_vm2, %vm1932_vm4  ;;  %vm1935_vm4 = vcmp.eq.s32.totalorder %v1916_v8, %v5780_v50  ;;  %vm1936_vm2 = vcmp.eq.s32.totalorder %v1917_v12, %v5780_v50  ;;  %v6027_v8 = vld [vmem:[#allocation3 + $0x20] sm:$0xff] }
 0x37b   : > { %1777 = vrot.lane.b32.xlu0 %v1758_v22, %s7271_s26  ;;  %v1636_v22 = vmul.f32 %v7298_v38, %v5754_v35 }
 0x37c   : > { %4249 = vmatpush3.bf16.msk.msra.mxu1 %vm5902_vm1, %v7158_v59 }
 0x37d   : > { %4251 = vmatprep.subr.msk.bf16.mxu1 %vm5928_vm3, %v7158_v59 }
 0x37e   : > { %1837 = vrot.lane.b32.xlu1 %v1818_v0, %s7272_s10  ;;  %v7301_v0 = vld [vmem:[#allocation39_spill] sm:$0xff] }
 0x37f   : > { %1835 = vrot.lane.b32.xlu0 %v1817_v41, %s7272_s10  ;;  %v1696_v62 = vmul.f32 %v7301_v0, %v5754_v35 }
 0x380   : > { %4253 = vmatpush3.bf16.msk.msra.mxu1 %vm5928_vm3, %v7158_v59  ;;  %vm7320_vm3 = vcmask 965632  }
 0x382   : > { %1291 = vrot.lane.b32.xlu1 %v1275_v48, %s4638_s13  ;;  %v1915_v48 = vadd.s32 96, %v5770_v18 }
 0x383   : > { %1293 = vrot.lane.b32.xlu0 %v1276_v23, %s4638_s13  ;;  %v1695_v23 = vmul.f32 %v7301_v0, %v5756_v44 }
 0x384   : > { %vm1934_vm6 = vcmp.eq.s32.totalorder %v1915_v48, %v5780_v50  ;;  %v1256_v48 = vld [vmem:[#allocation3 + $0x28] sm:$0xff] }
 0x385   : > { %vm4254_vm1 = vmpackc.low %vm1935_vm4, %vm1934_vm6 }
 0x386   : > { %1351 = vrot.lane.b32.xlu1 %v1335_v29, %s7174_s17  ;;  %v7302_v29 = vld [vmem:[#allocation63_spill] sm:$0xff]  ;;  %4255 = vmatprep.subr.msk.bf16.mxu1 %vm4254_vm1, %v7158_v59 }
 0x387   : > { %1353 = vrot.lane.b32.xlu0 %v1336_v63, %s7174_s17  ;;  %v1918_v63 = vadd.s32 120, %v5770_v18  ;;  %v1756_v10 = vmul.f32 %v7302_v29, %v5754_v35  ;;  %4257 = vmatpush3.bf16.msk.msra.mxu1 %vm4254_vm1, %v7158_v59  ;;  %vm7323_vm1 = vmmov %vm7320_vm3 }
 0x389   : > { %vm1937_vm15 = vcmp.eq.s32.totalorder %v1918_v63, %v5780_v50  ;;  %v7303_v50 = vld [vmem:[#allocation22_spill] sm:$0xff]  ;;  %v7309_v63 = vld [vmem:[#allocation21_spill] sm:$0xff] }
 0x38a   : > { %1411 = vrot.lane.b32.xlu1 %v1395_v54, %s7170_s18  ;;  %vm4258_vm6 = vmpackc.low %vm1937_vm15, %vm1936_vm2  ;;  %v1816_v54 = vmul.f32 %v5676_v21, %v5754_v35  ;;  %v7304_v21 = vld [vmem:[#allocation27_spill] sm:$0xff]  ;;  %vm7319_vm15 = vcmask 973824  }
 0x38b   : > { %1413 = vrot.lane.b32.xlu0 %v1396_v53, %s7170_s18  ;;  %v1755_v53 = vmul.f32 %v7302_v29, %v5756_v44  ;;  %4259 = vmatprep.subr.msk.bf16.mxu1 %vm4258_vm6, %v7158_v59  ;;  %v1280_v29 = vmul.f32 %v7309_v63, %v1256_v48  ;;  %vm7321_vm4 = vmmov %vm7319_vm15 }
 0x38c   : > { %4261 = vmatpush3.bf16.msk.msra.mxu1 %vm4258_vm6, %v7158_v59 }
 0x38e   : > { %1471 = vrot.lane.b32.xlu1 %v1455_v32, %s7172_s19  ;;  %v5969_v32 = vld [vmem:[#allocation3 + $0x30] sm:$0xff] }
 0x38f   : > { %1473 = vrot.lane.b32.xlu0 %v1456_v2, %s7172_s19  ;;  %v5967_v2 = vld [vmem:[#allocation3 + $0x38] sm:$0xff]  ;;  %v1281_v35 = vmul.f32 %v7303_v50, %v5969_v32  ;;  %v1581_v38 = vmul.f32 %v7308_v31, %v5969_v32  ;;  %v1641_v41 = vmul.f32 %v5674_v28, %v5969_v32  ;;  %v1701_v0 = vmul.f32 %v5678_v47, %v5969_v32 }
 0x390   : > { %v1282_v15 = vmul.f32 %v7303_v50, %v5967_v2  ;;  %v1342_v55 = vmul.f32 %v7304_v21, %v5967_v2  ;;  %v1462_v25 = vmul.f32 %v7306_v43, %v5967_v2  ;;  %v1246_v4 = vmul.f32 %v5969_v32, %v5684_v14 }
 0x392   : > { %1531 = vrot.lane.b32.xlu1 %v1515_v30, %s7156_s20  ;;  %v7305_v30 = vld [vmem:[#allocation19_spill] sm:$0xff] }
 0x393   : > { %1533 = vrot.lane.b32.xlu0 %v1516_v57, %s7156_s20  ;;  %v1341_v57 = vmul.f32 %v7304_v21, %v5969_v32  ;;  %v1402_v19 = vmul.f32 %v7305_v30, %v5967_v2  ;;  %v1401_v33 = vmul.f32 %v7305_v30, %v5969_v32  ;;  %v7311_v21 = vld [vmem:[#allocation28_spill] sm:$0xff] }
 0x396   : > { %1591 = vrot.lane.b32.xlu1 %v1575_v13, %s7154_s21  ;;  %v7307_v13 = vld [vmem:[#allocation37_spill] sm:$0xff] }
 0x397   : > { %1593 = vrot.lane.b32.xlu0 %v1576_v1, %s7154_s21  ;;  %v1461_v1 = vmul.f32 %v7306_v43, %v5969_v32  ;;  %v1522_v3 = vmul.f32 %v7307_v13, %v5967_v2  ;;  %v1521_v49 = vmul.f32 %v7307_v13, %v5969_v32 }
 0x39a   : > { %1651 = vrot.lane.b32.xlu1 %v1635_v20, %s7152_s23  ;;  %v1642_v20 = vmul.f32 %v5674_v28, %v5967_v2  ;;  %v1761_v28 = vmul.f32 %v5686_v39, %v5969_v32 }
 0x39b   : > { %1653 = vrot.lane.b32.xlu0 %v1636_v22, %s7152_s23  ;;  %v1582_v22 = vmul.f32 %v7308_v31, %v5967_v2 }
 0x39e   : > { %1711 = vrot.lane.b32.xlu1 %v1695_v23, %s7270_s25  ;;  %v1762_v23 = vmul.f32 %v5686_v39, %v5967_v2 }
 0x39f   : > { %1713 = vrot.lane.b32.xlu0 %v1696_v62, %s7270_s25  ;;  %v1702_v62 = vmul.f32 %v5678_v47, %v5967_v2 }
 0x3a2   : > { %1771 = vrot.lane.b32.xlu1 %v1755_v53, %s7271_s26 }
 0x3a3   : > { %1773 = vrot.lane.b32.xlu0 %v1756_v10, %s7271_s26  ;;  %v1279_v10 = vmul.f32 %v7309_v63, %v6027_v8  ;;  %v1639_v63 = vmul.f32 %v5672_v37, %v6027_v8 }
 0x3a6   : > { %1831 = vrot.lane.b32.xlu1 %v1815_v17, %s7272_s10 }
 0x3a7   : > { %1833 = vrot.lane.b32.xlu0 %v1816_v54, %s7272_s10  ;;  %v7310_v54 = vld [vmem:[#allocation13_spill] sm:$0xff] }
 0x3a8   : > { %v1340_v17 = vmul.f32 %v7310_v54, %v1256_v48  ;;  %v1339_v50 = vmul.f32 %v7310_v54, %v6027_v8  ;;  %v1700_v54 = vmul.f32 %v5546_v51, %v1256_v48 }
 0x3aa   : > { %1303 = vrot.lane.b32.xlu1 %v1281_v35, %s4638_s13 }
 0x3ab   : > { %1305 = vrot.lane.b32.xlu0 %v1282_v15, %s4638_s13 }
 0x3ae   : > { %1363 = vrot.lane.b32.xlu1 %v1341_v57, %s7174_s17  ;;  %v1399_v57 = vmul.f32 %v7311_v21, %v6027_v8 }
 0x3af   : > { %1365 = vrot.lane.b32.xlu0 %v1342_v55, %s7174_s17  ;;  %v1400_v55 = vmul.f32 %v7311_v21, %v1256_v48  ;;  %v1760_v21 = vmul.f32 %v5682_v34, %v1256_v48 }
 0x3b2   : > { %1423 = vrot.lane.b32.xlu1 %v1401_v33, %s7170_s18  ;;  %v7312_v33 = vld [vmem:[#allocation32_spill] sm:$0xff] }
 0x3b3   : > { %1425 = vrot.lane.b32.xlu0 %v1402_v19, %s7170_s18  ;;  %v1460_v43 = vmul.f32 %v7312_v33, %v1256_v48 }
 0x3b6   : > { %1483 = vrot.lane.b32.xlu1 %v1461_v1, %s7172_s19 }
 0x3b7   : > { %1485 = vrot.lane.b32.xlu0 %v1462_v25, %s7172_s19  ;;  %v1459_v25 = vmul.f32 %v7312_v33, %v6027_v8  ;;  %v1820_v33 = vmul.f32 %v5564_v11, %v1256_v48 }
 0x3ba   : > { %1543 = vrot.lane.b32.xlu1 %v1521_v49, %s7156_s20 }
 0x3bb   : > { %1545 = vrot.lane.b32.xlu0 %v1522_v3, %s7156_s20  ;;  %v7313_v3 = vld [vmem:[#allocation23_spill] sm:$0xff] }
 0x3bc   : > { %v1520_v49 = vmul.f32 %v7313_v3, %v1256_v48  ;;  %v1519_v31 = vmul.f32 %v7313_v3, %v6027_v8 }
 0x3be   : > { %1605 = vrot.lane.b32.xlu1 %v1582_v22, %s7154_s21 }
 0x3bf   : > { %1603 = vrot.lane.b32.xlu0 %v1581_v38, %s7154_s21 }
 0x3c2   : > { %1663 = vrot.lane.b32.xlu1 %v1641_v41, %s7152_s23 }
 0x3c3   : > { %1665 = vrot.lane.b32.xlu0 %v1642_v20, %s7152_s23  ;;  %v7314_v20 = vld [vmem:[#allocation38_spill] sm:$0xff] }
 0x3c4   : > { %v1580_v41 = vmul.f32 %v7314_v20, %v1256_v48 }
 0x3c6   : > { %1725 = vrot.lane.b32.xlu1 %v1702_v62, %s7270_s25 }
 0x3c7   : > { %1723 = vrot.lane.b32.xlu0 %v1701_v0, %s7270_s25  ;;  %v1579_v0 = vmul.f32 %v7314_v20, %v6027_v8 }
 0x3ca   : > { %1783 = vrot.lane.b32.xlu1 %v1761_v28, %s7271_s26  ;;  %v1640_v28 = vmul.f32 %v5672_v37, %v1256_v48  ;;  %v6135_v48 = vld [vmem:[%s7083_s3 + $0x40] sm:$0xff] }
 0x3cb   : > { %1785 = vrot.lane.b32.xlu0 %v1762_v23, %s7271_s26 }
 0x3cc   : > { %v6033_v47 = vpop.permute.xlu1 %1295 }
 0x3cd   : > { %v6031_v12 = vpop.permute.xlu0 %1297 }
 0x3ce   : > { %1299 = vrot.lane.b32.xlu1 %v1279_v10, %s4638_s13 }
 0x3cf   : > { %1301 = vrot.lane.b32.xlu0 %v1280_v29, %s4638_s13 }
 0x3d0   : > { %v6042_v53 = vpop.permute.xlu1 %1355 }
 0x3d1   : > { %v6040_v39 = vpop.permute.xlu0 %1357 }
 0x3d2   : > { %1359 = vrot.lane.b32.xlu1 %v1339_v50, %s7174_s17 }
 0x3d3   : > { %1361 = vrot.lane.b32.xlu0 %v1340_v17, %s7174_s17  ;;  %v1699_v17 = vmul.f32 %v5546_v51, %v6027_v8 }
 0x3d4   : > { %v6051_v35 = vpop.permute.xlu1 %1415 }
 0x3d5   : > { %v6049_v15 = vpop.permute.xlu0 %1417 }
 0x3d6   : > { %1419 = vrot.lane.b32.xlu1 %v1399_v57, %s7170_s18 }
 0x3d7   : > { %1421 = vrot.lane.b32.xlu0 %v1400_v55, %s7170_s18  ;;  %v1759_v55 = vmul.f32 %v5682_v34, %v6027_v8  ;;  %v1822_v34 = vmul.f32 %v5690_v61, %v5967_v2 }
 0x3d8   : > { %v6060_v19 = vpop.permute.xlu1 %1475 }
 0x3d9   : > { %v6058_v30 = vpop.permute.xlu0 %1477 }
 0x3da   : > { %1479 = vrot.lane.b32.xlu1 %v1459_v25, %s7172_s19 }
 0x3db   : > { %1481 = vrot.lane.b32.xlu0 %v1460_v43, %s7172_s19  ;;  %v1819_v43 = vmul.f32 %v5564_v11, %v6027_v8  ;;  %v6130_v11 = vld [vmem:[%s7083_s3 + $0x48] sm:$0xff] }
 0x3dc   : > { %v6069_v13 = vpop.permute.xlu1 %1535 }
 0x3dd   : > { %v6067_v1 = vpop.permute.xlu0 %1537 }
 0x3de   : > { %1539 = vrot.lane.b32.xlu1 %v1519_v31, %s7156_s20 }
 0x3df   : > { %1541 = vrot.lane.b32.xlu0 %v1520_v49, %s7156_s20  ;;  %v1821_v49 = vmul.f32 %v5690_v61, %v5969_v32  ;;  %s3917_s20 = sld [smem:[#allocation6 + $0x2]] }
 0x3e0   : > { %v6078_v22 = vpop.permute.xlu1 %1595 }
 0x3e1   : > { %v6076_v38 = vpop.permute.xlu0 %1597 }
 0x3e2   : > { %1599 = vrot.lane.b32.xlu1 %v1579_v0, %s7154_s21  ;;  %v1308_v0 = vsel %vm582_vm7, %v6033_v47, %v6031_v12  ;;  %v1428_v12 = vsel %vm704_vm9, %v6051_v35, %v6049_v15 }
 0x3e3   : > { %1601 = vrot.lane.b32.xlu0 %v1580_v41, %s7154_s21  ;;  %v7315_v41 = vmov 2   ;;  %s7334_s21 = smov 123  }
 0x3e4   : > { %v6087_v23 = vpop.permute.xlu1 %1655 }
 0x3e5   : > { %v6085_v62 = vpop.permute.xlu0 %1657 }
 0x3e6   : > { %1659 = vrot.lane.b32.xlu1 %v1639_v63, %s7152_s23 }
 0x3e7   : > { %1661 = vrot.lane.b32.xlu0 %v1640_v28, %s7152_s23  ;;  %s7335_s23 = smov 122  }
 0x3e8   : > { %v6096_v10 = vpop.permute.xlu1 %1717 }
 0x3e9   : > { %v6094_v29 = vpop.permute.xlu0 %1715 }
 0x3ea   : > { %1719 = vrot.lane.b32.xlu1 %v1699_v17, %s7270_s25  ;;  %v6151_v17 = vld [vmem:[%s7083_s3 + $0x50] sm:$0xff] }
 0x3eb   : > { %1721 = vrot.lane.b32.xlu0 %v1700_v54, %s7270_s25  ;;  %v1244_v54 = vmul.f32 %v5704_v46, %v5694_v6 }
 0x3ec   : > { %v6105_v37 = vpop.permute.xlu1 %1775 }
 0x3ed   : > { %v6103_v50 = vpop.permute.xlu0 %1777 }
 0x3ee   : > { %1779 = vrot.lane.b32.xlu1 %v1759_v55, %s7271_s26  ;;  %v1316_v55 = vadd.f32 %v1308_v0, %v1244_v54 }
 0x3ef   : > { %1781 = vrot.lane.b32.xlu0 %v1760_v21, %s7271_s26  ;;  %v1368_v21 = vsel %vm643_vm8, %v6042_v53, %v6040_v39  ;;  %v6166_v39 = vld [vmem:[%s7083_s3 + $0x58] sm:$0xff]  ;;  %v1488_v53 = vsel %vm765_vm10, %v6060_v19, %v6058_v30 }
 0x3f0   : > { %v6114_v51 = vpop.permute.xlu1 %1837  ;;  %v1376_v46 = vadd.f32 %v1368_v21, %v1316_v55 }
 0x3f1   : > { %v6112_v57 = vpop.permute.xlu0 %1835 }
 0x3f2   : > { %1839 = vrot.lane.b32.xlu1 %v1819_v43, %s7272_s10  ;;  %v1436_v15 = vadd.f32 %v1428_v12, %v1376_v46  ;;  %v7318_v12 = vmov 3  }
 0x3f3   : > { %1841 = vrot.lane.b32.xlu0 %v1820_v33, %s7272_s10  ;;  %v7316_v33 = vmov 1  }
 0x3f4   : > { %v1292_v3 = vpop.permute.xlu1 %1291  ;;  %v1496_v30 = vadd.f32 %v1488_v53, %v1436_v15 }
 0x3f5   : > { %v1294_v25 = vpop.permute.xlu0 %1293 }
 0x3f6   : > { %1843 = vrot.lane.b32.xlu1 %v1821_v49, %s7272_s10  ;;  %v1307_v43 = vsel %vm582_vm7, %v1292_v3, %v1294_v25  ;;  %v7317_v49 = vmov 4   ;;  %v1548_v25 = vsel %vm826_vm11, %v6069_v13, %v6067_v1  ;;  %v1668_v1 = vsel %vm948_vm13, %v6087_v23, %v6085_v62 }
 0x3f7   : > { %1845 = vrot.lane.b32.xlu0 %v1822_v34, %s7272_s10  ;;  %v1243_v34 = vmul.f32 %v5756_v44, %v5680_v9  ;;  %v1608_v9 = vsel %vm887_vm12, %v6078_v22, %v6076_v38  ;;  %v1728_v38 = vsel %vm1009_vm14, %v6094_v29, %v6096_v10  ;;  %v1848_v29 = vsel %vm7320_vm3, %v6112_v57, %v6114_v51 }
 0x3f8   : > { %v1352_v20 = vpop.permute.xlu1 %1351 }
 0x3f9   : > { %v1354_v31 = vpop.permute.xlu0 %1353  ;;  %v1315_v3 = vadd.f32 %v1307_v43, %v1243_v34 }
 0x3fa   : > { %2102 = vperm.xlu1 %4456, %v6135_v48   ;;  %v1367_v35 = vsel %vm643_vm8, %v1352_v20, %v1354_v31  ;;  %v1556_v31 = vadd.f32 %v1548_v25, %v1496_v30 }
 0x3fb   : > { %2106 = vperm.xlu0 %4455, %v6130_v11   ;;  %v1375_v44 = vadd.f32 %v1367_v35, %v1315_v3  ;;  %v7322_v3 = vmov 5  }
 0x3fc   : > { %v1412_v2 = vpop.permute.xlu1 %1411 }
 0x3fd   : > { %v1414_v61 = vpop.permute.xlu0 %1413 }
 0x3fe   : > { %4457 = vset.pattern.permute.xlu1 %v7315_v41  ;;  %v1427_v19 = vsel %vm704_vm9, %v1412_v2, %v1414_v61  ;;  %v1616_v61 = vadd.f32 %v1608_v9, %v1556_v31  ;;  %v6215_v9 = vstv %s3917_s20  ;;  %v7324_v31 = vmov 7   ;;  %s7338_s20 = smov 126  }
 0x3ff   : > { %4458 = vset.pattern.permute.xlu0 %v7315_v41  ;;  %2142 = vperm.xlu1 %4457, %v6135_v48   ;;  %v1435_v13 = vadd.f32 %v1427_v19, %v1375_v44 }
 0x400   : > { %2146 = vperm.xlu0 %4458, %v6130_v11   ;;  %v1472_v63 = vpop.permute.xlu1 %1471  ;;  %v1676_v62 = vadd.f32 %v1668_v1, %v1616_v61 }
 0x401   : > { %v1474_v28 = vpop.permute.xlu0 %1473 }
 0x402   : > { %v1487_v20 = vsel %vm765_vm10, %v1472_v63, %v1474_v28  ;;  %v1788_v28 = vsel %vm7319_vm15, %v6105_v37, %v6103_v50  ;;  %vm2544_vm15 = vcmask 523264  }
 0x403   : > { %4459 = vset.pattern.permute.xlu1 %v7316_v33  ;;  %v1495_v22 = vadd.f32 %v1487_v20, %v1435_v13 }
 0x404   : > { %2150 = vperm.xlu0 %4458, %v6151_v17   ;;  %v1532_v6 = vpop.permute.xlu1 %1531  ;;  %2110 = vperm.xlu1 %4459, %v6151_v17  }
 0x405   : > { %v1534_v47 = vpop.permute.xlu0 %1533 }
 0x406   : > { %v1547_v2 = vsel %vm826_vm11, %v1532_v6, %v1534_v47  ;;  %v1736_v47 = vadd.f32 %v1728_v38, %v1676_v62 }
 0x407   : > { %v1555_v63 = vadd.f32 %v1547_v2, %v1495_v22 }
 0x408   : > { %4463 = vset.pattern.permute.xlu0 %v7317_v49  ;;  %v1592_v54 = vpop.permute.xlu1 %1591  ;;  %2114 = vperm.xlu1 %4459, %v6166_v39   ;;  %v1796_v53 = vadd.f32 %v1788_v28, %v1736_v47  ;;  %v7327_v47 = vmov 8  }
 0x409   : > { %v1594_v0 = vpop.permute.xlu0 %1593  ;;  %2226 = vperm.xlu0 %4463, %v6130_v11  }
 0x40a   : > { %v1607_v23 = vsel %vm887_vm12, %v1592_v54, %v1594_v0  ;;  %v1856_v35 = vadd.f32 %v1848_v29, %v1796_v53 }
 0x40b   : > { %v1615_v10 = vadd.f32 %v1607_v23, %v1555_v63  ;;  %v7326_v63 = vmov 9  }
 0x40c   : > { %v1652_v55 = vpop.permute.xlu1 %1651  ;;  %4460 = vset.pattern.permute.xlu1 %v7318_v12  ;;  %v1885_v30 = vadd.f32 %v5688_v42, %v1856_v35 }
 0x40d   : > { %v1654_v21 = vpop.permute.xlu0 %1653  ;;  %4464 = vset.pattern.permute.xlu0 %v7318_v12  ;;  %2186 = vperm.xlu1 %4460, %v6130_v11  }
 0x40e   : > { %2182 = vperm.xlu0 %4464, %v6135_v48   ;;  %v1667_v6 = vsel %vm948_vm13, %v1652_v55, %v1654_v21  ;;  %v1895_v42 = vmul.f32 %v6215_v9, %v1885_v30  ;;  %vm1890_vm6 = vcmp.ge.f32.partialorder %v1885_v30, 0.0  ;;  %v7325_v55 = vmov 6  }
 0x40f   : > { %v1675_v37 = vadd.f32 %v1667_v6, %v1615_v10  ;;  %v7328_v10 = vmov 10  }
 0x410   : > { %v1712_v43 = vpop.permute.xlu1 %1711 }
 0x411   : > { %v1714_v46 = vpop.permute.xlu0 %1713  ;;  %4461 = vset.pattern.permute.xlu1 %v7317_v49 }
 0x412   : > { %2194 = vperm.xlu0 %4464, %v6166_v39   ;;  %2222 = vperm.xlu1 %4461, %v6135_v48   ;;  %v1727_v50 = vsel %vm1009_vm14, %v1712_v43, %v1714_v46 }
 0x413   : > { %v1735_v0 = vadd.f32 %v1727_v50, %v1675_v37 }
 0x414   : > { %v1772_v15 = vpop.permute.xlu1 %1771 }
 0x415   : > { %v1774_v34 = vpop.permute.xlu0 %1773 }
 0x416   : > { %v1787_v25 = vsel %vm7321_vm4, %v1772_v15, %v1774_v34  ;;  %4469 = vset.pattern.permute.xlu0 %v7322_v3  ;;  %4462 = vset.pattern.permute.xlu1 %v7315_v41  ;;  %v7329_v15 = vmov 0  }
 0x417   : > { %2270 = vperm.xlu0 %4469, %v6151_v17   ;;  %2154 = vperm.xlu1 %4462, %v6166_v39   ;;  %v1795_v57 = vadd.f32 %v1787_v25, %v1735_v0 }
 0x418   : > { %v1832_v54 = vpop.permute.xlu1 %1831 }
 0x419   : > { %v1834_v51 = vpop.permute.xlu0 %1833 }
 0x41a   : > { %v1847_v19 = vsel %vm7323_vm1, %v1832_v54, %v1834_v51 }
 0x41b   : > { %v1855_v44 = vadd.f32 %v1847_v19, %v1795_v57  ;;  %4472 = vset.pattern.permute.xlu0 %v7324_v31  ;;  %4465 = vset.pattern.permute.xlu1 %v7318_v12 }
 0x41c   : > { %2346 = vperm.xlu0 %4472, %v6130_v11   ;;  %v6223_v13 = vpop.permute.xlu1 %1303  ;;  %2190 = vperm.xlu1 %4465, %v6151_v17  }
 0x41d   : > { %v1884_v20 = vadd.f32 %v5700_v60, %v1855_v44  ;;  %v6221_v1 = vpop.permute.xlu0 %1305  ;;  %v1899_v60 = vsel %vm1890_vm6, %v1885_v30, %v1895_v42 }
 0x41e   : > { %v1310_v56 = vsel %vm582_vm7, %v6223_v13, %v6221_v1 }
 0x41f   : > { %vm1889_vm2 = vcmp.ge.f32.partialorder %v1884_v20, 0.0  ;;  %v1894_v21 = vmul.f32 %v6215_v9, %v1884_v20 }
 0x420   : > { %4473 = vset.pattern.permute.xlu0 %v7325_v55  ;;  %v6231_v2 = vpop.permute.xlu1 %1363  ;;  %4466 = vset.pattern.permute.xlu1 %v7322_v3 }
 0x421   : > { %v6229_v61 = vpop.permute.xlu0 %1365  ;;  %v1898_v38 = vsel %vm1889_vm2, %v1884_v20, %v1894_v21  ;;  %2302 = vperm.xlu0 %4473, %v6135_v48   ;;  %2262 = vperm.xlu1 %4466, %v6135_v48  }
 0x422   : > { %4127 = vmatprep.mubr.f32.mxu1 %v1898_v38 }
 0x423   : > { %4128 = vmatmul.mubr.f32.vlgmr.msra.gmra.mrb[4].mxu1 %v1899_v60  ;;  %v1245_v60 = vmul.f32 %v6027_v8, %v5696_v7  ;;  %v1370_v7 = vsel %vm643_vm8, %v6231_v2, %v6229_v61 }
 0x424   : > { %v6238_v62 = vpop.permute.xlu1 %1423 }
 0x425   : > { %v6236_v22 = vpop.permute.xlu0 %1425  ;;  %2314 = vperm.xlu0 %4473, %v6166_v39   ;;  %2266 = vperm.xlu1 %4466, %v6130_v11  }
 0x426   : > { %v1430_v1 = vsel %vm704_vm9, %v6238_v62, %v6236_v22 }
 0x428   : > { %v6244_v28 = vpop.permute.xlu1 %1483 }
 0x429   : > { %v6242_v23 = vpop.permute.xlu0 %1485  ;;  %4477 = vset.pattern.permute.xlu0 %v7326_v63  ;;  %4467 = vset.pattern.permute.xlu1 %v7317_v49 }
 0x42a   : > { %2422 = vperm.xlu0 %4477, %v6135_v48   ;;  %2230 = vperm.xlu1 %4467, %v6151_v17  }
 0x42c   : > { %v6252_v43 = vpop.permute.xlu1 %1543 }
 0x42d   : > { %v6250_v46 = vpop.permute.xlu0 %1545 }
 0x42e   : > { %4479 = vset.pattern.permute.xlu0 %v7327_v47  ;;  %2234 = vperm.xlu1 %4467, %v6166_v39   ;;  %v1550_v2 = vsel %vm826_vm11, %v6252_v43, %v6250_v46 }
 0x42f   : > { %2390 = vperm.xlu0 %4479, %v6151_v17  }
 0x430   : > { %v6259_v29 = vpop.permute.xlu1 %1605 }
 0x431   : > { %v6257_v6 = vpop.permute.xlu0 %1603 }
 0x432   : > { %4468 = vset.pattern.permute.xlu1 %v7325_v55 }
 0x433   : > { %4482 = vset.pattern.permute.xlu0 %v7328_v10  ;;  %2306 = vperm.xlu1 %4468, %v6130_v11  }
 0x434   : > { %2466 = vperm.xlu0 %4482, %v6130_v11   ;;  %v6267_v50 = vpop.permute.xlu1 %1663 }
 0x435   : > { %v6265_v53 = vpop.permute.xlu0 %1665 }
 0x436   : > { %v1670_v46 = vsel %vm948_vm13, %v6267_v50, %v6265_v53 }
 0x437   : > { %4470 = vset.pattern.permute.xlu1 %v7324_v31 }
 0x438   : > { %2470 = vperm.xlu0 %4482, %v6151_v17   ;;  %v6273_v34 = vpop.permute.xlu1 %1725  ;;  %2342 = vperm.xlu1 %4470, %v6135_v48  }
 0x439   : > { %v6271_v37 = vpop.permute.xlu0 %1723 }
 0x43c   : > { %4485 = vset.pattern.permute.xlu0 %v7329_v15  ;;  %v6279_v25 = vpop.permute.xlu1 %1783  ;;  %4471 = vset.pattern.permute.xlu1 %v7322_v3 }
 0x43d   : > { %v6277_v35 = vpop.permute.xlu0 %1785  ;;  %2075 = vperm.xlu0 %4485, %v6135_v48   ;;  %2274 = vperm.xlu1 %4471, %v6166_v39  }
 0x440   : > { %v1300_v57 = vpop.permute.xlu1 %1299 }
 0x441   : > { %v1302_v0 = vpop.permute.xlu0 %1301  ;;  %2090 = vperm.xlu0 %4485, %v6166_v39   ;;  %4474 = vset.pattern.permute.xlu1 %v7325_v55 }
 0x442   : > { %2310 = vperm.xlu1 %4474, %v6151_v17   ;;  %v1309_v38 = vsel %vm582_vm7, %v1300_v57, %v1302_v0  ;;  %v1318_v57 = vadd.f32 %v1310_v56, %v1246_v4  ;;  %vm7330_vm7 = vmmov %vm7321_vm4 }
 0x443   : > { %v1317_v27 = vadd.f32 %v1309_v38, %v1245_v60 }
 0x444   : > { %v1360_v54 = vpop.permute.xlu1 %1359  ;;  %v1378_v14 = vadd.f32 %v1370_v7, %v1318_v57 }
 0x445   : > { %v1362_v51 = vpop.permute.xlu0 %1361 }
 0x446   : > { %4475 = vset.pattern.permute.xlu1 %v7327_v47  ;;  %v1369_v59 = vsel %vm643_vm8, %v1360_v54, %v1362_v51  ;;  %vm7331_vm8 = vmmov %vm7321_vm4  ;;  %vm2662_vm4 = vcmask 343120  }
 0x447   : > { %2382 = vperm.xlu1 %4475, %v6135_v48   ;;  %v1377_v0 = vadd.f32 %v1369_v59, %v1317_v27  ;;  %v1490_v27 = vsel %vm765_vm10, %v6244_v28, %v6242_v23  ;;  %v1790_v53 = vsel %vm7331_vm8, %v6279_v25, %v6277_v35 }
 0x448   : > { %v1420_v19 = vpop.permute.xlu1 %1419 }
 0x449   : > { %v1422_v30 = vpop.permute.xlu0 %1421 }
 0x44a   : > { %v1429_v36 = vsel %vm704_vm9, %v1420_v19, %v1422_v30  ;;  %vm7332_vm9 = vmmov %vm7323_vm1 }
 0x44b   : > { %2386 = vperm.xlu1 %4475, %v6130_v11   ;;  %v1437_v51 = vadd.f32 %v1429_v36, %v1377_v0  ;;  %v1438_v36 = vadd.f32 %v1430_v1, %v1378_v14 }
 0x44c   : > { %v1480_v20 = vpop.permute.xlu1 %1479 }
 0x44d   : > { %v1482_v44 = vpop.permute.xlu0 %1481  ;;  %v1498_v62 = vadd.f32 %v1490_v27, %v1438_v36 }
 0x44e   : > { %v1489_v8 = vsel %vm765_vm10, %v1480_v20, %v1482_v44  ;;  %vm7333_vm10 = vmmov %vm7323_vm1 }
 0x44f   : > { %4476 = vset.pattern.permute.xlu1 %v7324_v31  ;;  %v1497_v59 = vadd.f32 %v1489_v8, %v1437_v51  ;;  %v1558_v23 = vadd.f32 %v1550_v2, %v1498_v62 }
 0x450   : > { %v1540_v21 = vpop.permute.xlu1 %1539  ;;  %2350 = vperm.xlu1 %4476, %v6151_v17  }
 0x451   : > { %v1542_v42 = vpop.permute.xlu0 %1541 }
 0x452   : > { %v1549_v13 = vsel %vm826_vm11, %v1540_v21, %v1542_v42 }
 0x453   : > { %v1557_v56 = vadd.f32 %v1549_v13, %v1497_v59 }
 0x454   : > { %v1600_v24 = vpop.permute.xlu1 %1599  ;;  %2354 = vperm.xlu1 %4476, %v6166_v39  }
 0x455   : > { %v1602_v26 = vpop.permute.xlu0 %1601 }
 0x456   : > { %v1609_v4 = vsel %vm887_vm12, %v1600_v24, %v1602_v26  ;;  %v1610_v24 = vsel %vm887_vm12, %v6257_v6, %v6259_v29 }
 0x457   : > { %v1617_v30 = vadd.f32 %v1609_v4, %v1557_v56  ;;  %v1618_v20 = vadd.f32 %v1610_v24, %v1558_v23  ;;  %v3939_v56 = vld [vmem:[%s7084_s4 + $0x48] sm:$0xff] }
 0x458   : > { %v1660_v38 = vpop.permute.xlu1 %1659  ;;  %4478 = vset.pattern.permute.xlu1 %v7326_v63 }
 0x459   : > { %v1662_v54 = vpop.permute.xlu0 %1661  ;;  %2426 = vperm.xlu1 %4478, %v6130_v11   ;;  %v1678_v6 = vadd.f32 %v1670_v46, %v1618_v20 }
 0x45a   : > { %v1669_v22 = vsel %vm948_vm13, %v1660_v38, %v1662_v54  ;;  %vm2059_vm13 = vcmask 605264  }
 0x45b   : > { %v1677_v28 = vadd.f32 %v1669_v22, %v1617_v30 }
 0x45c   : > { %v1720_v61 = vpop.permute.xlu1 %1719 }
 0x45d   : > { %v1722_v32 = vpop.permute.xlu0 %1721  ;;  %4480 = vset.pattern.permute.xlu1 %v7328_v10 }
 0x45e   : > { %2462 = vperm.xlu1 %4480, %v6135_v48   ;;  %v1729_v26 = vsel %vm1009_vm14, %v1720_v61, %v1722_v32  ;;  %v1730_v48 = vsel %vm1009_vm14, %v6271_v37, %v6273_v34  ;;  %v3941_v61 = vld [vmem:[%s7084_s4 + $0x58] sm:$0xff] }
 0x45f   : > { %v1737_v42 = vadd.f32 %v1729_v26, %v1677_v28  ;;  %v1738_v0 = vadd.f32 %v1730_v48, %v1678_v6 }
 0x460   : > { %v1780_v44 = vpop.permute.xlu1 %1779 }
 0x461   : > { %v1782_v19 = vpop.permute.xlu0 %1781  ;;  %v1798_v8 = vadd.f32 %v1790_v53, %v1738_v0 }
 0x462   : > { %v1789_v43 = vsel %vm7330_vm7, %v1780_v44, %v1782_v19  ;;  %4481 = vset.pattern.permute.xlu1 %v7327_v47 }
 0x463   : > { %2394 = vperm.xlu1 %4481, %v6166_v39   ;;  %v1797_v29 = vadd.f32 %v1789_v43, %v1737_v42 }
 0x464   : > { %v1840_v60 = vpop.permute.xlu1 %1839 }
 0x465   : > { %v1842_v21 = vpop.permute.xlu0 %1841 }
 0x466   : > { %v1849_v50 = vsel %vm7332_vm9, %v1840_v60, %v1842_v21 }
 0x467   : > { %v1857_v7 = vadd.f32 %v1849_v50, %v1797_v29  ;;  %4483 = vset.pattern.permute.xlu1 %v7326_v63 }
 0x468   : > { %v1844_v34 = vpop.permute.xlu1 %1843  ;;  %2430 = vperm.xlu1 %4483, %v6151_v17  }
 0x469   : > { %v1886_v57 = vadd.f32 %v5702_v52, %v1857_v7  ;;  %v1846_v37 = vpop.permute.xlu0 %1845 }
 0x46a   : > { %v1850_v51 = vsel %vm7333_vm10, %v1844_v34, %v1846_v37  ;;  %v3938_v34 = vld [vmem:[%s7084_s4 + $0x40] sm:$0xff] }
 0x46b   : > { %v1858_v54 = vadd.f32 %v1850_v51, %v1798_v8  ;;  %vm1891_vm11 = vcmp.ge.f32.partialorder %v1886_v57, 0.0  ;;  %v1896_v38 = vmul.f32 %v6215_v9, %v1886_v57 }
 0x46c   : > { %2434 = vperm.xlu1 %4483, %v6166_v39  }
 0x46d   : > { %v1887_v35 = vadd.f32 %v5692_v45, %v1858_v54  ;;  %v1900_v25 = vsel %vm1891_vm11, %v1886_v57, %v1896_v38  ;;  %v3940_v38 = vld [vmem:[%s7084_s4 + $0x50] sm:$0xff] }
 0x46e   : > { %4130 = vmatprep.mubr.f32.mxu1 %v1900_v25 }
 0x46f   : > { %vm1892_vm12 = vcmp.ge.f32.partialorder %v1887_v35, 0.0  ;;  %v1897_v1 = vmul.f32 %v6215_v9, %v1887_v35 }
 0x470   : > { %4484 = vset.pattern.permute.xlu1 %v7328_v10 }
 0x471   : > { %v1901_v52 = vsel %vm1892_vm12, %v1887_v35, %v1897_v1  ;;  %2474 = vperm.xlu1 %4484, %v6166_v39  }
 0x472   : > { %4131 = vmatmul.mubr.f32.gmra.mrb[6].mxu1 %v1901_v52 }
 0x475   : > { %4486 = vset.pattern.permute.xlu1 %v7329_v15 }
 0x476   : > { %2080 = vperm.xlu1 %4486, %v6130_v11  }
 0x479   : > { %v6353_v45 = vpop.permute.xlu1 %2102 }
 0x47a   : > { %2085 = vperm.xlu1 %4486, %v6151_v17   ;;  %v2107_v30 = vpop.permute.xlu0 %2106 }
 0x47e   : > { %v6355_v13 = vpop.permute.xlu1 %2142 }
 0x47f   : > { %v2147_v24 = vpop.permute.xlu0 %2146 }
 0x483   : > { %v6357_v14 = vpop.permute.xlu1 %2110  ;;  %v6390_v23 = vpop.permute.xlu0 %2150 }
 0x487   : > { %v6359_v59 = vpop.permute.xlu1 %2114 }
 0x488   : > { %v2227_v19 = vpop.permute.xlu0 %2226 }
 0x48c   : > { %v6361_v9 = vpop.permute.xlu1 %2186 }
 0x48d   : > { %v6396_v46 = vpop.permute.xlu0 %2182 }
 0x491   : > { %v6363_v27 = vpop.permute.xlu1 %2222  ;;  %v6398_v20 = vpop.permute.xlu0 %2194 }
 0x496   : > { %v6365_v4 = vpop.permute.xlu1 %2154  ;;  %v6400_v48 = vpop.permute.xlu0 %2270 }
 0x49b   : > { %v6367_v39 = vpop.permute.xlu1 %2190  ;;  %v2347_v29 = vpop.permute.xlu0 %2346 }
 0x4a0   : > { %v6369_v36 = vpop.permute.xlu1 %2262  ;;  %v6406_v60 = vpop.permute.xlu0 %2302 }
 0x4a4   : > { %v6376_v32 = vpop.permute.xlu1 %2266  ;;  %v6408_v50 = vpop.permute.xlu0 %2314 }
 0x4a9   : > { %v6381_v2 = vpop.permute.xlu1 %2230  ;;  %v6410_v8 = vpop.permute.xlu0 %2422 }
 0x4ad   : > { %v6384_v22 = vpop.permute.xlu1 %2234 }
 0x4ae   : > { %v6419_v51 = vpop.permute.xlu0 %2390 }
 0x4b2   : > { %v6386_v62 = vpop.permute.xlu1 %2306 }
 0x4b3   : > { %v2467_v35 = vpop.permute.xlu0 %2466 }
 0x4b7   : > { %v6388_v26 = vpop.permute.xlu1 %2342  ;;  %v6429_v1 = vpop.permute.xlu0 %2470 }
 0x4bc   : > { %v6392_v28 = vpop.permute.xlu1 %2274 }
 0x4c1   : > { %v6394_v44 = vpop.permute.xlu1 %2310 }
 0x4c6   : > { %v2383_v43 = vpop.permute.xlu1 %2382 }
 0x4ca   : > { %v2387_v42 = vpop.permute.xlu1 %2386 }
 0x4cf   : > { %v6402_v6 = vpop.permute.xlu1 %2350 }
 0x4d3   : > { %v6404_v21 = vpop.permute.xlu1 %2354 }
 0x4d8   : > { %v2427_v53 = vpop.permute.xlu1 %2426 }
 0x4dd   : > { %v2463_v0 = vpop.permute.xlu1 %2462 }
 0x4e2   : > { %v6413_v37 = vpop.permute.xlu1 %2394 }
 0x4e7   : > { %v6421_v54 = vpop.permute.xlu1 %2430 }
 0x4eb   : > { %v6426_v25 = vpop.permute.xlu1 %2434 }
 0x4f0   : > { %v6431_v52 = vpop.permute.xlu1 %2474 }
 0x4f6   : > { %v4129_v11 = vpop.f32.mrb[4].mxu1 }
 0x4f7   : > { %2049 = vrot.lane.b32.xlu0 %v4129_v11, %s4637_s12  ;;  %v2020_v17 = vpop.f32.mrb[5].mxu1  ;;  %v6433_v11 = vpop.permute.xlu0 %2075 }
 0x4f8   : > { %2047 = vrot.lane.b32.xlu1 %v2020_v17, %s4637_s12  ;;  %v6435_v17 = vpop.permute.xlu1 %2080 }
 0x4fb   : > { %2513 = vperm.xlu0 %4485, %v3939_v56   ;;  %v6437_v56 = vpop.permute.xlu0 %2090 }
 0x4ff   : > { %2523 = vperm.xlu0 %4485, %v3941_v61   ;;  %v6439_v61 = vpop.permute.xlu1 %2085 }
 0x503   : > { %4488 = vset.pattern.permute.xlu0 %v7316_v33 }
 0x545   : > { %v4132_v7 = vpop.f32.mrb[6].mxu1 }
 0x546   : > { %2053 = vrot.lane.b32.xlu1 %v4132_v7, %s4637_s12  ;;  %v2030_v57 = vpop.f32.mrb[7].mxu1 }
 0x54a   : > { %2051 = vrot.lane.b32.xlu1 %v2030_v57, %s4637_s12 }
 0x54e   : > { %2508 = vperm.xlu1 %4486, %v3938_v34  }
 0x552   : > { %2518 = vperm.xlu1 %4486, %v3940_v38  }
 0x556   : > { %4487 = vset.pattern.permute.xlu1 %v7316_v33 }
 0x569   : > { %v2050_v7 = vpop.permute.xlu0 %2049 }
 0x56a   : > { %2061 = vst.msk [vmem:[#allocation4 + $0x8] sm:$0xff] %vm2059_vm13, %v2050_v7  ;;  %v2048_v57 = vpop.permute.xlu1 %2047 }
 0x56b   : > { %2060 = vst.msk [vmem:[#allocation4] sm:$0xff] %vm2059_vm13, %v2048_v57 }
 0x571   : > { %v6443_v34 = vld [vmem:[#allocation4 + $0x8] sm:$0xff] }
 0x572   : > { %v6445_v38 = vld [vmem:[#allocation4] sm:$0xff]  ;;  %v2118_v16 = vmul.f32 %v2107_v30, %v6443_v34  ;;  %v2158_v58 = vmul.f32 %v2147_v24, %v6443_v34  ;;  %v2198_v57 = vmul.f32 %v6361_v9, %v6443_v34  ;;  %v2398_v9 = vmul.f32 %v2387_v42, %v6443_v34 }
 0x573   : > { %v2117_v18 = vmul.f32 %v6353_v45, %v6445_v38  ;;  %v2157_v7 = vmul.f32 %v6355_v13, %v6445_v38  ;;  %v2397_v30 = vmul.f32 %v2383_v43, %v6445_v38  ;;  %v2318_v45 = vmul.f32 %v6386_v62, %v6443_v34 }
 0x574   : > { %2127 = vrot.lane.b32.xlu0 %v2118_v16, %s4638_s13  ;;  %v2477_v16 = vmul.f32 %v2463_v0, %v6445_v38  ;;  %v2358_v13 = vmul.f32 %v2347_v29, %v6443_v34  ;;  %v2438_v24 = vmul.f32 %v2427_v53, %v6443_v34  ;;  %v2197_v62 = vmul.f32 %v6396_v46, %v6445_v38 }
 0x575   : > { %2125 = vrot.lane.b32.xlu1 %v2117_v18, %s4638_s13  ;;  %v2238_v18 = vmul.f32 %v2227_v19, %v6443_v34  ;;  %v2237_v19 = vmul.f32 %v6363_v27, %v6445_v38  ;;  %v2277_v43 = vmul.f32 %v6369_v36, %v6445_v38  ;;  %v2317_v42 = vmul.f32 %v6406_v60, %v6445_v38 }
 0x576   : > { %v2357_v46 = vmul.f32 %v6388_v26, %v6445_v38  ;;  %v2437_v27 = vmul.f32 %v6410_v8, %v6445_v38 }
 0x578   : > { %2167 = vrot.lane.b32.xlu0 %v2158_v58, %s7174_s17  ;;  %v2278_v58 = vmul.f32 %v6376_v32, %v6443_v34  ;;  %v2478_v32 = vmul.f32 %v2467_v35, %v6443_v34 }
 0x579   : > { %2165 = vrot.lane.b32.xlu1 %v2157_v7, %s7174_s17 }
 0x57a   : > { %v6537_v7 = vpop.permute.xlu0 %2513 }
 0x57c   : > { %2207 = vrot.lane.b32.xlu0 %v2198_v57, %s7170_s18 }
 0x57d   : > { %2405 = vrot.lane.b32.xlu1 %v2397_v30, %s7270_s25 }
 0x57e   : > { %v6544_v57 = vpop.permute.xlu0 %2523 }
 0x580   : > { %2247 = vrot.lane.b32.xlu0 %v2238_v18, %s7172_s19 }
 0x581   : > { %2485 = vrot.lane.b32.xlu1 %v2477_v16, %s7272_s10 }
 0x584   : > { %2287 = vrot.lane.b32.xlu0 %v2278_v58, %s7334_s21 }
 0x588   : > { %2327 = vrot.lane.b32.xlu0 %v2318_v45, %s7335_s23 }
 0x58c   : > { %2367 = vrot.lane.b32.xlu0 %v2358_v13, %s7336_s24 }
 0x590   : > { %2407 = vrot.lane.b32.xlu0 %v2398_v9, %s7270_s25 }
 0x594   : > { %2447 = vrot.lane.b32.xlu0 %v2438_v24, %s7271_s26 }
 0x598   : > { %2487 = vrot.lane.b32.xlu0 %v2478_v32, %s7272_s10 }
 0x59c   : > { %2205 = vrot.lane.b32.xlu0 %v2197_v62, %s7170_s18 }
 0x5a0   : > { %2245 = vrot.lane.b32.xlu0 %v2237_v19, %s7172_s19 }
 0x5a4   : > { %2285 = vrot.lane.b32.xlu0 %v2277_v43, %s7334_s21  ;;  %v2094_v43 = vmul.f32 %v6435_v17, %v6443_v34  ;;  %v2093_v17 = vmul.f32 %v6433_v11, %v6445_v38 }
 0x5a8   : > { %2325 = vrot.lane.b32.xlu0 %v2317_v42, %s7335_s23 }
 0x5ac   : > { %2365 = vrot.lane.b32.xlu0 %v2357_v46, %s7336_s24 }
 0x5b0   : > { %2445 = vrot.lane.b32.xlu0 %v2437_v27, %s7271_s26 }
 0x5b8   : > { %v2054_v29 = vpop.permute.xlu1 %2053 }
 0x5b9   : > { %2063 = vst.msk [vmem:[#allocation4 + $0x18] sm:$0xff] %vm2059_vm13, %v2054_v29  ;;  %v6604_v29 = vld [vmem:[%s7083_s3 + $0x78] sm:$0xff] }
 0x5bc   : > { %v2052_v36 = vpop.permute.xlu1 %2051 }
 0x5bd   : > { %2062 = vst.msk [vmem:[#allocation4 + $0x10] sm:$0xff] %vm2059_vm13, %v2052_v36  ;;  %vm3147_vm13 = vcmask 261120  }
 0x5c0   : > { %v6500_v53 = vld [vmem:[#allocation4 + $0x18] sm:$0xff] }
 0x5c1   : > { %v2120_v60 = vmul.f32 %v6359_v59, %v6500_v53  ;;  %v2160_v0 = vmul.f32 %v6365_v4, %v6500_v53  ;;  %v2200_v35 = vmul.f32 %v6398_v20, %v6500_v53  ;;  %v2240_v4 = vmul.f32 %v6384_v22, %v6500_v53 }
 0x5c2   : > { %v2280_v20 = vmul.f32 %v6392_v28, %v6500_v53  ;;  %v2320_v22 = vmul.f32 %v6408_v50, %v6500_v53  ;;  %v2400_v28 = vmul.f32 %v6413_v37, %v6500_v53 }
 0x5c3   : > { %2131 = vrot.lane.b32.xlu1 %v2120_v60, %s4638_s13 }
 0x5c4   : > { %v6505_v26 = vld [vmem:[#allocation4 + $0x10] sm:$0xff] }
 0x5c5   : > { %v2319_v8 = vmul.f32 %v6394_v44, %v6505_v26  ;;  %v2399_v59 = vmul.f32 %v6419_v51, %v6505_v26  ;;  %v2440_v44 = vmul.f32 %v6426_v25, %v6500_v53  ;;  %v2480_v51 = vmul.f32 %v6431_v52, %v6500_v53 }
 0x5c6   : > { %v2360_v25 = vmul.f32 %v6404_v21, %v6500_v53  ;;  %v2119_v52 = vmul.f32 %v6357_v14, %v6505_v26  ;;  %v2159_v50 = vmul.f32 %v6390_v23, %v6505_v26  ;;  %v2199_v30 = vmul.f32 %v6367_v39, %v6505_v26 }
 0x5c7   : > { %2171 = vrot.lane.b32.xlu1 %v2160_v0, %s7174_s17  ;;  %2329 = vrot.lane.b32.xlu0 %v2319_v8, %s7335_s23  ;;  %v2239_v37 = vmul.f32 %v6381_v2, %v6505_v26  ;;  %v2279_v16 = vmul.f32 %v6400_v48, %v6505_v26  ;;  %v2359_v23 = vmul.f32 %v6402_v6, %v6505_v26  ;;  %v6567_v2 = vld [vmem:[%s7083_s3 + $0x68] sm:$0xff] }
 0x5c8   : > { %v2439_v39 = vmul.f32 %v6421_v54, %v6505_v26  ;;  %v2479_v48 = vmul.f32 %v6429_v1, %v6505_v26  ;;  %v6578_v54 = vld [vmem:[%s7083_s3 + $0x60] sm:$0xff]  ;;  %v6587_v1 = vld [vmem:[%s7083_s3 + $0x70] sm:$0xff] }
 0x5cb   : > { %2211 = vrot.lane.b32.xlu1 %v2200_v35, %s7170_s18  ;;  %2409 = vrot.lane.b32.xlu0 %v2399_v59, %s7270_s25 }
 0x5cd   : > { %v6581_v9 = vpop.permute.xlu1 %2508 }
 0x5cf   : > { %2251 = vrot.lane.b32.xlu1 %v2240_v4, %s7172_s19  ;;  %2451 = vrot.lane.b32.xlu0 %v2440_v44, %s7271_s26 }
 0x5d1   : > { %v6591_v62 = vpop.permute.xlu1 %2518 }
 0x5d3   : > { %2291 = vrot.lane.b32.xlu1 %v2280_v20, %s7334_s21  ;;  %2491 = vrot.lane.b32.xlu0 %v2480_v51, %s7272_s10 }
 0x5d7   : > { %2331 = vrot.lane.b32.xlu1 %v2320_v22, %s7335_s23  ;;  %2709 = vperm.xlu0 %4488, %v6567_v2  }
 0x5db   : > { %2371 = vrot.lane.b32.xlu1 %v2360_v25, %s7336_s24  ;;  %4490 = vset.pattern.permute.xlu0 %v7315_v41 }
 0x5dc   : > { %2749 = vperm.xlu0 %4490, %v6567_v2  }
 0x5df   : > { %2411 = vrot.lane.b32.xlu1 %v2400_v28, %s7270_s25 }
 0x5e0   : > { %2753 = vperm.xlu0 %4490, %v6587_v1  }
 0x5e3   : > { %2129 = vrot.lane.b32.xlu1 %v2119_v52, %s4638_s13 }
 0x5e4   : > { %4495 = vset.pattern.permute.xlu0 %v7317_v49 }
 0x5e5   : > { %2829 = vperm.xlu0 %4495, %v6567_v2  }
 0x5e6   : > { %v2128_v21 = vpop.permute.xlu0 %2127 }
 0x5e7   : > { %2169 = vrot.lane.b32.xlu1 %v2159_v50, %s7174_s17  ;;  %v2126_v42 = vpop.permute.xlu1 %2125  ;;  %v2138_v46 = vadd.f32 %v2128_v21, %v2094_v43  ;;  %s7339_s17 = smov 125  }
 0x5e8   : > { %v2137_v0 = vadd.f32 %v2126_v42, %v2093_v17  ;;  %v2096_v42 = vmul.f32 %v6437_v56, %v6500_v53 }
 0x5e9   : > { %4496 = vset.pattern.permute.xlu0 %v7318_v12 }
 0x5ea   : > { %v2168_v18 = vpop.permute.xlu0 %2167  ;;  %2785 = vperm.xlu0 %4496, %v6578_v54  }
 0x5eb   : > { %2209 = vrot.lane.b32.xlu1 %v2199_v30, %s7170_s18  ;;  %v2178_v36 = vadd.f32 %v2168_v18, %v2138_v46  ;;  %s3942_s18 = sld [smem:[#allocation6 + $0x3]] }
 0x5ee   : > { %v2208_v14 = vpop.permute.xlu0 %2207  ;;  %2797 = vperm.xlu0 %4496, %v6604_v29  }
 0x5ef   : > { %2249 = vrot.lane.b32.xlu1 %v2239_v37, %s7172_s19  ;;  %v2218_v34 = vadd.f32 %v2208_v14, %v2178_v36  ;;  %s7340_s19 = smov 124  }
 0x5f2   : > { %v2248_v58 = vpop.permute.xlu0 %2247  ;;  %4501 = vset.pattern.permute.xlu0 %v7322_v3 }
 0x5f3   : > { %2289 = vrot.lane.b32.xlu1 %v2279_v16, %s7334_s21  ;;  %v2258_v8 = vadd.f32 %v2248_v58, %v2218_v34  ;;  %2873 = vperm.xlu0 %4501, %v6587_v1  }
 0x5f6   : > { %v2288_v45 = vpop.permute.xlu0 %2287 }
 0x5f7   : > { %2369 = vrot.lane.b32.xlu1 %v2359_v23, %s7336_s24  ;;  %v2298_v59 = vadd.f32 %v2288_v45, %v2258_v8  ;;  %4504 = vset.pattern.permute.xlu0 %v7324_v31 }
 0x5f8   : > { %2949 = vperm.xlu0 %4504, %v6567_v2  }
 0x5fa   : > { %v2328_v13 = vpop.permute.xlu0 %2327 }
 0x5fb   : > { %2449 = vrot.lane.b32.xlu1 %v2439_v39, %s7271_s26  ;;  %v2338_v11 = vadd.f32 %v2328_v13, %v2298_v59  ;;  %v6625_v39 = vstv %s3942_s18 }
 0x5fc   : > { %4505 = vset.pattern.permute.xlu0 %v7325_v55 }
 0x5fd   : > { %2905 = vperm.xlu0 %4505, %v6578_v54  }
 0x5fe   : > { %v2368_v6 = vpop.permute.xlu0 %2367 }
 0x5ff   : > { %2489 = vrot.lane.b32.xlu1 %v2479_v48, %s7272_s10  ;;  %v2378_v20 = vadd.f32 %v2368_v6, %v2338_v11  ;;  %v7337_v6 = vmov 1.0|1.0  }
 0x601   : > { %2917 = vperm.xlu0 %4505, %v6604_v29  }
 0x602   : > { %v2408_v24 = vpop.permute.xlu0 %2407 }
 0x603   : > { %2705 = vperm.xlu1 %4487, %v6578_v54   ;;  %v2418_v25 = vadd.f32 %v2408_v24, %v2378_v20 }
 0x605   : > { %4509 = vset.pattern.permute.xlu0 %v7326_v63 }
 0x606   : > { %v2448_v32 = vpop.permute.xlu0 %2447  ;;  %3025 = vperm.xlu0 %4509, %v6578_v54  }
 0x607   : > { %4489 = vset.pattern.permute.xlu1 %v7315_v41  ;;  %v2458_v50 = vadd.f32 %v2448_v32, %v2418_v25 }
 0x608   : > { %2745 = vperm.xlu1 %4489, %v6578_v54  }
 0x60a   : > { %v2488_v19 = vpop.permute.xlu0 %2487  ;;  %4511 = vset.pattern.permute.xlu0 %v7327_v47 }
 0x60b   : > { %v2498_v18 = vadd.f32 %v2488_v19, %v2458_v50  ;;  %2993 = vperm.xlu0 %4511, %v6587_v1  }
 0x60c   : > { %4491 = vset.pattern.permute.xlu1 %v7316_v33  ;;  %v2166_v33 = vpop.permute.xlu1 %2165 }
 0x60d   : > { %2713 = vperm.xlu1 %4491, %v6587_v1   ;;  %v2177_v35 = vadd.f32 %v2166_v33, %v2137_v0  ;;  %v2527_v23 = vadd.f32 %v6537_v7, %v2498_v18  ;;  %v2095_v33 = vmul.f32 %v6439_v61, %v6505_v26 }
 0x60e   : > { %v2206_v27 = vpop.permute.xlu0 %2205 }
 0x60f   : > { %v2217_v44 = vadd.f32 %v2206_v27, %v2177_v35  ;;  %v2537_v13 = vmul.f32 %v6625_v39, %v2527_v23  ;;  %vm2532_vm3 = vcmp.ge.f32.partialorder %v2527_v23, 0.0  ;;  %4514 = vset.pattern.permute.xlu0 %v7328_v10 }
 0x610   : > { %v2406_v52 = vpop.permute.xlu1 %2405  ;;  %3069 = vperm.xlu0 %4514, %v6567_v2  }
 0x611   : > { %2717 = vperm.xlu1 %4491, %v6604_v29   ;;  %v2541_v7 = vsel %vm2532_vm3, %v2527_v23, %v2537_v13 }
 0x612   : > { %v2246_v60 = vpop.permute.xlu0 %2245 }
 0x613   : > { %v2257_v38 = vadd.f32 %v2246_v60, %v2217_v44 }
 0x614   : > { %v2486_v58 = vpop.permute.xlu1 %2485  ;;  %3073 = vperm.xlu0 %4514, %v6587_v1  }
 0x615   : > { %4492 = vset.pattern.permute.xlu1 %v7318_v12 }
 0x616   : > { %v2286_v4 = vpop.permute.xlu0 %2285  ;;  %2789 = vperm.xlu1 %4492, %v6567_v2  }
 0x617   : > { %v2297_v22 = vadd.f32 %v2286_v4, %v2257_v38 }
 0x618   : > { %4517 = vset.pattern.permute.xlu0 %v7329_v15 }
 0x619   : > { %2678 = vperm.xlu0 %4517, %v6578_v54  }
 0x61a   : > { %v2326_v51 = vpop.permute.xlu0 %2325  ;;  %4493 = vset.pattern.permute.xlu1 %v7317_v49 }
 0x61b   : > { %2825 = vperm.xlu1 %4493, %v6578_v54   ;;  %v2337_v28 = vadd.f32 %v2326_v51, %v2297_v22 }
 0x61e   : > { %v2366_v21 = vpop.permute.xlu0 %2365 }
 0x61f   : > { %v2377_v30 = vadd.f32 %v2366_v21, %v2337_v28  ;;  %4494 = vset.pattern.permute.xlu1 %v7315_v41 }
 0x620   : > { %2757 = vperm.xlu1 %4494, %v6604_v29  }
 0x621   : > { %v2417_v37 = vadd.f32 %v2406_v52, %v2377_v30 }
 0x622   : > { %v2446_v14 = vpop.permute.xlu0 %2445 }
 0x623   : > { %v2457_v16 = vadd.f32 %v2446_v14, %v2417_v37 }
 0x624   : > { %4497 = vset.pattern.permute.xlu1 %v7318_v12 }
 0x625   : > { %v2497_v45 = vadd.f32 %v2486_v58, %v2457_v16  ;;  %2793 = vperm.xlu1 %4497, %v6587_v1  }
 0x627   : > { %v2526_v41 = vadd.f32 %v6581_v9, %v2497_v45 }
 0x629   : > { %vm2531_vm14 = vcmp.ge.f32.partialorder %v2526_v41, 0.0  ;;  %v2536_v48 = vmul.f32 %v6625_v39, %v2526_v41  ;;  %4498 = vset.pattern.permute.xlu1 %v7322_v3 }
 0x62a   : > { %2865 = vperm.xlu1 %4498, %v6578_v54  }
 0x62b   : > { %v2540_v12 = vsel %vm2531_vm14, %v2526_v41, %v2536_v48 }
 0x62c   : > { %4149 = vmatprep.mubr.msk.f32.mxu0 %vm2544_vm15, %v2540_v12  ;;  %v3960_v12 = vld [vmem:[%s7084_s4 + $0x68] sm:$0xff] }
 0x62d   : > { %4150 = vmatmul.mubr.msk.f32.vlgmr.msra.gmra.mrb[0].mxu0 %vm2544_vm15, %v2541_v7 }
 0x62e   : > { %2869 = vperm.xlu1 %4498, %v6567_v2   ;;  %4281 = vmatpush3.bf16.msk.msra.mxu0 %vm5798_vm5, %v7337_v6 }
 0x62f   : > { %4283 = vmatprep.subr.msk.bf16.mxu0 %vm5806_vm0, %v7337_v6 }
 0x632   : > { %4499 = vset.pattern.permute.xlu1 %v7317_v49  ;;  %4285 = vmatpush3.bf16.msk.msra.mxu0 %vm5806_vm0, %v7337_v6 }
 0x633   : > { %2833 = vperm.xlu1 %4499, %v6587_v1  }
 0x635   : > { %v2132_v9 = vpop.permute.xlu1 %2131 }
 0x637   : > { %2837 = vperm.xlu1 %4499, %v6604_v29  }
 0x639   : > { %v2172_v5 = vpop.permute.xlu1 %2171 }
 0x63b   : > { %4500 = vset.pattern.permute.xlu1 %v7325_v55 }
 0x63c   : > { %2909 = vperm.xlu1 %4500, %v6567_v2  }
 0x63d   : > { %v2212_v49 = vpop.permute.xlu1 %2211 }
 0x640   : > { %4502 = vset.pattern.permute.xlu1 %v7324_v31 }
 0x641   : > { %v2252_v24 = vpop.permute.xlu1 %2251  ;;  %2945 = vperm.xlu1 %4502, %v6578_v54  }
 0x645   : > { %v2292_v40 = vpop.permute.xlu1 %2291  ;;  %4503 = vset.pattern.permute.xlu1 %v7322_v3  ;;  %v2140_v3 = vadd.f32 %v2132_v9, %v2096_v42  ;;  %v3962_v9 = vld [vmem:[%s7084_s4 + $0x78] sm:$0xff] }
 0x646   : > { %2877 = vperm.xlu1 %4503, %v6604_v29  }
 0x647   : > { %v2180_v27 = vadd.f32 %v2172_v5, %v2140_v3 }
 0x649   : > { %v2332_v32 = vpop.permute.xlu1 %2331  ;;  %v2220_v17 = vadd.f32 %v2212_v49, %v2180_v27 }
 0x64a   : > { %4506 = vset.pattern.permute.xlu1 %v7325_v55  ;;  %v2330_v55 = vpop.permute.xlu0 %2329 }
 0x64b   : > { %2913 = vperm.xlu1 %4506, %v6587_v1   ;;  %v2260_v34 = vadd.f32 %v2252_v24, %v2220_v17 }
 0x64d   : > { %v2372_v19 = vpop.permute.xlu1 %2371  ;;  %v2300_v8 = vadd.f32 %v2292_v40, %v2260_v34 }
 0x64e   : > { %v2410_v56 = vpop.permute.xlu0 %2409 }
 0x64f   : > { %4507 = vset.pattern.permute.xlu1 %v7327_v47  ;;  %v2340_v35 = vadd.f32 %v2332_v32, %v2300_v8 }
 0x650   : > { %2985 = vperm.xlu1 %4507, %v6578_v54  }
 0x651   : > { %v2412_v43 = vpop.permute.xlu1 %2411  ;;  %v2380_v4 = vadd.f32 %v2372_v19, %v2340_v35 }
 0x652   : > { %v2452_v61 = vpop.permute.xlu0 %2451 }
 0x653   : > { %v2420_v11 = vadd.f32 %v2412_v43, %v2380_v4 }
 0x654   : > { %2989 = vperm.xlu1 %4507, %v6567_v2  }
 0x655   : > { %v2130_v46 = vpop.permute.xlu1 %2129  ;;  %v2460_v51 = vadd.f32 %v2452_v61, %v2420_v11  ;;  %v3961_v11 = vld [vmem:[%s7084_s4 + $0x70] sm:$0xff] }
 0x656   : > { %v2139_v0 = vadd.f32 %v2130_v46, %v2095_v33  ;;  %v2492_v28 = vpop.permute.xlu0 %2491 }
 0x657   : > { %v2500_v50 = vadd.f32 %v2492_v28, %v2460_v51 }
 0x658   : > { %4508 = vset.pattern.permute.xlu1 %v7324_v31 }
 0x659   : > { %v2170_v36 = vpop.permute.xlu1 %2169  ;;  %2953 = vperm.xlu1 %4508, %v6587_v1   ;;  %v2529_v18 = vadd.f32 %v6544_v57, %v2500_v50 }
 0x65a   : > { %v2179_v53 = vadd.f32 %v2170_v36, %v2139_v0  ;;  %v2710_v24 = vpop.permute.xlu0 %2709 }
 0x65b   : > { %v2539_v16 = vmul.f32 %v6625_v39, %v2529_v18  ;;  %vm2534_vm5 = vcmp.ge.f32.partialorder %v2529_v18, 0.0 }
 0x65d   : > { %v2210_v60 = vpop.permute.xlu1 %2209  ;;  %2957 = vperm.xlu1 %4508, %v6604_v29  }
 0x65e   : > { %v2219_v31 = vadd.f32 %v2210_v60, %v2179_v53 }
 0x661   : > { %v2250_v59 = vpop.permute.xlu1 %2249  ;;  %4510 = vset.pattern.permute.xlu1 %v7326_v63 }
 0x662   : > { %3029 = vperm.xlu1 %4510, %v6567_v2   ;;  %v2259_v44 = vadd.f32 %v2250_v59, %v2219_v31  ;;  %v3959_v31 = vld [vmem:[%s7084_s4 + $0x60] sm:$0xff] }
 0x665   : > { %v2290_v38 = vpop.permute.xlu1 %2289 }
 0x666   : > { %v2299_v26 = vadd.f32 %v2290_v38, %v2259_v44  ;;  %4512 = vset.pattern.permute.xlu1 %v7328_v10 }
 0x667   : > { %3065 = vperm.xlu1 %4512, %v6578_v54  }
 0x668   : > { %v2339_v20 = vadd.f32 %v2330_v55, %v2299_v26 }
 0x669   : > { %v2370_v22 = vpop.permute.xlu1 %2369 }
 0x66a   : > { %v2379_v25 = vadd.f32 %v2370_v22, %v2339_v20 }
 0x66b   : > { %4513 = vset.pattern.permute.xlu1 %v7327_v47 }
 0x66c   : > { %v2419_v52 = vadd.f32 %v2410_v56, %v2379_v25  ;;  %2997 = vperm.xlu1 %4513, %v6604_v29  }
 0x66d   : > { %v2450_v21 = vpop.permute.xlu1 %2449 }
 0x66e   : > { %v2459_v30 = vadd.f32 %v2450_v21, %v2419_v52 }
 0x670   : > { %4515 = vset.pattern.permute.xlu1 %v7326_v63  ;;  %v2543_v63 = vsel %vm2534_vm5, %v2529_v18, %v2539_v16 }
 0x671   : > { %v2490_v37 = vpop.permute.xlu1 %2489  ;;  %3033 = vperm.xlu1 %4515, %v6587_v1  }
 0x672   : > { %v2499_v54 = vadd.f32 %v2490_v37, %v2459_v30 }
 0x674   : > { %v2528_v14 = vadd.f32 %v6591_v62, %v2499_v54 }
 0x675   : > { %3037 = vperm.xlu1 %4515, %v6604_v29  }
 0x676   : > { %vm2533_vm0 = vcmp.ge.f32.partialorder %v2528_v14, 0.0  ;;  %v2538_v47 = vmul.f32 %v6625_v39, %v2528_v14 }
 0x678   : > { %v2542_v58 = vsel %vm2533_vm0, %v2528_v14, %v2538_v47  ;;  %vm7346_vm0 = vcmask 130048  }
 0x679   : > { %4152 = vmatprep.mubr.msk.f32.mxu0 %vm2544_vm15, %v2542_v58  ;;  %4516 = vset.pattern.permute.xlu1 %v7328_v10  ;;  %vm7347_vm5 = vmmov %vm7346_vm0 }
 0x67a   : > { %4153 = vmatmul.mubr.msk.f32.gmra.mrb[2].mxu0 %vm2544_vm15, %v2543_v63  ;;  %3077 = vperm.xlu1 %4516, %v6604_v29  }
 0x67e   : > { %4518 = vset.pattern.permute.xlu1 %v7329_v15 }
 0x67f   : > { %2683 = vperm.xlu1 %4518, %v6567_v2  }
 0x682   : > { %v6696_v57 = vpop.permute.xlu1 %2705 }
 0x683   : > { %2688 = vperm.xlu1 %4518, %v6587_v1  }
 0x687   : > { %v6698_v62 = vpop.permute.xlu1 %2745 }
 0x68c   : > { %v6700_v23 = vpop.permute.xlu1 %2713 }
 0x690   : > { %v6702_v45 = vpop.permute.xlu1 %2717 }
 0x695   : > { %v6704_v39 = vpop.permute.xlu1 %2789 }
 0x69a   : > { %v6706_v10 = vpop.permute.xlu1 %2825 }
 0x69f   : > { %v6708_v41 = vpop.permute.xlu1 %2757 }
 0x6a4   : > { %v6710_v13 = vpop.permute.xlu1 %2793 }
 0x6a9   : > { %v6712_v15 = vpop.permute.xlu1 %2865 }
 0x6ad   : > { %v6716_v48 = vpop.permute.xlu1 %2869 }
 0x6b2   : > { %v6722_v7 = vpop.permute.xlu1 %2833 }
 0x6b6   : > { %v6727_v5 = vpop.permute.xlu1 %2837 }
 0x6bb   : > { %v6729_v49 = vpop.permute.xlu1 %2909 }
 0x6c0   : > { %v6731_v40 = vpop.permute.xlu1 %2945 }
 0x6c5   : > { %v6733_v32 = vpop.permute.xlu1 %2877 }
 0x6ca   : > { %v6737_v43 = vpop.permute.xlu1 %2913 }
 0x6cf   : > { %v2986_v46 = vpop.permute.xlu1 %2985 }
 0x6d3   : > { %v2990_v27 = vpop.permute.xlu1 %2989 }
 0x6d8   : > { %v6743_v55 = vpop.permute.xlu1 %2953 }
 0x6dc   : > { %v6747_v33 = vpop.permute.xlu1 %2957 }
 0x6e1   : > { %v3030_v60 = vpop.permute.xlu1 %3029 }
 0x6e6   : > { %v3066_v8 = vpop.permute.xlu1 %3065 }
 0x6eb   : > { %v6754_v59 = vpop.permute.xlu1 %2997 }
 0x6f0   : > { %v6760_v44 = vpop.permute.xlu1 %3033 }
 0x6f4   : > { %v6767_v61 = vpop.permute.xlu1 %3037 }
 0x6f9   : > { %v6769_v20 = vpop.permute.xlu1 %3077 }
 0x6fe   : > { %v6773_v22 = vpop.permute.xlu1 %2683 }
 0x700   : > { %v4151_v2 = vpop.f32.mrb[0].mxu0 }
 0x701   : > { %2652 = vrot.lane.b32.xlu0 %v4151_v2, %s4637_s12  ;;  %v2623_v1 = vpop.f32.mrb[1].mxu0 }
 0x702   : > { %2650 = vrot.lane.b32.xlu1 %v2623_v1, %s4637_s12  ;;  %v6777_v28 = vpop.permute.xlu1 %2688 }
 0x705   : > { %2693 = vperm.xlu0 %4517, %v6604_v29   ;;  %v2750_v29 = vpop.permute.xlu0 %2749 }
 0x709   : > { %3116 = vperm.xlu0 %4517, %v3960_v12   ;;  %v6735_v19 = vpop.permute.xlu0 %2753 }
 0x70d   : > { %3126 = vperm.xlu0 %4517, %v3962_v9   ;;  %v2830_v42 = vpop.permute.xlu0 %2829 }
 0x711   : > { %v6739_v3 = vpop.permute.xlu0 %2785 }
 0x715   : > { %v6741_v36 = vpop.permute.xlu0 %2797 }
 0x719   : > { %v6745_v17 = vpop.permute.xlu0 %2873 }
 0x71d   : > { %v2950_v34 = vpop.permute.xlu0 %2949 }
 0x721   : > { %v6749_v0 = vpop.permute.xlu0 %2905 }
 0x725   : > { %v6752_v35 = vpop.permute.xlu0 %2917 }
 0x729   : > { %v3026_v4 = vpop.permute.xlu0 %3025 }
 0x72d   : > { %v6765_v38 = vpop.permute.xlu0 %2993 }
 0x731   : > { %v3070_v26 = vpop.permute.xlu0 %3069 }
 0x735   : > { %v6771_v51 = vpop.permute.xlu0 %3073 }
 0x739   : > { %v6775_v25 = vpop.permute.xlu0 %2678 }
 0x74d   : > { %v4154_v56 = vpop.f32.mrb[2].mxu0 }
 0x74e   : > { %2656 = vrot.lane.b32.xlu1 %v4154_v56, %s4637_s12  ;;  %v2633_v53 = vpop.f32.mrb[3].mxu0 }
 0x752   : > { %2654 = vrot.lane.b32.xlu1 %v2633_v53, %s4637_s12 }
 0x756   : > { %3111 = vperm.xlu1 %4518, %v3959_v31  }
 0x75a   : > { %3121 = vperm.xlu1 %4518, %v3961_v11  }
 0x773   : > { %v2653_v52 = vpop.permute.xlu0 %2652 }
 0x774   : > { %2664 = vst.msk [vmem:[#allocation5 + $0x8] sm:$0xff] %vm2662_vm4, %v2653_v52  ;;  %v2651_v50 = vpop.permute.xlu1 %2650 }
 0x775   : > { %2663 = vst.msk [vmem:[#allocation5] sm:$0xff] %vm2662_vm4, %v2651_v50  ;;  %v7342_v50 = vld [vmem:[#allocation40_spill] sm:$0xff] }
 0x77b   : > { %v6781_v21 = vld [vmem:[#allocation5 + $0x8] sm:$0xff] }
 0x77c   : > { %v6783_v30 = vld [vmem:[#allocation5] sm:$0xff]  ;;  %v2721_v18 = vmul.f32 %v2710_v24, %v6781_v21  ;;  %v2761_v54 = vmul.f32 %v2750_v29, %v6781_v21  ;;  %v2801_v16 = vmul.f32 %v6704_v39, %v6781_v21  ;;  %v2841_v58 = vmul.f32 %v2830_v42, %v6781_v21 }
 0x77d   : > { %v2720_v37 = vmul.f32 %v6696_v57, %v6783_v30  ;;  %v2760_v14 = vmul.f32 %v6698_v62, %v6783_v30  ;;  %v3000_v47 = vmul.f32 %v2986_v46, %v6783_v30  ;;  %v3080_v63 = vmul.f32 %v3066_v8, %v6783_v30 }
 0x77e   : > { %2730 = vrot.lane.b32.xlu0 %v2721_v18, %s4638_s13  ;;  %v2881_v57 = vmul.f32 %v6716_v48, %v6781_v21  ;;  %v2921_v62 = vmul.f32 %v6729_v49, %v6781_v21  ;;  %v2961_v39 = vmul.f32 %v2950_v34, %v6781_v21  ;;  %v3001_v2 = vmul.f32 %v2990_v27, %v6781_v21 }
 0x77f   : > { %2728 = vrot.lane.b32.xlu1 %v2720_v37, %s4638_s13  ;;  %v3041_v1 = vmul.f32 %v3030_v60, %v6781_v21  ;;  %v3081_v48 = vmul.f32 %v3070_v26, %v6781_v21  ;;  %v2800_v12 = vmul.f32 %v6739_v3, %v6783_v30  ;;  %v2840_v9 = vmul.f32 %v6706_v10, %v6783_v30  ;;  %v7343_v37 = vld [vmem:[#allocation42_spill] sm:$0xff] }
 0x780   : > { %v2880_v49 = vmul.f32 %v6712_v15, %v6783_v30  ;;  %v2920_v24 = vmul.f32 %v6749_v0, %v6783_v30  ;;  %v2960_v29 = vmul.f32 %v6731_v40, %v6783_v30  ;;  %v3040_v42 = vmul.f32 %v3026_v4, %v6783_v30 }
 0x781   : > { %v3245_v18 = vmul.u32 2, %v7342_v50 }
 0x782   : > { %2770 = vrot.lane.b32.xlu0 %v2761_v54, %s7338_s20 }
 0x783   : > { %2768 = vrot.lane.b32.xlu1 %v2760_v14, %s7338_s20  ;;  %v3247_v14 = vsub.s32 %v7343_v37, %v3245_v18 }
 0x784   : > { %v6871_v8 = vpop.permute.xlu0 %2693 }
 0x785   : > { %vm3249_vm7 = vcmp.eq.s32.totalorder %v3247_v14, 0  ;;  %vm3251_vm8 = vcmp.eq.s32.totalorder %v3247_v14, 1 }
 0x786   : > { %2810 = vrot.lane.b32.xlu0 %v2801_v16, %s7339_s17  ;;  %vm3253_vm9 = vmor %vm3249_vm7, %vm3251_vm8 }
 0x787   : > { %3008 = vrot.lane.b32.xlu1 %v3000_v47, %s7270_s25 }
 0x788   : > { %v6878_v53 = vpop.permute.xlu0 %3116 }
 0x78a   : > { %2850 = vrot.lane.b32.xlu0 %v2841_v58, %s7340_s19 }
 0x78b   : > { %3088 = vrot.lane.b32.xlu1 %v3080_v63, %s7272_s10 }
 0x78e   : > { %2890 = vrot.lane.b32.xlu0 %v2881_v57, %s7334_s21 }
 0x792   : > { %2930 = vrot.lane.b32.xlu0 %v2921_v62, %s7335_s23  ;;  %v2697_v62 = vmul.f32 %v6773_v22, %v6781_v21 }
 0x796   : > { %2970 = vrot.lane.b32.xlu0 %v2961_v39, %s7336_s24 }
 0x79a   : > { %3010 = vrot.lane.b32.xlu0 %v3001_v2, %s7270_s25 }
 0x79e   : > { %3050 = vrot.lane.b32.xlu0 %v3041_v1, %s7271_s26 }
 0x7a2   : > { %3090 = vrot.lane.b32.xlu0 %v3081_v48, %s7272_s10 }
 0x7a6   : > { %2808 = vrot.lane.b32.xlu0 %v2800_v12, %s7339_s17  ;;  %v2696_v12 = vmul.f32 %v6775_v25, %v6783_v30 }
 0x7aa   : > { %2848 = vrot.lane.b32.xlu0 %v2840_v9, %s7340_s19 }
 0x7ae   : > { %2888 = vrot.lane.b32.xlu0 %v2880_v49, %s7334_s21 }
 0x7b2   : > { %2928 = vrot.lane.b32.xlu0 %v2920_v24, %s7335_s23 }
 0x7b6   : > { %2968 = vrot.lane.b32.xlu0 %v2960_v29, %s7336_s24 }
 0x7ba   : > { %3048 = vrot.lane.b32.xlu0 %v3040_v42, %s7271_s26 }
 0x7c0   : > { %v2657_v10 = vpop.permute.xlu1 %2656 }
 0x7c1   : > { %2666 = vst.msk [vmem:[#allocation5 + $0x18] sm:$0xff] %vm2662_vm4, %v2657_v10 }
 0x7c4   : > { %v2655_v15 = vpop.permute.xlu1 %2654 }
 0x7c5   : > { %2665 = vst.msk [vmem:[#allocation5 + $0x10] sm:$0xff] %vm2662_vm4, %v2655_v15  ;;  %vm7348_vm4 = vmmov %vm7346_vm0 }
 0x7c8   : > { %v6837_v46 = vld [vmem:[#allocation5 + $0x18] sm:$0xff] }
 0x7c9   : > { %v2723_v3 = vmul.f32 %v6702_v45, %v6837_v46  ;;  %v2763_v27 = vmul.f32 %v6708_v41, %v6837_v46  ;;  %v2803_v60 = vmul.f32 %v6741_v36, %v6837_v46  ;;  %v2843_v41 = vmul.f32 %v6727_v5, %v6837_v46 }
 0x7ca   : > { %v2883_v36 = vmul.f32 %v6733_v32, %v6837_v46  ;;  %v3083_v0 = vmul.f32 %v6769_v20, %v6837_v46  ;;  %v2923_v5 = vmul.f32 %v6752_v35, %v6837_v46  ;;  %v2963_v56 = vmul.f32 %v6747_v33, %v6837_v46  ;;  %v6884_v35 = vpop.permute.xlu0 %3126  ;;  %v7341_v20 = vld [vmem:[#allocation48_spill] sm:$0xff] }
 0x7cb   : > { %2734 = vrot.lane.b32.xlu1 %v2723_v3, %s4638_s13  ;;  %v3003_v32 = vmul.f32 %v6754_v59, %v6837_v46 }
 0x7cc   : > { %v6842_v40 = vld [vmem:[#allocation5 + $0x10] sm:$0xff] }
 0x7cd   : > { %v2922_v34 = vmul.f32 %v6737_v43, %v6842_v40  ;;  %v3002_v45 = vmul.f32 %v6765_v38, %v6842_v40  ;;  %v3043_v43 = vmul.f32 %v6767_v61, %v6837_v46  ;;  %v2722_v31 = vmul.f32 %v6700_v23, %v6842_v40 }
 0x7ce   : > { %v2762_v4 = vmul.f32 %v6735_v19, %v6842_v40  ;;  %v2802_v59 = vmul.f32 %v6710_v13, %v6842_v40  ;;  %v2842_v38 = vmul.f32 %v6722_v7, %v6842_v40  ;;  %v2882_v61 = vmul.f32 %v6745_v17, %v6842_v40 }
 0x7cf   : > { %2774 = vrot.lane.b32.xlu1 %v2763_v27, %s7338_s20  ;;  %2932 = vrot.lane.b32.xlu0 %v2922_v34, %s7335_s23  ;;  %v2962_v26 = vmul.f32 %v6743_v55, %v6842_v40  ;;  %v3246_v13 = vmul.u32 2, %v7341_v20  ;;  %v3042_v7 = vmul.f32 %v6760_v44, %v6842_v40  ;;  %v3082_v55 = vmul.f32 %v6771_v51, %v6842_v40 }
 0x7d1   : > { %v3248_v54 = vsub.s32 %v7343_v37, %v3246_v13 }
 0x7d3   : > { %2814 = vrot.lane.b32.xlu1 %v2803_v60, %s7339_s17  ;;  %3012 = vrot.lane.b32.xlu0 %v3002_v45, %s7270_s25  ;;  %vm3250_vm1 = vcmp.eq.s32.totalorder %v3248_v54, 0  ;;  %vm3252_vm2 = vcmp.eq.s32.totalorder %v3248_v54, 1 }
 0x7d4   : > { %vm3254_vm6 = vmor %vm3250_vm1, %vm3252_vm2 }
 0x7d5   : > { %vm6911_vm10 = vmpackc.low %vm3254_vm6, %vm3253_vm9  ;;  %v3112_v51 = vpop.permute.xlu1 %3111 }
 0x7d6   : > { %4287 = vmatprep.subr.msk.bf16.mxu0 %vm6911_vm10, %v7337_v6  ;;  %4291 = vmatprep.subr.msk.bf16.mxu1 %vm6911_vm10, %v7337_v6  ;;  %vm7349_vm1 = vmmov %vm7346_vm0 }
 0x7d7   : > { %2854 = vrot.lane.b32.xlu1 %v2843_v41, %s7340_s19  ;;  %3054 = vrot.lane.b32.xlu0 %v3043_v43, %s7271_s26 }
 0x7d8   : > { %4293 = vmatpush3.bf16.msk.msra.mxu1 %vm6911_vm10, %v7337_v6 }
 0x7d9   : > { %v6924_v63 = vpop.permute.xlu1 %3121 }
 0x7db   : > { %2894 = vrot.lane.b32.xlu1 %v2883_v36, %s7334_s21  ;;  %3094 = vrot.lane.b32.xlu0 %v3083_v0, %s7272_s10 }
 0x7df   : > { %2934 = vrot.lane.b32.xlu1 %v2923_v5, %s7335_s23 }
 0x7e3   : > { %2974 = vrot.lane.b32.xlu1 %v2963_v56, %s7336_s24 }
 0x7e7   : > { %3014 = vrot.lane.b32.xlu1 %v3003_v32, %s7270_s25  ;;  %s4006_s25 = sshll.u32 %s4718_s9, 8 }
 0x7eb   : > { %2732 = vrot.lane.b32.xlu1 %v2722_v31, %s4638_s13  ;;  %s3963_s13 = sld [smem:[#allocation6 + $0x4]] }
 0x7ef   : > { %2772 = vrot.lane.b32.xlu1 %v2762_v4, %s7338_s20  ;;  %s310_s20 = sand.u32 1, %s4614_s28  }
 0x7f0   : > { %v2731_v33 = vpop.permute.xlu0 %2730  ;;  %s7039_s9 = scalar_lea.sflag [#allocation7], %s310_s20 }
 0x7f1   : > { %v2729_v39 = vpop.permute.xlu1 %2728  ;;  %v2741_v2 = vadd.f32 %v2731_v33, %v2697_v62 }
 0x7f2   : > { %v2740_v29 = vadd.f32 %v2729_v39, %v2696_v12  ;;  %v2698_v39 = vmul.f32 %v6777_v28, %v6842_v40 }
 0x7f3   : > { %2812 = vrot.lane.b32.xlu1 %v2802_v59, %s7339_s17  ;;  %s3901_s17 = sshll.u32 %s310_s20, 4 }
 0x7f4   : > { %v2771_v11 = vpop.permute.xlu0 %2770 }
 0x7f5   : > { %v2781_v48 = vadd.f32 %v2771_v11, %v2741_v2  ;;  %v2769_v9 = vpop.permute.xlu1 %2768 }
 0x7f6   : > { %v2780_v10 = vadd.f32 %v2769_v9, %v2740_v29 }
 0x7f7   : > { %2852 = vrot.lane.b32.xlu1 %v2842_v38, %s7340_s19  ;;  %v3138_v38 = vstv %s3963_s13  ;;  %s312_s19 = scalar_lea.vmem [#allocation9], %s3901_s17 }
 0x7f8   : > { %v2811_v23 = vpop.permute.xlu0 %2810  ;;  %s3821_s13 = sshll.u32 %s312_s19, 4  ;;  %s7031_s13 = int_to_ptr.vmem [resolvable:$true] %s3821_s13 }
 0x7f9   : > { %v2821_v49 = vadd.f32 %v2811_v23, %v2781_v48  ;;  %v3009_v0 = vpop.permute.xlu1 %3008  ;;  %s4556_s23 = scalar_lea.vmem %s7031_s13, 256 }
 0x7fa   : > { %p4557_p9 = scmp.ne.s32.totalorder %s7031_s13, %s4556_s23 }
 0x7fb   : > { %2892 = vrot.lane.b32.xlu1 %v2882_v61, %s7334_s21  ;;  %s7036_s21 = scalar_lea.hbm %s7088_s8, %s4006_s25 }
 0x7fc   : > { %v2851_v19 = vpop.permute.xlu0 %2850  ;;  %p4558_p10 = pnand %p4557_p9, %p4735_p5 }
 0x7fd   : > { %v2861_v42 = vadd.f32 %v2851_v19, %v2821_v49  ;;  %v3089_v59 = vpop.permute.xlu1 %3088 }
 0x7fe   : > { %p4559_p12 = pneg %p4558_p10 }
 0x7ff   : > { %2972 = vrot.lane.b32.xlu1 %v2962_v26, %s7336_s24  ;;  %s4649_s24 = smov [#allocation9]  }
 0x800   : > { %v2891_v52 = vpop.permute.xlu0 %2890 }
 0x801   : > { %v2901_v15 = vadd.f32 %v2891_v52, %v2861_v42 }
 0x803   : > { %3052 = vrot.lane.b32.xlu1 %v3042_v7, %s7271_s26 }
 0x804   : > { %v2931_v17 = vpop.permute.xlu0 %2930 }
 0x805   : > { %v2941_v34 = vadd.f32 %v2931_v17, %v2901_v15 }
 0x807   : > { %3092 = vrot.lane.b32.xlu1 %v3082_v55, %s7272_s10  ;;  %v2699_v55 = vmul.f32 %v6871_v8, %v6837_v46 }
 0x808   : > { %v2971_v44 = vpop.permute.xlu0 %2970 }
 0x809   : > { %v2981_v45 = vadd.f32 %v2971_v44, %v2941_v34 }
 0x80c   : > { %v3011_v47 = vpop.permute.xlu0 %3010 }
 0x80d   : > { %v3021_v43 = vadd.f32 %v3011_v47, %v2981_v45 }
 0x810   : > { %v3051_v58 = vpop.permute.xlu0 %3050 }
 0x811   : > { %v3061_v5 = vadd.f32 %v3051_v58, %v3021_v43 }
 0x814   : > { %v3091_v57 = vpop.permute.xlu0 %3090 }
 0x815   : > { %v3101_v32 = vadd.f32 %v3091_v57, %v3061_v5 }
 0x817   : > { %v3130_v11 = vadd.f32 %v6878_v53, %v3101_v32 }
 0x818   : > { %v2809_v1 = vpop.permute.xlu0 %2808 }
 0x819   : > { %v2820_v27 = vadd.f32 %v2809_v1, %v2780_v10  ;;  %v3140_v19 = vmul.f32 %v3138_v38, %v3130_v11  ;;  %vm3135_vm11 = vcmp.ge.f32.partialorder %v3130_v11, 0.0 }
 0x81b   : > { %v3144_v13 = vsel %vm3135_vm11, %v3130_v11, %v3140_v19 }
 0x81c   : > { %v2849_v24 = vpop.permute.xlu0 %2848 }
 0x81d   : > { %v2860_v60 = vadd.f32 %v2849_v24, %v2820_v27 }
 0x820   : > { %v2889_v3 = vpop.permute.xlu0 %2888 }
 0x821   : > { %v2900_v41 = vadd.f32 %v2889_v3, %v2860_v60 }
 0x824   : > { %v2929_v22 = vpop.permute.xlu0 %2928 }
 0x825   : > { %v2940_v36 = vadd.f32 %v2929_v22, %v2900_v41 }
 0x828   : > { %v2969_v25 = vpop.permute.xlu0 %2968 }
 0x829   : > { %v2980_v56 = vadd.f32 %v2969_v25, %v2940_v36 }
 0x82b   : > { %v3020_v31 = vadd.f32 %v3009_v0, %v2980_v56 }
 0x82c   : > { %v3049_v4 = vpop.permute.xlu0 %3048 }
 0x82d   : > { %v3060_v33 = vadd.f32 %v3049_v4, %v3020_v31 }
 0x82f   : > { %v3100_v23 = vadd.f32 %v3089_v59, %v3060_v33 }
 0x831   : > { %v3129_v61 = vadd.f32 %v3112_v51, %v3100_v23 }
 0x833   : > { %vm3134_vm12 = vcmp.ge.f32.partialorder %v3129_v61, 0.0  ;;  %v3139_v26 = vmul.f32 %v3138_v38, %v3129_v61 }
 0x835   : > { %v3143_v20 = vsel %vm3134_vm12, %v3129_v61, %v3139_v26  ;;  %v7350_v26 = vld [vmem:[#allocation54_spill] sm:$0xff] }
 0x836   : > { %4163 = vmatprep.mubr.msk.f32.mxu0 %vm3147_vm13, %v3143_v20  ;;  %v3374_v20 = vmul.u32 2, %v7350_v26 }
 0x837   : > { %4164 = vmatmul.mubr.msk.f32.vlgmr.msra.gmra.mrb[4].mxu0 %vm3147_vm13, %v3144_v13  ;;  %v7351_v13 = vld [vmem:[#allocation60_spill] sm:$0xff] }
 0x838   : > { %4289 = vmatpush3.bf16.msk.msra.mxu0 %vm6911_vm10, %v7337_v6 }
 0x839   : > { %4299 = vmatprep.subr.msk.bf16.mxu0 %vm6911_vm10, %v7337_v6 }
 0x83d   : > { %v2735_v53 = vpop.permute.xlu1 %2734 }
 0x83e   : > { %v2743_v51 = vadd.f32 %v2735_v53, %v2699_v55  ;;  %v3375_v53 = vmul.u32 2, %v7351_v13 }
 0x840   : > { %v3377_v16 = vsub.s32 %v7343_v37, %v3375_v53 }
 0x841   : > { %v2775_v52 = vpop.permute.xlu1 %2774  ;;  %v2933_v57 = vpop.permute.xlu0 %2932 }
 0x842   : > { %v2783_v47 = vadd.f32 %v2775_v52, %v2743_v51  ;;  %v3376_v52 = vsub.s32 %v7343_v37, %v3374_v20  ;;  %vm3379_vm6 = vcmp.eq.s32.totalorder %v3377_v16, 0  ;;  %vm3381_vm8 = vcmp.eq.s32.totalorder %v3377_v16, 1  ;;  %v3650_v16 = vld [vmem:[#allocation3 + $0x30] sm:$0xff] }
 0x844   : > { %vm3378_vm2 = vcmp.eq.s32.totalorder %v3376_v52, 0  ;;  %vm3380_vm7 = vcmp.eq.s32.totalorder %v3376_v52, 1  ;;  %v3676_v52 = vld [vmem:[%s7085_s5] sm:$0xff] }
 0x845   : > { %v2815_v7 = vpop.permute.xlu1 %2814  ;;  %v3013_v9 = vpop.permute.xlu0 %3012  ;;  %vm3382_vm9 = vmor %vm3378_vm2, %vm3380_vm7 }
 0x846   : > { %v2823_v62 = vadd.f32 %v2815_v7, %v2783_v47 }
 0x849   : > { %v2855_v50 = vpop.permute.xlu1 %2854  ;;  %v3055_v27 = vpop.permute.xlu0 %3054 }
 0x84a   : > { %v2863_v2 = vadd.f32 %v2855_v50, %v2823_v62  ;;  %v7352_v62 = vld [vmem:[#allocation41_spill] sm:$0xff] }
 0x84d   : > { %v2895_v18 = vpop.permute.xlu1 %2894  ;;  %v3095_v28 = vpop.permute.xlu0 %3094 }
 0x84e   : > { %v2903_v12 = vadd.f32 %v2895_v18, %v2863_v2  ;;  %v7353_v2 = vld [vmem:[#allocation45_spill] sm:$0xff] }
 0x851   : > { %v2935_v54 = vpop.permute.xlu1 %2934 }
 0x852   : > { %v2943_v24 = vadd.f32 %v2935_v54, %v2903_v12 }
 0x855   : > { %v2975_v17 = vpop.permute.xlu1 %2974 }
 0x856   : > { %v2983_v10 = vadd.f32 %v2975_v17, %v2943_v24 }
 0x859   : > { %v3015_v14 = vpop.permute.xlu1 %3014 }
 0x85a   : > { %v3023_v15 = vadd.f32 %v3015_v14, %v2983_v10 }
 0x85c   : > { %v3063_v45 = vadd.f32 %v3055_v27, %v3023_v15  ;;  %v3492_v15 = vld [vmem:[#allocation4 + $0x8] sm:$0xff] }
 0x85d   : > { %v2733_v44 = vpop.permute.xlu1 %2732 }
 0x85e   : > { %v2742_v48 = vadd.f32 %v2733_v44, %v2698_v39  ;;  %v3103_v36 = vadd.f32 %v3095_v28, %v3063_v45  ;;  %v3515_v39 = vmul.u32 2, %v7352_v62 }
 0x860   : > { %v3132_v25 = vadd.f32 %v6884_v35, %v3103_v36  ;;  %v3519_v24 = vsub.s32 %v7343_v37, %v3515_v39 }
 0x861   : > { %v2773_v58 = vpop.permute.xlu1 %2772 }
 0x862   : > { %v2782_v49 = vadd.f32 %v2773_v58, %v2742_v48  ;;  %v3142_v4 = vmul.f32 %v3138_v38, %v3132_v25  ;;  %vm3137_vm3 = vcmp.ge.f32.partialorder %v3132_v25, 0.0  ;;  %v7354_v48 = vld [vmem:[#allocation55_spill] sm:$0xff]  ;;  %vm3523_vm12 = vcmp.eq.s32.totalorder %v3519_v24, 0 }
 0x863   : > { %v3517_v12 = vmul.u32 2, %v7354_v48 }
 0x864   : > { %v3146_v11 = vsel %vm3137_vm3, %v3132_v25, %v3142_v4  ;;  %vm3527_vm3 = vcmp.eq.s32.totalorder %v3519_v24, 1 }
 0x865   : > { %v2813_v1 = vpop.permute.xlu1 %2812 }
 0x866   : > { %v2822_v42 = vadd.f32 %v2813_v1, %v2782_v49  ;;  %v3516_v1 = vmul.u32 2, %v7353_v2 }
 0x869   : > { %v2853_v29 = vpop.permute.xlu1 %2852 }
 0x86a   : > { %v2862_v8 = vadd.f32 %v2853_v29, %v2822_v42  ;;  %v3520_v29 = vsub.s32 %v7343_v37, %v3516_v1  ;;  %v3521_v42 = vsub.s32 %v7343_v37, %v3517_v12 }
 0x86d   : > { %v2893_v3 = vpop.permute.xlu1 %2892 }
 0x86e   : > { %v2902_v34 = vadd.f32 %v2893_v3, %v2862_v8 }
 0x870   : > { %v2942_v60 = vadd.f32 %v2933_v57, %v2902_v34  ;;  %v3491_v34 = vld [vmem:[#allocation4] sm:$0xff] }
 0x871   : > { %v2973_v22 = vpop.permute.xlu1 %2972 }
 0x872   : > { %v2982_v41 = vadd.f32 %v2973_v22, %v2942_v60  ;;  %v3494_v22 = vld [vmem:[#allocation4 + $0x18] sm:$0xff] }
 0x874   : > { %v3022_v43 = vadd.f32 %v3013_v9, %v2982_v41  ;;  %v7355_v9 = vld [vmem:[#allocation49_spill] sm:$0xff] }
 0x875   : > { %v3053_v0 = vpop.permute.xlu1 %3052  ;;  %v3518_v49 = vmul.u32 2, %v7355_v9 }
 0x876   : > { %v3062_v5 = vadd.f32 %v3053_v0, %v3022_v43  ;;  %v3493_v43 = vld [vmem:[#allocation4 + $0x10] sm:$0xff] }
 0x877   : > { %v3522_v10 = vsub.s32 %v7343_v37, %v3518_v49 }
 0x879   : > { %v3093_v56 = vpop.permute.xlu1 %3092  ;;  %vm3530_vm7 = vcmp.eq.s32.totalorder %v3522_v10, 1 }
 0x87a   : > { %v3102_v32 = vadd.f32 %v3093_v56, %v3062_v5 }
 0x87c   : > { %v3131_v31 = vadd.f32 %v6924_v63, %v3102_v32 }
 0x87e   : > { %v3141_v33 = vmul.f32 %v3138_v38, %v3131_v31  ;;  %vm3136_vm14 = vcmp.ge.f32.partialorder %v3131_v31, 0.0 }
 0x880   : > { %v3145_v59 = vsel %vm3136_vm14, %v3131_v31, %v3141_v33  ;;  %vm3524_vm14 = vcmp.eq.s32.totalorder %v3520_v29, 0 }
 0x881   : > { %4166 = vmatprep.mubr.msk.f32.mxu0 %vm3147_vm13, %v3145_v59  ;;  %v3646_v59 = vld [vmem:[#allocation3 + $0x10] sm:$0xff] }
 0x882   : > { %4167 = vmatmul.mubr.msk.f32.gmra.mrb[6].mxu0 %vm3147_vm13, %v3146_v11  ;;  %v3647_v11 = vld [vmem:[#allocation3 + $0x18] sm:$0xff] }
 0x90a   : > { %v4165_v23 = vpop.f32.mrb[4].mxu0 }
 0x90b   : > { %v3226_v61 = vpop.f32.mrb[5].mxu0 }
 0x90c   : > { %4173 = vmatprep.mubr.msk.f32.mxu0 %vm7346_vm0, %v3226_v61  ;;  %vm3528_vm0 = vcmp.eq.s32.totalorder %v3520_v29, 1 }
 0x90d   : > { %4174 = vmatmul.mubr.msk.f32.vlgmr.msra.gmra.mrb[8].mxu0 %vm7347_vm5, %v4165_v23  ;;  %vm3531_vm5 = vmor %vm3523_vm12, %vm3527_vm3 }
 0x90e   : > { %4301 = vmatpush3.bf16.msk.msra.mxu0 %vm6911_vm10, %v7337_v6  ;;  %vm3383_vm10 = vmor %vm3379_vm6, %vm3381_vm8  ;;  %vm3526_vm6 = vcmp.eq.s32.totalorder %v3522_v10, 0 }
 0x90f   : > { %vm4294_vm11 = vmpackc.low %vm3383_vm10, %vm3382_vm9 }
 0x910   : > { %4295 = vmatprep.subr.msk.bf16.mxu1 %vm4294_vm11, %v7337_v6  ;;  %4303 = vmatprep.subr.msk.bf16.mxu0 %vm4294_vm11, %v7337_v6  ;;  %vm3532_vm2 = vmor %vm3524_vm14, %vm3528_vm0 }
 0x911   : > { %4297 = vmatpush3.bf16.msk.msra.mxu1 %vm4294_vm11, %v7337_v6  ;;  %vm4306_vm8 = vmpackc.low %vm3532_vm2, %vm3531_vm5 }
 0x912   : > { %4305 = vmatpush3.bf16.msk.msra.mxu0 %vm4294_vm11, %v7337_v6  ;;  %vm3534_vm10 = vmor %vm3526_vm6, %vm3530_vm7 }
 0x913   : > { %4307 = vmatprep.subr.msk.bf16.mxu0 %vm4306_vm8, %v7337_v6 }
 0x916   : > { %4309 = vmatpush3.bf16.msk.msra.mxu0 %vm4306_vm8, %v7337_v6 }
 0x955   : > { %v4168_v35 = vpop.f32.mrb[6].mxu0 }
 0x956   : > { %v3236_v63 = vpop.f32.mrb[7].mxu0 }
 0x957   : > { %4176 = vmatprep.mubr.msk.f32.mxu0 %vm7348_vm4, %v3236_v63  ;;  %vm3525_vm4 = vcmp.eq.s32.totalorder %v3521_v42, 0  ;;  %v3644_v63 = vld [vmem:[#allocation3] sm:$0xff] }
 0x958   : > { %4177 = vmatmul.mubr.msk.f32.gmra.mrb[10].mxu0 %vm7349_vm1, %v4168_v35  ;;  %vm3529_vm1 = vcmp.eq.s32.totalorder %v3521_v42, 1 }
 0x959   : > { %vm3533_vm9 = vmor %vm3525_vm4, %vm3529_vm1 }
 0x95a   : > { %vm4310_vm11 = vmpackc.low %vm3534_vm10, %vm3533_vm9 }
 0x95b   : > { %4311 = vmatprep.subr.msk.bf16.mxu0 %vm4310_vm11, %v7337_v6 }
 0x95c   : > { %4313 = vmatpush3.bf16.msk.msra.mxu0 %vm4310_vm11, %v7337_v6 }
 0x9e0   : > { %v4175_v38 = vpop.f32.mrb[8].mxu0 }
 0x9e1   : > { %3360 = vrot.lane.b32.xlu0 %v4175_v38, %s4637_s12  ;;  %v3335_v19 = vpop.f32.mrb[9].mxu0  ;;  %v3645_v38 = vld [vmem:[#allocation3 + $0x8] sm:$0xff] }
 0x9e2   : > { %3358 = vrot.lane.b32.xlu1 %v3335_v19, %s4637_s12 }
 0xa2b   : > { %v4178_v7 = vpop.f32.mrb[10].mxu0 }
 0xa2c   : > { %3364 = vrot.lane.b32.xlu0 %v4178_v7, %s4637_s12  ;;  %v3345_v50 = vpop.f32.mrb[11].mxu0  ;;  %v3651_v7 = vld [vmem:[#allocation3 + $0x38] sm:$0xff] }
 0xa2d   : > { %3362 = vrot.lane.b32.xlu1 %v3345_v50, %s4637_s12 }
 0xa53   : > { %v3361_v18 = vpop.permute.xlu0 %3360 }
 0xa54   : > { %v3371_v54 = vadd.f32 %v3361_v18, %v6781_v21  ;;  %v3359_v17 = vpop.permute.xlu1 %3358 }
 0xa55   : > { %v3370_v14 = vadd.f32 %v3359_v17, %v6783_v30  ;;  %v3648_v17 = vld [vmem:[#allocation3 + $0x20] sm:$0xff] }
 0xa56   : > { %3392 = vrot.lane.b32.xlu0 %v3371_v54, %s7272_s10 }
 0xa57   : > { %3390 = vrot.lane.b32.xlu1 %v3370_v14, %s7272_s10  ;;  %v3649_v14 = vld [vmem:[#allocation3 + $0x28] sm:$0xff] }
 0xa9e   : > { %v3365_v55 = vpop.permute.xlu0 %3364 }
 0xa9f   : > { %v3373_v44 = vadd.f32 %v3365_v55, %v6837_v46  ;;  %v3363_v51 = vpop.permute.xlu1 %3362 }
 0xaa0   : > { %v3372_v47 = vadd.f32 %v3363_v51, %v6842_v40 }
 0xaa1   : > { %3396 = vrot.lane.b32.xlu0 %v3373_v44, %s7272_s10 }
 0xaa2   : > { %3394 = vrot.lane.b32.xlu1 %v3372_v47, %s7272_s10 }
 0xac8   : > { %v3393_v57 = vpop.permute.xlu0 %3392 }
 0xac9   : > { %v3391_v58 = vpop.permute.xlu1 %3390 }
 0xaca   : > { %4187 = vmatprep.mubr.msk.f32.mxu1 %vm3147_vm13, %v3391_v58 }
 0xacb   : > { %4188 = vmatmul.mubr.msk.f32.vlgmr.msra.gmra.mrb[8].mxu1 %vm3147_vm13, %v3393_v57  ;;  %v3679_v57 = vld [vmem:[%s7086_s6 + $0x8] sm:$0xff] }
 0xb13   : > { %v3397_v30 = vpop.permute.xlu0 %3396 }
 0xb14   : > { %v3395_v21 = vpop.permute.xlu1 %3394 }
 0xb15   : > { %4190 = vmatprep.mubr.msk.f32.mxu1 %vm3147_vm13, %v3395_v21  ;;  %v3678_v21 = vld [vmem:[%s7086_s6] sm:$0xff] }
 0xb16   : > { %4191 = vmatmul.mubr.msk.f32.gmra.mrb[10].mxu1 %vm3147_vm13, %v3397_v30 }
 0xb17   : > { %4223 = vmatprep.mubr.msk.f32.mxu1 %vm3147_vm13, %v3676_v52 }
 0xb9e   : > { %v4189_v46 = vpop.f32.mrb[8].mxu1 }
 0xb9f   : > { %3501 = vrot.lane.b32.xlu0 %v4189_v46, %s4637_s12  ;;  %v3472_v40 = vpop.f32.mrb[9].mxu1 }
 0xba0   : > { %3499 = vrot.lane.b32.xlu1 %v3472_v40, %s4637_s12 }
 0xbe9   : > { %v4192_v8 = vpop.f32.mrb[10].mxu1 }
 0xbea   : > { %3505 = vrot.lane.b32.xlu0 %v4192_v8, %s4637_s12  ;;  %v3482_v37 = vpop.f32.mrb[11].mxu1 }
 0xbeb   : > { %3503 = vrot.lane.b32.xlu1 %v3482_v37, %s4637_s12 }
 0xc11   : > { %v3502_v3 = vpop.permute.xlu0 %3501 }
 0xc12   : > { %v3512_v27 = vadd.f32 %v3502_v3, %v3492_v15  ;;  %v3500_v60 = vpop.permute.xlu1 %3499  ;;  %v3677_v3 = vld [vmem:[%s7085_s5 + $0x8] sm:$0xff] }
 0xc13   : > { %v3511_v45 = vadd.f32 %v3500_v60, %v3491_v34 }
 0xc14   : > { %3545 = vrot.lane.b32.xlu0 %v3512_v27, %s7272_s10 }
 0xc15   : > { %3543 = vrot.lane.b32.xlu1 %v3511_v45, %s7272_s10 }
 0xc5c   : > { %v3506_v41 = vpop.permute.xlu0 %3505 }
 0xc5d   : > { %v3514_v28 = vadd.f32 %v3506_v41, %v3494_v22  ;;  %v3504_v36 = vpop.permute.xlu1 %3503 }
 0xc5e   : > { %v3513_v0 = vadd.f32 %v3504_v36, %v3493_v43  ;;  %v4540_v36 = vld [vmem:[%s4783_s22] sm:$0xff] }
 0xc5f   : > { %3549 = vrot.lane.b32.xlu0 %v3514_v28, %s7272_s10  ;;  %v4539_v28 = vld [vmem:[%s4783_s22 + $0x8] sm:$0xff] }
 0xc60   : > { %3547 = vrot.lane.b32.xlu1 %v3513_v0, %s7272_s10 }
 0xc86   : > { %v3546_v5 = vpop.permute.xlu0 %3545 }
 0xc87   : > { %v3544_v6 = vpop.permute.xlu1 %3543 }
 0xc88   : > { %4209 = vmatprep.mubr.msk.f32.mxu0 %vm2544_vm15, %v3544_v6 }
 0xc89   : > { %4210 = vmatmul.mubr.msk.f32.vlgmr.msra.gmra.mrb[12].mxu0 %vm2544_vm15, %v3546_v5 }
 0xcd1   : > { %v3550_v56 = vpop.permute.xlu0 %3549 }
 0xcd2   : > { %v3548_v25 = vpop.permute.xlu1 %3547 }
 0xcd3   : > { %4212 = vmatprep.mubr.msk.f32.mxu0 %vm2544_vm15, %v3548_v25 }
 0xcd4   : > { %4213 = vmatmul.mubr.msk.f32.gmra.mrb[14].mxu0 %vm2544_vm15, %v3550_v56  ;;  %vm7356_vm15 = vcmask 965632  }
 0xcd5   : > { %vm7357_vm12 = vmmov %vm7356_vm15 }
 0xcd6   : > { %vm7358_vm14 = vmmov %vm7357_vm12 }
 0xcd7   : > { %vm7359_vm3 = vmmov %vm7357_vm12 }
 0xd5c   : > { %v4211_v32 = vpop.f32.mrb[12].mxu0 }
 0xd5d   : > { %3658 = vrot.lane.b32.xlu0 %v4211_v32, %s4637_s12  ;;  %v3625_v31 = vpop.f32.mrb[13].mxu0 }
 0xd5e   : > { %3656 = vrot.lane.b32.xlu1 %v3625_v31, %s4637_s12 }
 0xda7   : > { %v4214_v4 = vpop.f32.mrb[14].mxu0 }
 0xda8   : > { %3662 = vrot.lane.b32.xlu0 %v4214_v4, %s4637_s12  ;;  %v3635_v33 = vpop.f32.mrb[15].mxu0 }
 0xda9   : > { %3660 = vrot.lane.b32.xlu1 %v3635_v33, %s4637_s12 }
 0xdcf   : > { %v3659_v23 = vpop.permute.xlu0 %3658 }
 0xdd0   : > { %v3670_v61 = vadd.f32 %v3659_v23, %v3646_v59  ;;  %v3671_v35 = vadd.f32 %v3659_v23, %v3647_v11  ;;  %v3657_v19 = vpop.permute.xlu1 %3656 }
 0xdd1   : > { %v3668_v26 = vadd.f32 %v3657_v19, %v3644_v63  ;;  %v3669_v20 = vadd.f32 %v3657_v19, %v3645_v38 }
 0xdd2   : > { %v4519_v13 = vpack.i.bf16 %v3671_v35, %v3670_v61 }
 0xdd3   : > { %v4524_v53 = vpack.i.bf16 %v3669_v20, %v3668_v26 }
 0xdd4   : > { %4520 = vrot.lane.b32.xlu0 %v4519_v13, %s7272_s10 }
 0xdd5   : > { %4525 = vrot.lane.b32.xlu1 %v4524_v53, %s7272_s10 }
 0xe1a   : > { %v3663_v50 = vpop.permute.xlu0 %3662 }
 0xe1b   : > { %v3674_v18 = vadd.f32 %v3663_v50, %v3650_v16  ;;  %v3675_v54 = vadd.f32 %v3663_v50, %v3651_v7  ;;  %v3661_v55 = vpop.permute.xlu1 %3660 }
 0xe1c   : > { %v3672_v44 = vadd.f32 %v3661_v55, %v3648_v17  ;;  %v3673_v51 = vadd.f32 %v3661_v55, %v3649_v14 }
 0xe1d   : > { %v4534_v47 = vpack.i.bf16 %v3675_v54, %v3674_v18 }
 0xe1e   : > { %v4529_v58 = vpack.i.bf16 %v3673_v51, %v3672_v44 }
 0xe1f   : > { %4535 = vrot.lane.b32.xlu0 %v4534_v47, %s7272_s10 }
 0xe20   : > { %4530 = vrot.lane.b32.xlu1 %v4529_v58, %s7272_s10  ;;  %s4560_s10 = sshll.u32 %s4649_s24, 4  ;;  %s4561_s10 = int_to_ptr.vmem [resolvable:$false] %s4560_s10 }
 0xe21   : > { %s4562_s18 = scalar_lea.vmem %s4561_s10, 512  ;;  %p4563_p13 = scmp.lt.s32.totalorder %s7031_s13, %s4561_s10 }
 0xe22   : > { %p4564_p0 = scmp.lt.s32.totalorder %s4562_s18, %s4556_s23 }
 0xe23   : > { %3687 = vperm.xlu0 %4517, %v3679_v57  }
 0xe24   : > { %3682 = vperm.xlu1 %4518, %v3678_v21   ;;  %p4565_p1 = por %p4564_p0, %p4563_p13 }
 0xe26   : > { %p4566_p2 = pnand %p4565_p1, %p4559_p12 }
 0xe46   : > { %v4521_v30 = vpop.permute.xlu0 %4520 }
 0xe47   : > { %v4523_v46 = vunpack.i.h.bf16 %v4521_v30  ;;  %v4522_v40 = vunpack.i.l.bf16 %v4521_v30  ;;  %v4526_v62 = vpop.permute.xlu1 %4525 }
 0xe48   : > { %v4528_v39 = vunpack.i.h.bf16 %v4526_v62  ;;  %v4527_v2 = vunpack.i.l.bf16 %v4526_v62 }
 0xe49   : > { %v3715_v1 = vsel %vm7356_vm15, %v4522_v40, %v4523_v46 }
 0xe4a   : > { %v3714_v48 = vsel %vm7357_vm12, %v4527_v2, %v4528_v39 }
 0xe4b   : > { %v4314_v12 = vpack.c.bf16 %v3715_v1, %v3714_v48 }
 0xe4d   : > { %4315 = vmatprep.subr.bf16.mxu1 %v4314_v12 }
 0xe4e   : > { %4317 = vmatpush3.bf16.msra.mxu1 %v4314_v12 }
 0xe91   : > { %v4536_v9 = vpop.permute.xlu0 %4535 }
 0xe92   : > { %v4538_v49 = vunpack.i.h.bf16 %v4536_v9  ;;  %v4537_v24 = vunpack.i.l.bf16 %v4536_v9  ;;  %v4531_v29 = vpop.permute.xlu1 %4530 }
 0xe93   : > { %v4533_v42 = vunpack.i.h.bf16 %v4531_v29  ;;  %v4532_v10 = vunpack.i.l.bf16 %v4531_v29 }
 0xe94   : > { %v3717_v8 = vsel %vm7358_vm14, %v4537_v24, %v4538_v49 }
 0xe95   : > { %v3716_v37 = vsel %vm7359_vm3, %v4532_v10, %v4533_v42 }
 0xe96   : > { %v4318_v15 = vpack.c.bf16 %v3717_v8, %v3716_v37 }
 0xe98   : > { %4319 = vmatprep.subr.bf16.mxu1 %v4318_v15 }
 0xe99   : > { %4321 = vmatpush3.bf16.msra.mxu1 %v4318_v15 }
 0xe9c   : > { %4224 = vmatmul.mubr.msk.f32.vlgmr.msra.gmra.mrb[12].mxu1 %vm3147_vm13, %v3677_v3 }
 0xea2   : > { %v3688_v27 = vpop.permute.xlu0 %3687 }
 0xea3   : > { %v3683_v60 = vpop.permute.xlu1 %3682 }
 0xf6f   : > { %v4225_v34 = vpop.f32.mrb[12].mxu1 }
 0xf70   : > { %v3800_v45 = vadd.f32 %v4225_v34, %v3688_v27  ;;  %v3794_v22 = vpop.f32.mrb[13].mxu1 }
 0xf71   : > { %v3795_v41 = vadd.f32 %v3794_v22, %v3683_v60 }
 0xf72   : > { %v3804_v43 = vadd.f32 %v4539_v28, %v3800_v45 }
 0xf73   : > { %v3803_v0 = vadd.f32 %v4540_v36, %v3795_v41 }
 0xf74   : > { %3806 = vst [vmem:[%s312_s19 + $0x8] sm:$0xff] %v3804_v43 }
 0xf75   : > { %3805 = vst [vmem:[%s312_s19] sm:$0xff] %v3803_v0 }
 0xf76   : > { %4569 = shalt.err (!%p4566_p2)
}
 0xf77   : > { %s4570_s22 = scalar_lea.hbm %s7036_s21, 256  ;;  %s4574_s19 = scalar_lea.hbm %s7088_s8, 512 }
 0xf78   : > { %p4571_p3 = scmp.ne.s32.totalorder %s7036_s21, %s4570_s22  ;;  %p4575_p8 = scmp.lt.u32.totalorder %s7036_s21, %s7088_s8 }
 0xf79   : > { %p4576_p11 = scmp.lt.u32.totalorder %s4574_s19, %s4570_s22  ;;  %p4578_p10 = scmp.lt.u32.totalorder %s4570_s22, %s7036_s21 }
 0xf7a   : > { %p4572_p4 = pnand %p4571_p3, %p4735_p5 }
 0xf7b   : > { %p4577_p9 = por %p4576_p11, %p4575_p8 }
 0xf7c   : > { %p4573_p7 = pneg %p4572_p4 }
 0xf7d   : > { %p4579_p12 = por %p4578_p10, %p4577_p9 }
 0xf7f   : > { %p4580_p13 = pnand %p4579_p12, %p4573_p7 }
 0xf81   : > { %4583 = shalt.err (!%p4580_p13)
}
 0xf82   : > { %s4650_s12 = smov 128   ;;  %s4651_s23 = smov 8  }
 0xf83   : > { %4326 = dma.vmem_to_hbm [thread:$0]  (%p4735_p5), %s7031_s13, 256, %s7036_s21, %s7039_s9, %s4650_s12, %s4650_s12, %s4651_s23  }
 0xf84 PF: > { %p4338_p0 = scmp.ge.s32.totalorder %s4622_s30, 2  ;;  %s3836_s24 = sand.u32 1, %s4610_s27  }
 0xf85   : > { %s3837_s10 = scalar_lea.sflag [#allocation7], %s3836_s24 }
 0xf86   : > { %p4333_p1 = pnand %p4338_p0, %p4739_p6 }
 0xf88   : > { %4605 = dma.done.wait (!%p4333_p1), %s3837_s10, 256  }
 0xf89   : > { %4607 = vsyncadd (!%p4333_p1), %s3837_s10, 4294967040  ;;  %p19_p2 = scmp.ge.s32.totalorder %s4722_s11, 4   ;;  %s7360_s27 = smov %s4614_s28 }
 0xf8a   : > { %s7361_s28 = smov %s4618_s29  ;;  %s7362_s29 = smov %s4733_s14 }
 0xf8b   : > { %s7363_s30 = smov %s4722_s11  ;;  %21 = sbr.rel (!%p19_p2) target bundleno = 4 (0x4), region = 98 }
 0xf92   :  { %3842 = vsyncpa [#allocation7], 1 }
 0xf93   :  { %3844 = vsyncpa [#allocation7 + $0x1], 1 }
 0xf94   :  { %3845 = vsyncpa [#allocation8], 1 }
 0xf95   :  { %3847 = vsyncpa [#allocation8 + $0x1], 1 }

</bundles_post_ra>
